<compile_context>
chip_gen: v6e
topology: v6e:2x2x1
jax: 0.10.0
libtpu: 0.0.40
codegen_flags: <defaults>
</compile_context>

<pallas_src>
import functools
import math

import jax
import jax.numpy as jnp
from jax.experimental import pallas as pl
from jax.experimental.pallas import tpu as pltpu

_EPS = 1e-5
# Budget against v7x's 64 MiB physical / 32 MiB scoped VMEM (everything here is
# tiny, but keep the limit explicit so future tile growth stays visible).
_VMEM_LIMIT_BYTES = 32 * 1024 * 1024


# ----------------------------------------------------------------------------
# In-kernel helpers (operate on VMEM-resident values, f32 math)
# ----------------------------------------------------------------------------
def _ln(x, g, b, eps=_EPS):
    mu = jnp.mean(x, axis=-1, keepdims=True)
    var = jnp.mean(jnp.square(x - mu), axis=-1, keepdims=True)
    return (x - mu) * jax.lax.rsqrt(var + eps) * g + b


def _mha_core(q, k, v, wo_ref, bo, num_heads):
    """Multi-head softmax attention + output projection, fully in-kernel.

    q: [Nq, D], k/v: [Nk, D] with heads packed along the lane dim.
    concat_h(o_h) @ Wo == sum_h o_h @ Wo[h*d:(h+1)*d, :]  (no lane concat).
    """
    D = q.shape[-1]
    d = D // num_heads
    scale = 1.0 / math.sqrt(d)
    out = None
    for h in range(num_heads):
        sl = slice(h * d, (h + 1) * d)
        # Scale the smaller q tile before QK^T.
        s = jnp.einsum("qd,kd->qk", q[:, sl] * scale, k[:, sl],
                       preferred_element_type=jnp.float32)
        m = jnp.max(s, axis=-1, keepdims=True)
        p = jnp.exp(s - m)
        p = p * pl.reciprocal(jnp.sum(p, axis=-1, keepdims=True), approx=True)
        o_h = jnp.dot(p, v[:, sl], preferred_element_type=jnp.float32)   # [Nq, d]
        c = jnp.dot(o_h, wo_ref[h * d:(h + 1) * d, :],
                    preferred_element_type=jnp.float32)                   # [Nq, D]
        out = c if out is None else out + c
    return out + bo


def _ffn(x, w1, b1, w2, b2):
    h = jnp.dot(x, w1, preferred_element_type=jnp.float32) + b1
    h = jax.nn.gelu(h)   # tanh approx (EUP); see TODO(synk) above
    return jnp.dot(h, w2, preferred_element_type=jnp.float32) + b2


# ----------------------------------------------------------------------------
# Fused transformer block kernels (one pallas_call per block, grid over batch)
# ----------------------------------------------------------------------------
def _self_block_kernel(x_ref, ln1g_ref, ln1b_ref, wqkv_ref, bqkv_ref, wo_ref,
                       bo_ref, ln2g_ref, ln2b_ref, w1_ref, b1_ref, w2_ref,
                       b2_ref, o_ref, *, num_heads):
    x = x_ref[0].astype(jnp.float32)                                  # [N, D]
    D = x.shape[-1]
    h = _ln(x, ln1g_ref[...], ln1b_ref[...])
    qkv = jnp.dot(h, wqkv_ref[...], preferred_element_type=jnp.float32) + bqkv_ref[...]
    x = x + _mha_core(qkv[:, 0:D], qkv[:, D:2 * D], qkv[:, 2 * D:3 * D],
                      wo_ref, bo_ref[...], num_heads)
    h = _ln(x, ln2g_ref[...], ln2b_ref[...])
    h = _ffn(h, w1_ref[...], b1_ref[...], w2_ref[...], b2_ref[...])
    o_ref[0] = (x + h).astype(o_ref.dtype)


def _cross_block_kernel(x_ref, ctx_ref, lnqg_ref, lnqb_ref, lnkg_ref, lnkb_ref,
                        wq_ref, bq_ref, wkv_ref, bkv_ref, wo_ref, bo_ref,
                        ln2g_ref, ln2b_ref, w1_ref, b1_ref, w2_ref, b2_ref,
                        o_ref, *, num_heads):
    x = x_ref[0].astype(jnp.float32)                                  # [Nq, D]
    c = ctx_ref[0].astype(jnp.float32)                                # [Nk, D]
    D = x.shape[-1]
    hq = _ln(x, lnqg_ref[...], lnqb_ref[...])
    hk = _ln(c, lnkg_ref[...], lnkb_ref[...])
    q = jnp.dot(hq, wq_ref[...], preferred_element_type=jnp.float32) + bq_ref[...]
    kv = jnp.dot(hk, wkv_ref[...], preferred_element_type=jnp.float32) + bkv_ref[...]
    x = x + _mha_core(q, kv[:, 0:D], kv[:, D:2 * D], wo_ref, bo_ref[...], num_heads)
    h = _ln(x, ln2g_ref[...], ln2b_ref[...])
    h = _ffn(h, w1_ref[...], b1_ref[...], w2_ref[...], b2_ref[...])
    o_ref[0] = (x + h).astype(o_ref.dtype)


_SELF_PARAM_ORDER = ("ln1_g", "ln1_b", "wqkv", "bqkv", "wo", "bo",
                     "ln2_g", "ln2_b", "ffn_w1", "ffn_b1", "ffn_w2", "ffn_b2")
_CROSS_PARAM_ORDER = ("ln_q_g", "ln_q_b", "ln_kv_g", "ln_kv_b", "wq", "bq",
                      "wkv", "bkv", "wo", "bo", "ln2_g", "ln2_b",
                      "ffn_w1", "ffn_b1", "ffn_w2", "ffn_b2")


def transformer_block(x, p, num_heads):
    """Fused pre-norm self-attention block: one pallas_call, grid over batch."""
    B, N, D = x.shape
    params = [p[k] for k in _SELF_PARAM_ORDER]
    tok = lambda: pl.BlockSpec((1, N, D), lambda b: (b, 0, 0))
    par_specs = [pl.BlockSpec(a.shape, lambda b: (0, 0)) for a in params]
    return pl.pallas_call(
        functools.partial(_self_block_kernel, num_heads=num_heads),
        grid=(B,),
        in_specs=[tok()] + par_specs,
        out_specs=tok(),
        out_shape=jax.ShapeDtypeStruct((B, N, D), jnp.float32),
        compiler_params=pltpu.CompilerParams(
            dimension_semantics=("parallel",),
            vmem_limit_bytes=_VMEM_LIMIT_BYTES),
    )(x, *params)


def cross_transformer_block(x, ctx, p, num_heads):
    """Fused pre-norm cross-attention block: one pallas_call, grid over batch."""
    B, Nq, D = x.shape
    Nk = ctx.shape[1]
    params = [p[k] for k in _CROSS_PARAM_ORDER]
    par_specs = [pl.BlockSpec(a.shape, lambda b: (0, 0)) for a in params]
    return pl.pallas_call(
        functools.partial(_cross_block_kernel, num_heads=num_heads),
        grid=(B,),
        in_specs=[pl.BlockSpec((1, Nq, D), lambda b: (b, 0, 0)),
                  pl.BlockSpec((1, Nk, D), lambda b: (b, 0, 0))] + par_specs,
        out_specs=pl.BlockSpec((1, Nq, D), lambda b: (b, 0, 0)),
        out_shape=jax.ShapeDtypeStruct((B, Nq, D), jnp.float32),
        compiler_params=pltpu.CompilerParams(
            dimension_semantics=("parallel",),
            vmem_limit_bytes=_VMEM_LIMIT_BYTES),
    )(x, ctx, *params)


# ----------------------------------------------------------------------------
# Fused MLP kernel (whole Linear+ReLU stack in one pallas_call)
# ----------------------------------------------------------------------------
def _mlp_kernel(*refs, num_layers):
    x_ref, o_ref = refs[0], refs[-1]
    h = x_ref[...].astype(jnp.float32)
    for i in range(num_layers):
        w = refs[1 + 2 * i][...]
        b = refs[2 + 2 * i][...]
        h = jnp.dot(h, w, preferred_element_type=jnp.float32) + b
        if i < num_layers - 1:
            h = jnp.maximum(h, 0.0)          # ReLU on hidden layers only
    o_ref[...] = h.astype(o_ref.dtype)       # narrow store happens once, at the end


def mlp_forward(x, layers):
    """Fused pointwise MLP over the last axis; one pallas_call per stack."""
    # TODO(synk): at production sizes add a grid/BlockSpec over the M (token) axis.
    lead, K = x.shape[:-1], x.shape[-1]
    M = 1
    for s in lead:
        M *= s
    N = layers[-1]["w"].shape[1]
    flat = []
    for lyr in layers:
        flat += [lyr["w"], lyr["b"]]
    out = pl.pallas_call(
        functools.partial(_mlp_kernel, num_layers=len(layers)),
        out_shape=jax.ShapeDtypeStruct((M, N), jnp.float32),
        compiler_params=pltpu.CompilerParams(vmem_limit_bytes=_VMEM_LIMIT_BYTES),
    )(x.reshape(M, K), *flat)
    return out.reshape(lead + (N,))


def upsample_transformer_block(x, p, num_heads, up_factor):
    x = transformer_block(x, p["tblock"], num_heads)
    B, N, D = x.shape
    y = mlp_forward(x, [{"w": p["up_w"], "b": p["up_b"]}])        # [B, N, up*D]
    return y.reshape(B, N, up_factor, D).reshape(B, N * up_factor, D)


# ----------------------------------------------------------------------------
# Deterministic parameter initialization
# ----------------------------------------------------------------------------
class KeyGen:
    def __init__(self, seed):
        self.key = jax.random.PRNGKey(seed)

    def __call__(self):
        self.key, sub = jax.random.split(self.key)
        return sub


def init_linear(kg, din, dout):
    return {"w": 0.02 * jax.random.normal(kg(), (din, dout), jnp.float32),
            "b": jnp.zeros((1, dout), jnp.float32)}


def init_mlp(kg, din, dout, hidden):
    dims = [din] + list(hidden) + [dout]
    return [init_linear(kg, dims[i], dims[i + 1]) for i in range(len(dims) - 1)]


def init_tblock(kg, D):
    qkv = init_linear(kg, D, 3 * D)
    o = init_linear(kg, D, D)
    f1 = init_linear(kg, D, 4 * D)
    f2 = init_linear(kg, 4 * D, D)
    return {
        "ln1_g": jnp.ones((1, D), jnp.float32), "ln1_b": jnp.zeros((1, D), jnp.float32),
        "wqkv": qkv["w"], "bqkv": qkv["b"], "wo": o["w"], "bo": o["b"],
        "ln2_g": jnp.ones((1, D), jnp.float32), "ln2_b": jnp.zeros((1, D), jnp.float32),
        "ffn_w1": f1["w"], "ffn_b1": f1["b"], "ffn_w2": f2["w"], "ffn_b2": f2["b"],
    }


def init_cross_block(kg, D):
    q = init_linear(kg, D, D)
    kv = init_linear(kg, D, 2 * D)
    o = init_linear(kg, D, D)
    f1 = init_linear(kg, D, 4 * D)
    f2 = init_linear(kg, 4 * D, D)
    return {
        "ln_q_g": jnp.ones((1, D), jnp.float32), "ln_q_b": jnp.zeros((1, D), jnp.float32),
        "ln_kv_g": jnp.ones((1, D), jnp.float32), "ln_kv_b": jnp.zeros((1, D), jnp.float32),
        "wq": q["w"], "bq": q["b"], "wkv": kv["w"], "bkv": kv["b"],
        "wo": o["w"], "bo": o["b"],
        "ln2_g": jnp.ones((1, D), jnp.float32), "ln2_b": jnp.zeros((1, D), jnp.float32),
        "ffn_w1": f1["w"], "ffn_b1": f1["b"], "ffn_w2": f2["w"], "ffn_b2": f2["b"],
    }


def init_params(seed, in_dim, out_dim, global_dim, embed_dim,
                num_blocks, cross_num_blocks, up_factor):
    kg = KeyGen(seed)
    up = init_linear(kg, embed_dim, up_factor * embed_dim)
    return {
        "center_seed_token": 0.02 * jax.random.normal(kg(), (embed_dim,), jnp.float32),
        "free_space_token": 0.02 * jax.random.normal(kg(), (embed_dim,), jnp.float32),
        "occupied_space_token": 0.02 * jax.random.normal(kg(), (embed_dim,), jnp.float32),
        "pos_embed": init_mlp(kg, 3, embed_dim, [in_dim // 2]),
        "input_proj": init_mlp(kg, in_dim, embed_dim, [in_dim // 2]),
        "transformer_blocks": [init_tblock(kg, embed_dim) for _ in range(num_blocks)],
        "cross_transformer_blocks": [init_cross_block(kg, embed_dim)
                                     for _ in range(cross_num_blocks)],
        "upsample_block": {"tblock": init_tblock(kg, embed_dim),
                           "up_w": up["w"], "up_b": up["b"]},
        "output_proj": init_mlp(kg, embed_dim, out_dim, [embed_dim // 2]),
        "center_mlp": init_mlp(kg, embed_dim + global_dim, 3, [embed_dim, embed_dim // 2]),
        "offset_mlp": init_mlp(kg, out_dim + embed_dim + global_dim, 3,
                               [out_dim, out_dim // 2]),
    }


# ----------------------------------------------------------------------------
# Top-level forward (mirrors the PyTorch forward)
# ----------------------------------------------------------------------------
def constrained_seed_generator_forward(params, partial_xyz, partial_features,
                                       global_feature, free_space_points,
                                       occupied_space_points, object_transforms,
                                       *, num_heads, cross_num_heads, up_factor):
    B, N, _ = partial_features.shape
    N_free = free_space_points.shape[1]
    N_occ = occupied_space_points.shape[1]
    D = params["center_seed_token"].shape[0]

    t_xyz = object_transforms[..., :3]                    # [B, 1, 3]
    t_scale = object_transforms[..., 3:]                  # [B, 1, 1]
    free_p = (free_space_points - t_xyz) / t_scale        # [B, N_free, 3]
    occ_p = (occupied_space_points - t_xyz) / t_scale     # [B, N_occ, 3]
    constraint_points = jnp.concatenate([free_p, occ_p], axis=1)

    # pos_embed is pointwise: batch partial_xyz and constraint points into one call.
    all_xyz = jnp.concatenate([partial_xyz, constraint_points], axis=1)
    all_pos = mlp_forward(all_xyz, params["pos_embed"])
    pos_embed = all_pos[:, :N]
    constraint_pos_embed = all_pos[:, N:]

    free_embed = jnp.broadcast_to(params["free_space_token"][None, None, :], (B, N_free, D))
    occ_embed = jnp.broadcast_to(params["occupied_space_token"][None, None, :], (B, N_occ, D))
    constraint_space_embed = jnp.concatenate([free_embed, occ_embed], axis=1)
    constraint_embed = constraint_pos_embed + constraint_space_embed

    feat_embed = mlp_forward(partial_features, params["input_proj"])
    center_embed = jnp.broadcast_to(params["center_seed_token"][None, None, :], (B, 1, D))
    center_pos_embed = jnp.zeros((B, 1, D), jnp.float32)
    feat_embed = jnp.concatenate([feat_embed, center_embed], axis=1)
    pos_embed = jnp.concatenate([pos_embed, center_pos_embed], axis=1)
    obj_embed = pos_embed + feat_embed

    embed1 = obj_embed
    for p in params["transformer_blocks"]:
        embed1 = transformer_block(embed1, p, num_heads)

    embed2 = obj_embed
    for p in params["cross_transformer_blocks"]:
        embed2 = cross_transformer_block(embed2, constraint_embed, p, cross_num_heads)

    embed = embed1 + embed2
    center_seed_embed = embed[:, -1:, :]
    embed = embed[:, :-1, :]

    upsampled_embed = upsample_transformer_block(embed, params["upsample_block"],
                                                 num_heads, up_factor)
    seed_features = mlp_forward(upsampled_embed, params["output_proj"])

    center_feat = jnp.concatenate([center_seed_embed, global_feature], axis=-1)
    object_center = mlp_forward(center_feat, params["center_mlp"])

    seed_feats = jnp.concatenate(
        [seed_features,
         jnp.broadcast_to(center_feat, (B, up_factor * N, center_feat.shape[-1]))],
        axis=-1)
    seed_offsets = mlp_forward(seed_feats, params["offset_mlp"])
    seed_xyz = object_center + seed_offsets
    return seed_xyz, seed_features, object_center


# ----------------------------------------------------------------------------
if __name__ == "__main__":
    B, N, in_dim = 2, 8, 32
    out_dim, global_dim, embed_dim = 32, 16, 32
    num_blocks, num_heads = 2, 4
    cross_num_blocks, cross_num_heads = 1, 4
    up_factor = 2
    N_free, N_occ = 4, 4

    params = init_params(1234, in_dim, out_dim, global_dim, embed_dim,
                         num_blocks, cross_num_blocks, up_factor)

    key = jax.random.PRNGKey(0)
    k1, k2, k3, k4, k5, k6 = jax.random.split(key, 6)
    partial_xyz = jax.random.normal(k1, (B, N, 3), jnp.float32)
    partial_features = jax.random.normal(k2, (B, N, in_dim), jnp.float32)
    global_feature = jax.random.normal(k3, (B, 1, global_dim), jnp.float32)
    free_space_points = jax.random.normal(k4, (1, N_free, 3), jnp.float32)
    occupied_space_points = jax.random.normal(k5, (1, N_occ, 3), jnp.float32)
    translation = 0.1 * jax.random.normal(k6, (B, 1, 3), jnp.float32)
    scale = 1.5 * jnp.ones((B, 1, 1), jnp.float32)
    object_transforms = jnp.concatenate([translation, scale], axis=-1)

    fwd = jax.jit(functools.partial(
        constrained_seed_generator_forward,
        num_heads=num_heads, cross_num_heads=cross_num_heads, up_factor=up_factor))

    seed_xyz, seed_features, object_center = fwd(
        params, partial_xyz, partial_features, global_feature,
        free_space_points, occupied_space_points, object_transforms)

    jax.block_until_ready((seed_xyz, seed_features, object_center))
    assert seed_xyz.shape == (B, N * up_factor, 3)
    assert seed_features.shape == (B, N * up_factor, out_dim)
    assert object_center.shape == (B, 1, 3)
    assert bool(jnp.all(jnp.isfinite(seed_xyz)))
    print("KERNEL_OK")
</pallas_src>

<mosaic_0001>
module attributes {stable_mosaic.version = 11 : i64} {
  func.func @_mlp_kernel(%arg0: memref<32x3xf32, #tpu.memory_space<vmem>>, %arg1: memref<3x16xf32, #tpu.memory_space<vmem>>, %arg2: memref<1x16xf32, #tpu.memory_space<vmem>>, %arg3: memref<16x32xf32, #tpu.memory_space<vmem>>, %arg4: memref<1x32xf32, #tpu.memory_space<vmem>>, %arg5: memref<32x32xf32, #tpu.memory_space<vmem>>) attributes {dimension_semantics = [], scalar_prefetch = 0 : i64, scratch_operands = 0 : i64, tpu.core_type = #tpu.core_type<tc>} {
    %c0 = arith.constant 0 : index
    %c0_0 = arith.constant 0 : index
    %0 = vector.load %arg0[%c0, %c0_0] : memref<32x3xf32, #tpu.memory_space<vmem>>, vector<32x3xf32>
    %c0_1 = arith.constant 0 : index
    %c0_2 = arith.constant 0 : index
    %1 = vector.load %arg1[%c0_1, %c0_2] : memref<3x16xf32, #tpu.memory_space<vmem>>, vector<3x16xf32>
    %c0_3 = arith.constant 0 : index
    %c0_4 = arith.constant 0 : index
    %2 = vector.load %arg2[%c0_3, %c0_4] : memref<1x16xf32, #tpu.memory_space<vmem>>, vector<1x16xf32>
    %cst = arith.constant dense<0.000000e+00> : vector<32x16xf32>
    %3 = tpu.matmul %0, %1, %cst {dimension_numbers = #tpu.dot_dimension_numbers<[1], [0], [0], [1], [0, 0, 1, 1], [], []>} : vector<32x3xf32>, vector<3x16xf32>, vector<32x16xf32> -> vector<32x16xf32>
    %4 = vector.broadcast %2 : vector<1x16xf32> to vector<32x16xf32>
    %5 = arith.addf %3, %4 : vector<32x16xf32>
    %cst_5 = arith.constant 0.000000e+00 : f32
    %6 = vector.broadcast %cst_5 : f32 to vector<32x16xf32>
    %7 = arith.maximumf %5, %6 : vector<32x16xf32>
    %c0_6 = arith.constant 0 : index
    %c0_7 = arith.constant 0 : index
    %8 = vector.load %arg3[%c0_6, %c0_7] : memref<16x32xf32, #tpu.memory_space<vmem>>, vector<16x32xf32>
    %c0_8 = arith.constant 0 : index
    %c0_9 = arith.constant 0 : index
    %9 = vector.load %arg4[%c0_8, %c0_9] : memref<1x32xf32, #tpu.memory_space<vmem>>, vector<1x32xf32>
    %cst_10 = arith.constant dense<0.000000e+00> : vector<32x32xf32>
    %10 = tpu.matmul %7, %8, %cst_10 {dimension_numbers = #tpu.dot_dimension_numbers<[1], [0], [0], [1], [0, 0, 1, 1], [], []>} : vector<32x16xf32>, vector<16x32xf32>, vector<32x32xf32> -> vector<32x32xf32>
    %11 = vector.broadcast %9 : vector<1x32xf32> to vector<32x32xf32>
    %12 = arith.addf %10, %11 : vector<32x32xf32>
    %c0_11 = arith.constant 0 : index
    %c0_12 = arith.constant 0 : index
    %13 = vector.load %arg5[%c0_11, %c0_12] : memref<32x32xf32, #tpu.memory_space<vmem>>, vector<32x32xf32>
    tpu.vector_store %arg5[%c0_11, %c0_12], %12 {strides = array<i32>} : memref<32x32xf32, #tpu.memory_space<vmem>>, vector<32x32xf32>,
    return
  }
}

module attributes {stable_mosaic.version = 11 : i64} {
  func.func @_mlp_kernel(%arg0: memref<16x32xf32, #tpu.memory_space<vmem>>, %arg1: memref<32x16xf32, #tpu.memory_space<vmem>>, %arg2: memref<1x16xf32, #tpu.memory_space<vmem>>, %arg3: memref<16x32xf32, #tpu.memory_space<vmem>>, %arg4: memref<1x32xf32, #tpu.memory_space<vmem>>, %arg5: memref<16x32xf32, #tpu.memory_space<vmem>>) attributes {dimension_semantics = [], scalar_prefetch = 0 : i64, scratch_operands = 0 : i64, tpu.core_type = #tpu.core_type<tc>} {
    %c0 = arith.constant 0 : index
    %c0_0 = arith.constant 0 : index
    %0 = vector.load %arg0[%c0, %c0_0] : memref<16x32xf32, #tpu.memory_space<vmem>>, vector<16x32xf32>
    %c0_1 = arith.constant 0 : index
    %c0_2 = arith.constant 0 : index
    %1 = vector.load %arg1[%c0_1, %c0_2] : memref<32x16xf32, #tpu.memory_space<vmem>>, vector<32x16xf32>
    %c0_3 = arith.constant 0 : index
    %c0_4 = arith.constant 0 : index
    %2 = vector.load %arg2[%c0_3, %c0_4] : memref<1x16xf32, #tpu.memory_space<vmem>>, vector<1x16xf32>
    %cst = arith.constant dense<0.000000e+00> : vector<16x16xf32>
    %3 = tpu.matmul %0, %1, %cst {dimension_numbers = #tpu.dot_dimension_numbers<[1], [0], [0], [1], [0, 0, 1, 1], [], []>} : vector<16x32xf32>, vector<32x16xf32>, vector<16x16xf32> -> vector<16x16xf32>
    %4 = vector.broadcast %2 : vector<1x16xf32> to vector<16x16xf32>
    %5 = arith.addf %3, %4 : vector<16x16xf32>
    %cst_5 = arith.constant 0.000000e+00 : f32
    %6 = vector.broadcast %cst_5 : f32 to vector<16x16xf32>
    %7 = arith.maximumf %5, %6 : vector<16x16xf32>
    %c0_6 = arith.constant 0 : index
    %c0_7 = arith.constant 0 : index
    %8 = vector.load %arg3[%c0_6, %c0_7] : memref<16x32xf32, #tpu.memory_space<vmem>>, vector<16x32xf32>
    %c0_8 = arith.constant 0 : index
    %c0_9 = arith.constant 0 : index
    %9 = vector.load %arg4[%c0_8, %c0_9] : memref<1x32xf32, #tpu.memory_space<vmem>>, vector<1x32xf32>
    %cst_10 = arith.constant dense<0.000000e+00> : vector<16x32xf32>
    %10 = tpu.matmul %7, %8, %cst_10 {dimension_numbers = #tpu.dot_dimension_numbers<[1], [0], [0], [1], [0, 0, 1, 1], [], []>} : vector<16x16xf32>, vector<16x32xf32>, vector<16x32xf32> -> vector<16x32xf32>
    %11 = vector.broadcast %9 : vector<1x32xf32> to vector<16x32xf32>
    %12 = arith.addf %10, %11 : vector<16x32xf32>
    %c0_11 = arith.constant 0 : index
    %c0_12 = arith.constant 0 : index
    %13 = vector.load %arg5[%c0_11, %c0_12] : memref<16x32xf32, #tpu.memory_space<vmem>>, vector<16x32xf32>
    tpu.vector_store %arg5[%c0_11, %c0_12], %12 {strides = array<i32>} : memref<16x32xf32, #tpu.memory_space<vmem>>, vector<16x32xf32>,
    return
  }
}

module attributes {stable_mosaic.version = 11 : i64} {
  func.func @_self_block_kernel(%arg0: i32, %arg1: memref<1x9x32xf32, #tpu.memory_space<vmem>>, %arg2: memref<1x32xf32, #tpu.memory_space<vmem>>, %arg3: memref<1x32xf32, #tpu.memory_space<vmem>>, %arg4: memref<32x96xf32, #tpu.memory_space<vmem>>, %arg5: memref<1x96xf32, #tpu.memory_space<vmem>>, %arg6: memref<32x32xf32, #tpu.memory_space<vmem>>, %arg7: memref<1x32xf32, #tpu.memory_space<vmem>>, %arg8: memref<1x32xf32, #tpu.memory_space<vmem>>, %arg9: memref<1x32xf32, #tpu.memory_space<vmem>>, %arg10: memref<32x128xf32, #tpu.memory_space<vmem>>, %arg11: memref<1x128xf32, #tpu.memory_space<vmem>>, %arg12: memref<128x32xf32, #tpu.memory_space<vmem>>, %arg13: memref<1x32xf32, #tpu.memory_space<vmem>>, %arg14: memref<1x9x32xf32, #tpu.memory_space<vmem>>) attributes {dimension_semantics = [#tpu.dimension_semantics<parallel>], iteration_bounds = array<i64: 2>, scalar_prefetch = 0 : i64, scratch_operands = 0 : i64, tpu.core_type = #tpu.core_type<tc>, window_params = [{transform_indices = @transform_0, window_bounds = array<i64: 1, 9, 32>}, {pipeline_mode = #tpu.pipeline_mode<synchronous>, transform_indices = @transform_1, window_bounds = array<i64: 1, 32>}, {pipeline_mode = #tpu.pipeline_mode<synchronous>, transform_indices = @transform_2, window_bounds = array<i64: 1, 32>}, {pipeline_mode = #tpu.pipeline_mode<synchronous>, transform_indices = @transform_3, window_bounds = array<i64: 32, 96>}, {pipeline_mode = #tpu.pipeline_mode<synchronous>, transform_indices = @transform_4, window_bounds = array<i64: 1, 96>}, {pipeline_mode = #tpu.pipeline_mode<synchronous>, transform_indices = @transform_5, window_bounds = array<i64: 32, 32>}, {pipeline_mode = #tpu.pipeline_mode<synchronous>, transform_indices = @transform_6, window_bounds = array<i64: 1, 32>}, {pipeline_mode = #tpu.pipeline_mode<synchronous>, transform_indices = @transform_7, window_bounds = array<i64: 1, 32>}, {pipeline_mode = #tpu.pipeline_mode<synchronous>, transform_indices = @transform_8, window_bounds = array<i64: 1, 32>}, {pipeline_mode = #tpu.pipeline_mode<synchronous>, transform_indices = @transform_9, window_bounds = array<i64: 32, 128>}, {pipeline_mode = #tpu.pipeline_mode<synchronous>, transform_indices = @transform_10, window_bounds = array<i64: 1, 128>}, {pipeline_mode = #tpu.pipeline_mode<synchronous>, transform_indices = @transform_11, window_bounds = array<i64: 128, 32>}, {pipeline_mode = #tpu.pipeline_mode<synchronous>, transform_indices = @transform_12, window_bounds = array<i64: 1, 32>}, {transform_indices = @transform_13, window_bounds = array<i64: 1, 9, 32>}]} {
    %c0 = arith.constant 0 : index
    %c0_0 = arith.constant 0 : index
    %c0_1 = arith.constant 0 : index
    %0 = vector.load %arg1[%c0, %c0_0, %c0_1] : memref<1x9x32xf32, #tpu.memory_space<vmem>>, vector<1x9x32xf32>
    %1 = vector.shape_cast %0 : vector<1x9x32xf32> to vector<9x32xf32>
    %c0_2 = arith.constant 0 : index
    %c0_3 = arith.constant 0 : index
    %2 = vector.load %arg2[%c0_2, %c0_3] : memref<1x32xf32, #tpu.memory_space<vmem>>, vector<1x32xf32>
    %c0_4 = arith.constant 0 : index
    %c0_5 = arith.constant 0 : index
    %3 = vector.load %arg3[%c0_4, %c0_5] : memref<1x32xf32, #tpu.memory_space<vmem>>, vector<1x32xf32>
    %cst = arith.constant dense<0.000000e+00> : vector<9xf32>
    %4 = vector.multi_reduction <add>, %1, %cst [1] : vector<9x32xf32> to vector<9xf32>
    %5 = vector.shape_cast %4 : vector<9xf32> to vector<9x1xf32>
    %cst_6 = arith.constant 3.200000e+01 : f32
    %6 = vector.broadcast %cst_6 : f32 to vector<9x1xf32>
    %7 = arith.divf %5, %6 : vector<9x1xf32>
    %8 = vector.broadcast %7 : vector<9x1xf32> to vector<9x32xf32>
    %9 = arith.subf %1, %8 : vector<9x32xf32>
    %10 = arith.mulf %9, %9 : vector<9x32xf32>
    %cst_7 = arith.constant dense<0.000000e+00> : vector<9xf32>
    %11 = vector.multi_reduction <add>, %10, %cst_7 [1] : vector<9x32xf32> to vector<9xf32>
    %12 = vector.shape_cast %11 : vector<9xf32> to vector<9x1xf32>
    %cst_8 = arith.constant 3.200000e+01 : f32
    %13 = vector.broadcast %cst_8 : f32 to vector<9x1xf32>
    %14 = arith.divf %12, %13 : vector<9x1xf32>
    %15 = vector.broadcast %7 : vector<9x1xf32> to vector<9x32xf32>
    %16 = arith.subf %1, %15 : vector<9x32xf32>
    %cst_9 = arith.constant 9.99999974E-6 : f32
    %17 = vector.broadcast %cst_9 : f32 to vector<9x1xf32>
    %18 = arith.addf %14, %17 : vector<9x1xf32>
    %19 = math.rsqrt %18 : vector<9x1xf32>
    %20 = vector.broadcast %19 : vector<9x1xf32> to vector<9x32xf32>
    %21 = arith.mulf %16, %20 : vector<9x32xf32>
    %22 = vector.broadcast %2 : vector<1x32xf32> to vector<9x32xf32>
    %23 = arith.mulf %21, %22 : vector<9x32xf32>
    %24 = vector.broadcast %3 : vector<1x32xf32> to vector<9x32xf32>
    %25 = arith.addf %23, %24 : vector<9x32xf32>
    %c0_10 = arith.constant 0 : index
    %c0_11 = arith.constant 0 : index
    %26 = vector.load %arg4[%c0_10, %c0_11] : memref<32x96xf32, #tpu.memory_space<vmem>>, vector<32x96xf32>
    %cst_12 = arith.constant dense<0.000000e+00> : vector<9x96xf32>
    %27 = tpu.matmul %25, %26, %cst_12 {dimension_numbers = #tpu.dot_dimension_numbers<[1], [0], [0], [1], [0, 0, 1, 1], [], []>} : vector<9x32xf32>, vector<32x96xf32>, vector<9x96xf32> -> vector<9x96xf32>
    %c0_13 = arith.constant 0 : index
    %c0_14 = arith.constant 0 : index
    %28 = vector.load %arg5[%c0_13, %c0_14] : memref<1x96xf32, #tpu.memory_space<vmem>>, vector<1x96xf32>
    %29 = vector.broadcast %28 : vector<1x96xf32> to vector<9x96xf32>
    %30 = arith.addf %27, %29 : vector<9x96xf32>
    %31 = vector.extract_strided_slice %30 {offsets = [0, 0], sizes = [9, 32], strides = [1, 1]} : vector<9x96xf32> to vector<9x32xf32>
    %32 = vector.extract_strided_slice %30 {offsets = [0, 32], sizes = [9, 32], strides = [1, 1]} : vector<9x96xf32> to vector<9x32xf32>
    %33 = vector.extract_strided_slice %30 {offsets = [0, 64], sizes = [9, 32], strides = [1, 1]} : vector<9x96xf32> to vector<9x32xf32>
    %c0_15 = arith.constant 0 : index
    %c0_16 = arith.constant 0 : index
    %34 = vector.load %arg7[%c0_15, %c0_16] : memref<1x32xf32, #tpu.memory_space<vmem>>, vector<1x32xf32>
    %35 = vector.extract_strided_slice %31 {offsets = [0, 0], sizes = [9, 8], strides = [1, 1]} : vector<9x32xf32> to vector<9x8xf32>
    %cst_17 = arith.constant 0.353553385 : f32
    %36 = vector.broadcast %cst_17 : f32 to vector<9x8xf32>
    %37 = arith.mulf %35, %36 : vector<9x8xf32>
    %38 = vector.extract_strided_slice %32 {offsets = [0, 0], sizes = [9, 8], strides = [1, 1]} : vector<9x32xf32> to vector<9x8xf32>
    "tpu.trace_start"() <{level = 10 : i32, message = "qd,kd->qk"}> : () -> ()
    %cst_18 = arith.constant dense<0.000000e+00> : vector<9x9xf32>
    %39 = tpu.matmul %37, %38, %cst_18 {dimension_numbers = #tpu.dot_dimension_numbers<[1], [1], [0], [0], [0, 0, 1, 0], [], []>} : vector<9x8xf32>, vector<9x8xf32>, vector<9x9xf32> -> vector<9x9xf32>
    "tpu.trace_stop"() : () -> ()
    %cst_19 = arith.constant dense<0xFF800000> : vector<9xf32>
    %40 = vector.multi_reduction <maximumf>, %39, %cst_19 [1] : vector<9x9xf32> to vector<9xf32>
    %41 = vector.shape_cast %40 : vector<9xf32> to vector<9x1xf32>
    %42 = vector.broadcast %41 : vector<9x1xf32> to vector<9x9xf32>
    %43 = arith.subf %39, %42 : vector<9x9xf32>
    %44 = math.exp %43 : vector<9x9xf32>
    %cst_20 = arith.constant dense<0.000000e+00> : vector<9xf32>
    %45 = vector.multi_reduction <add>, %44, %cst_20 [1] : vector<9x9xf32> to vector<9xf32>
    %46 = vector.shape_cast %45 : vector<9xf32> to vector<9x1xf32>
    %47 = tpu.reciprocal %46 {approx = true} : vector<9x1xf32> -> vector<9x1xf32>
    %48 = vector.broadcast %47 : vector<9x1xf32> to vector<9x9xf32>
    %49 = arith.mulf %44, %48 : vector<9x9xf32>
    %50 = vector.extract_strided_slice %33 {offsets = [0, 0], sizes = [9, 8], strides = [1, 1]} : vector<9x32xf32> to vector<9x8xf32>
    %cst_21 = arith.constant dense<0.000000e+00> : vector<9x8xf32>
    %51 = tpu.matmul %49, %50, %cst_21 {dimension_numbers = #tpu.dot_dimension_numbers<[1], [0], [0], [1], [0, 0, 1, 1], [], []>} : vector<9x9xf32>, vector<9x8xf32>, vector<9x8xf32> -> vector<9x8xf32>
    %c0_22 = arith.constant 0 : index
    %c0_23 = arith.constant 0 : index
    %52 = vector.load %arg6[%c0_22, %c0_23] : memref<32x32xf32, #tpu.memory_space<vmem>>, vector<8x32xf32>
    %cst_24 = arith.constant dense<0.000000e+00> : vector<9x32xf32>
    %53 = tpu.matmul %51, %52, %cst_24 {dimension_numbers = #tpu.dot_dimension_numbers<[1], [0], [0], [1], [0, 0, 1, 1], [], []>} : vector<9x8xf32>, vector<8x32xf32>, vector<9x32xf32> -> vector<9x32xf32>
    %54 = vector.extract_strided_slice %31 {offsets = [0, 8], sizes = [9, 8], strides = [1, 1]} : vector<9x32xf32> to vector<9x8xf32>
    %cst_25 = arith.constant 0.353553385 : f32
    %55 = vector.broadcast %cst_25 : f32 to vector<9x8xf32>
    %56 = arith.mulf %54, %55 : vector<9x8xf32>
    %57 = vector.extract_strided_slice %32 {offsets = [0, 8], sizes = [9, 8], strides = [1, 1]} : vector<9x32xf32> to vector<9x8xf32>
    "tpu.trace_start"() <{level = 10 : i32, message = "qd,kd->qk"}> : () -> ()
    %cst_26 = arith.constant dense<0.000000e+00> : vector<9x9xf32>
    %58 = tpu.matmul %56, %57, %cst_26 {dimension_numbers = #tpu.dot_dimension_numbers<[1], [1], [0], [0], [0, 0, 1, 0], [], []>} : vector<9x8xf32>, vector<9x8xf32>, vector<9x9xf32> -> vector<9x9xf32>
    "tpu.trace_stop"() : () -> ()
    %cst_27 = arith.constant dense<0xFF800000> : vector<9xf32>
    %59 = vector.multi_reduction <maximumf>, %58, %cst_27 [1] : vector<9x9xf32> to vector<9xf32>
    %60 = vector.shape_cast %59 : vector<9xf32> to vector<9x1xf32>
    %61 = vector.broadcast %60 : vector<9x1xf32> to vector<9x9xf32>
    %62 = arith.subf %58, %61 : vector<9x9xf32>
    %63 = math.exp %62 : vector<9x9xf32>
    %cst_28 = arith.constant dense<0.000000e+00> : vector<9xf32>
    %64 = vector.multi_reduction <add>, %63, %cst_28 [1] : vector<9x9xf32> to vector<9xf32>
    %65 = vector.shape_cast %64 : vector<9xf32> to vector<9x1xf32>
    %66 = tpu.reciprocal %65 {approx = true} : vector<9x1xf32> -> vector<9x1xf32>
    %67 = vector.broadcast %66 : vector<9x1xf32> to vector<9x9xf32>
    %68 = arith.mulf %63, %67 : vector<9x9xf32>
    %69 = vector.extract_strided_slice %33 {offsets = [0, 8], sizes = [9, 8], strides = [1, 1]} : vector<9x32xf32> to vector<9x8xf32>
    %cst_29 = arith.constant dense<0.000000e+00> : vector<9x8xf32>
    %70 = tpu.matmul %68, %69, %cst_29 {dimension_numbers = #tpu.dot_dimension_numbers<[1], [0], [0], [1], [0, 0, 1, 1], [], []>} : vector<9x9xf32>, vector<9x8xf32>, vector<9x8xf32> -> vector<9x8xf32>
    %c8 = arith.constant 8 : index
    %c0_30 = arith.constant 0 : index
    %71 = vector.load %arg6[%c8, %c0_30] : memref<32x32xf32, #tpu.memory_space<vmem>>, vector<8x32xf32>
    %cst_31 = arith.constant dense<0.000000e+00> : vector<9x32xf32>
    %72 = tpu.matmul %70, %71, %cst_31 {dimension_numbers = #tpu.dot_dimension_numbers<[1], [0], [0], [1], [0, 0, 1, 1], [], []>} : vector<9x8xf32>, vector<8x32xf32>, vector<9x32xf32> -> vector<9x32xf32>
    %73 = arith.addf %53, %72 : vector<9x32xf32>
    %74 = vector.extract_strided_slice %31 {offsets = [0, 16], sizes = [9, 8], strides = [1, 1]} : vector<9x32xf32> to vector<9x8xf32>
    %cst_32 = arith.constant 0.353553385 : f32
    %75 = vector.broadcast %cst_32 : f32 to vector<9x8xf32>
    %76 = arith.mulf %74, %75 : vector<9x8xf32>
    %77 = vector.extract_strided_slice %32 {offsets = [0, 16], sizes = [9, 8], strides = [1, 1]} : vector<9x32xf32> to vector<9x8xf32>
    "tpu.trace_start"() <{level = 10 : i32, message = "qd,kd->qk"}> : () -> ()
    %cst_33 = arith.constant dense<0.000000e+00> : vector<9x9xf32>
    %78 = tpu.matmul %76, %77, %cst_33 {dimension_numbers = #tpu.dot_dimension_numbers<[1], [1], [0], [0], [0, 0, 1, 0], [], []>} : vector<9x8xf32>, vector<9x8xf32>, vector<9x9xf32> -> vector<9x9xf32>
    "tpu.trace_stop"() : () -> ()
    %cst_34 = arith.constant dense<0xFF800000> : vector<9xf32>
    %79 = vector.multi_reduction <maximumf>, %78, %cst_34 [1] : vector<9x9xf32> to vector<9xf32>
    %80 = vector.shape_cast %79 : vector<9xf32> to vector<9x1xf32>
    %81 = vector.broadcast %80 : vector<9x1xf32> to vector<9x9xf32>
    %82 = arith.subf %78, %81 : vector<9x9xf32>
    %83 = math.exp %82 : vector<9x9xf32>
    %cst_35 = arith.constant dense<0.000000e+00> : vector<9xf32>
    %84 = vector.multi_reduction <add>, %83, %cst_35 [1] : vector<9x9xf32> to vector<9xf32>
    %85 = vector.shape_cast %84 : vector<9xf32> to vector<9x1xf32>
    %86 = tpu.reciprocal %85 {approx = true} : vector<9x1xf32> -> vector<9x1xf32>
    %87 = vector.broadcast %86 : vector<9x1xf32> to vector<9x9xf32>
    %88 = arith.mulf %83, %87 : vector<9x9xf32>
    %89 = vector.extract_strided_slice %33 {offsets = [0, 16], sizes = [9, 8], strides = [1, 1]} : vector<9x32xf32> to vector<9x8xf32>
    %cst_36 = arith.constant dense<0.000000e+00> : vector<9x8xf32>
    %90 = tpu.matmul %88, %89, %cst_36 {dimension_numbers = #tpu.dot_dimension_numbers<[1], [0], [0], [1], [0, 0, 1, 1], [], []>} : vector<9x9xf32>, vector<9x8xf32>, vector<9x8xf32> -> vector<9x8xf32>
    %c16 = arith.constant 16 : index
    %c0_37 = arith.constant 0 : index
    %91 = vector.load %arg6[%c16, %c0_37] : memref<32x32xf32, #tpu.memory_space<vmem>>, vector<8x32xf32>
    %cst_38 = arith.constant dense<0.000000e+00> : vector<9x32xf32>
    %92 = tpu.matmul %90, %91, %cst_38 {dimension_numbers = #tpu.dot_dimension_numbers<[1], [0], [0], [1], [0, 0, 1, 1], [], []>} : vector<9x8xf32>, vector<8x32xf32>, vector<9x32xf32> -> vector<9x32xf32>
    %93 = arith.addf %73, %92 : vector<9x32xf32>
    %94 = vector.extract_strided_slice %31 {offsets = [0, 24], sizes = [9, 8], strides = [1, 1]} : vector<9x32xf32> to vector<9x8xf32>
    %cst_39 = arith.constant 0.353553385 : f32
    %95 = vector.broadcast %cst_39 : f32 to vector<9x8xf32>
    %96 = arith.mulf %94, %95 : vector<9x8xf32>
    %97 = vector.extract_strided_slice %32 {offsets = [0, 24], sizes = [9, 8], strides = [1, 1]} : vector<9x32xf32> to vector<9x8xf32>
    "tpu.trace_start"() <{level = 10 : i32, message = "qd,kd->qk"}> : () -> ()
    %cst_40 = arith.constant dense<0.000000e+00> : vector<9x9xf32>
    %98 = tpu.matmul %96, %97, %cst_40 {dimension_numbers = #tpu.dot_dimension_numbers<[1], [1], [0], [0], [0, 0, 1, 0], [], []>} : vector<9x8xf32>, vector<9x8xf32>, vector<9x9xf32> -> vector<9x9xf32>
    "tpu.trace_stop"() : () -> ()
    %cst_41 = arith.constant dense<0xFF800000> : vector<9xf32>
    %99 = vector.multi_reduction <maximumf>, %98, %cst_41 [1] : vector<9x9xf32> to vector<9xf32>
    %100 = vector.shape_cast %99 : vector<9xf32> to vector<9x1xf32>
    %101 = vector.broadcast %100 : vector<9x1xf32> to vector<9x9xf32>
    %102 = arith.subf %98, %101 : vector<9x9xf32>
    %103 = math.exp %102 : vector<9x9xf32>
    %cst_42 = arith.constant dense<0.000000e+00> : vector<9xf32>
    %104 = vector.multi_reduction <add>, %103, %cst_42 [1] : vector<9x9xf32> to vector<9xf32>
    %105 = vector.shape_cast %104 : vector<9xf32> to vector<9x1xf32>
    %106 = tpu.reciprocal %105 {approx = true} : vector<9x1xf32> -> vector<9x1xf32>
    %107 = vector.broadcast %106 : vector<9x1xf32> to vector<9x9xf32>
    %108 = arith.mulf %103, %107 : vector<9x9xf32>
    %109 = vector.extract_strided_slice %33 {offsets = [0, 24], sizes = [9, 8], strides = [1, 1]} : vector<9x32xf32> to vector<9x8xf32>
    %cst_43 = arith.constant dense<0.000000e+00> : vector<9x8xf32>
    %110 = tpu.matmul %108, %109, %cst_43 {dimension_numbers = #tpu.dot_dimension_numbers<[1], [0], [0], [1], [0, 0, 1, 1], [], []>} : vector<9x9xf32>, vector<9x8xf32>, vector<9x8xf32> -> vector<9x8xf32>
    %c24 = arith.constant 24 : index
    %c0_44 = arith.constant 0 : index
    %111 = vector.load %arg6[%c24, %c0_44] : memref<32x32xf32, #tpu.memory_space<vmem>>, vector<8x32xf32>
    %cst_45 = arith.constant dense<0.000000e+00> : vector<9x32xf32>
    %112 = tpu.matmul %110, %111, %cst_45 {dimension_numbers = #tpu.dot_dimension_numbers<[1], [0], [0], [1], [0, 0, 1, 1], [], []>} : vector<9x8xf32>, vector<8x32xf32>, vector<9x32xf32> -> vector<9x32xf32>
    %113 = arith.addf %93, %112 : vector<9x32xf32>
    %114 = vector.broadcast %34 : vector<1x32xf32> to vector<9x32xf32>
    %115 = arith.addf %113, %114 : vector<9x32xf32>
    %116 = arith.addf %1, %115 : vector<9x32xf32>
    %c0_46 = arith.constant 0 : index
    %c0_47 = arith.constant 0 : index
    %117 = vector.load %arg8[%c0_46, %c0_47] : memref<1x32xf32, #tpu.memory_space<vmem>>, vector<1x32xf32>
    %c0_48 = arith.constant 0 : index
    %c0_49 = arith.constant 0 : index
    %118 = vector.load %arg9[%c0_48, %c0_49] : memref<1x32xf32, #tpu.memory_space<vmem>>, vector<1x32xf32>
    %cst_50 = arith.constant dense<0.000000e+00> : vector<9xf32>
    %119 = vector.multi_reduction <add>, %116, %cst_50 [1] : vector<9x32xf32> to vector<9xf32>
    %120 = vector.shape_cast %119 : vector<9xf32> to vector<9x1xf32>
    %cst_51 = arith.constant 3.200000e+01 : f32
    %121 = vector.broadcast %cst_51 : f32 to vector<9x1xf32>
    %122 = arith.divf %120, %121 : vector<9x1xf32>
    %123 = vector.broadcast %122 : vector<9x1xf32> to vector<9x32xf32>
    %124 = arith.subf %116, %123 : vector<9x32xf32>
    %125 = arith.mulf %124, %124 : vector<9x32xf32>
    %cst_52 = arith.constant dense<0.000000e+00> : vector<9xf32>
    %126 = vector.multi_reduction <add>, %125, %cst_52 [1] : vector<9x32xf32> to vector<9xf32>
    %127 = vector.shape_cast %126 : vector<9xf32> to vector<9x1xf32>
    %cst_53 = arith.constant 3.200000e+01 : f32
    %128 = vector.broadcast %cst_53 : f32 to vector<9x1xf32>
    %129 = arith.divf %127, %128 : vector<9x1xf32>
    %130 = vector.broadcast %122 : vector<9x1xf32> to vector<9x32xf32>
    %131 = arith.subf %116, %130 : vector<9x32xf32>
    %cst_54 = arith.constant 9.99999974E-6 : f32
    %132 = vector.broadcast %cst_54 : f32 to vector<9x1xf32>
    %133 = arith.addf %129, %132 : vector<9x1xf32>
    %134 = math.rsqrt %133 : vector<9x1xf32>
    %135 = vector.broadcast %134 : vector<9x1xf32> to vector<9x32xf32>
    %136 = arith.mulf %131, %135 : vector<9x32xf32>
    %137 = vector.broadcast %117 : vector<1x32xf32> to vector<9x32xf32>
    %138 = arith.mulf %136, %137 : vector<9x32xf32>
    %139 = vector.broadcast %118 : vector<1x32xf32> to vector<9x32xf32>
    %140 = arith.addf %138, %139 : vector<9x32xf32>
    %c0_55 = arith.constant 0 : index
    %c0_56 = arith.constant 0 : index
    %141 = vector.load %arg10[%c0_55, %c0_56] : memref<32x128xf32, #tpu.memory_space<vmem>>, vector<32x128xf32>
    %c0_57 = arith.constant 0 : index
    %c0_58 = arith.constant 0 : index
    %142 = vector.load %arg11[%c0_57, %c0_58] : memref<1x128xf32, #tpu.memory_space<vmem>>, vector<1x128xf32>
    %c0_59 = arith.constant 0 : index
    %c0_60 = arith.constant 0 : index
    %143 = vector.load %arg12[%c0_59, %c0_60] : memref<128x32xf32, #tpu.memory_space<vmem>>, vector<128x32xf32>
    %c0_61 = arith.constant 0 : index
    %c0_62 = arith.constant 0 : index
    %144 = vector.load %arg13[%c0_61, %c0_62] : memref<1x32xf32, #tpu.memory_space<vmem>>, vector<1x32xf32>
    %cst_63 = arith.constant dense<0.000000e+00> : vector<9x128xf32>
    %145 = tpu.matmul %140, %141, %cst_63 {dimension_numbers = #tpu.dot_dimension_numbers<[1], [0], [0], [1], [0, 0, 1, 1], [], []>} : vector<9x32xf32>, vector<32x128xf32>, vector<9x128xf32> -> vector<9x128xf32>
    %146 = vector.broadcast %142 : vector<1x128xf32> to vector<9x128xf32>
    %147 = arith.addf %145, %146 : vector<9x128xf32>
    %148 = arith.mulf %147, %147 : vector<9x128xf32>
    %149 = arith.mulf %147, %148 : vector<9x128xf32>
    %cst_64 = arith.constant 4.471500e-02 : f32
    %150 = vector.broadcast %cst_64 : f32 to vector<9x128xf32>
    %151 = arith.mulf %150, %149 : vector<9x128xf32>
    %152 = arith.addf %147, %151 : vector<9x128xf32>
    %cst_65 = arith.constant 0.797884583 : f32
    %153 = vector.broadcast %cst_65 : f32 to vector<9x128xf32>
    %154 = arith.mulf %153, %152 : vector<9x128xf32>
    %155 = math.tanh %154 : vector<9x128xf32>
    %cst_66 = arith.constant 1.000000e+00 : f32
    %156 = vector.broadcast %cst_66 : f32 to vector<9x128xf32>
    %157 = arith.addf %156, %155 : vector<9x128xf32>
    %cst_67 = arith.constant 5.000000e-01 : f32
    %158 = vector.broadcast %cst_67 : f32 to vector<9x128xf32>
    %159 = arith.mulf %158, %157 : vector<9x128xf32>
    %160 = arith.mulf %147, %159 : vector<9x128xf32>
    %cst_68 = arith.constant dense<0.000000e+00> : vector<9x32xf32>
    %161 = tpu.matmul %160, %143, %cst_68 {dimension_numbers = #tpu.dot_dimension_numbers<[1], [0], [0], [1], [0, 0, 1, 1], [], []>} : vector<9x128xf32>, vector<128x32xf32>, vector<9x32xf32> -> vector<9x32xf32>
    %162 = vector.broadcast %144 : vector<1x32xf32> to vector<9x32xf32>
    %163 = arith.addf %161, %162 : vector<9x32xf32>
    %164 = arith.addf %116, %163 : vector<9x32xf32>
    %c0_69 = arith.constant 0 : index
    %c0_70 = arith.constant 0 : index
    %c0_71 = arith.constant 0 : index
    %165 = vector.load %arg14[%c0_69, %c0_70, %c0_71] : memref<1x9x32xf32, #tpu.memory_space<vmem>>, vector<1x9x32xf32>
    %166 = vector.shape_cast %165 : vector<1x9x32xf32> to vector<9x32xf32>
    %167 = vector.shape_cast %164 : vector<9x32xf32> to vector<1x9x32xf32>
    tpu.vector_store %arg14[%c0_69, %c0_70, %c0_71], %167 {strides = array<i32>} : memref<1x9x32xf32, #tpu.memory_space<vmem>>, vector<1x9x32xf32>,
    return
  }
  func.func @transform_0(%arg0: i32) -> (i32, i32, i32) {
    %c0_i32 = arith.constant 0 : i32
    %c0_i32_0 = arith.constant 0 : i32
    %c0_i32_1 = arith.constant 0 : i32
    return %arg0, %c0_i32, %c0_i32_0 : i32, i32, i32
  }
  func.func @transform_1(%arg0: i32) -> (i32, i32) {
    %c0_i32 = arith.constant 0 : i32
    %c0_i32_0 = arith.constant 0 : i32
    %c0_i32_1 = arith.constant 0 : i32
    return %c0_i32, %c0_i32_0 : i32, i32
  }
  func.func @transform_2(%arg0: i32) -> (i32, i32) {
    %c0_i32 = arith.constant 0 : i32
    %c0_i32_0 = arith.constant 0 : i32
    %c0_i32_1 = arith.constant 0 : i32
    return %c0_i32, %c0_i32_0 : i32, i32
  }
  func.func @transform_3(%arg0: i32) -> (i32, i32) {
    %c0_i32 = arith.constant 0 : i32
    %c0_i32_0 = arith.constant 0 : i32
    %c0_i32_1 = arith.constant 0 : i32
    return %c0_i32, %c0_i32_0 : i32, i32
  }
  func.func @transform_4(%arg0: i32) -> (i32, i32) {
    %c0_i32 = arith.constant 0 : i32
    %c0_i32_0 = arith.constant 0 : i32
    %c0_i32_1 = arith.constant 0 : i32
    return %c0_i32, %c0_i32_0 : i32, i32
  }
  func.func @transform_5(%arg0: i32) -> (i32, i32) {
    %c0_i32 = arith.constant 0 : i32
    %c0_i32_0 = arith.constant 0 : i32
    %c0_i32_1 = arith.constant 0 : i32
    return %c0_i32, %c0_i32_0 : i32, i32
  }
  func.func @transform_6(%arg0: i32) -> (i32, i32) {
    %c0_i32 = arith.constant 0 : i32
    %c0_i32_0 = arith.constant 0 : i32
    %c0_i32_1 = arith.constant 0 : i32
    return %c0_i32, %c0_i32_0 : i32, i32
  }
  func.func @transform_7(%arg0: i32) -> (i32, i32) {
    %c0_i32 = arith.constant 0 : i32
    %c0_i32_0 = arith.constant 0 : i32
    %c0_i32_1 = arith.constant 0 : i32
    return %c0_i32, %c0_i32_0 : i32, i32
  }
  func.func @transform_8(%arg0: i32) -> (i32, i32) {
    %c0_i32 = arith.constant 0 : i32
    %c0_i32_0 = arith.constant 0 : i32
    %c0_i32_1 = arith.constant 0 : i32
    return %c0_i32, %c0_i32_0 : i32, i32
  }
  func.func @transform_9(%arg0: i32) -> (i32, i32) {
    %c0_i32 = arith.constant 0 : i32
    %c0_i32_0 = arith.constant 0 : i32
    %c0_i32_1 = arith.constant 0 : i32
    return %c0_i32, %c0_i32_0 : i32, i32
  }
  func.func @transform_10(%arg0: i32) -> (i32, i32) {
    %c0_i32 = arith.constant 0 : i32
    %c0_i32_0 = arith.constant 0 : i32
    %c0_i32_1 = arith.constant 0 : i32
    return %c0_i32, %c0_i32_0 : i32, i32
  }
  func.func @transform_11(%arg0: i32) -> (i32, i32) {
    %c0_i32 = arith.constant 0 : i32
    %c0_i32_0 = arith.constant 0 : i32
    %c0_i32_1 = arith.constant 0 : i32
    return %c0_i32, %c0_i32_0 : i32, i32
  }
  func.func @transform_12(%arg0: i32) -> (i32, i32) {
    %c0_i32 = arith.constant 0 : i32
    %c0_i32_0 = arith.constant 0 : i32
    %c0_i32_1 = arith.constant 0 : i32
    return %c0_i32, %c0_i32_0 : i32, i32
  }
  func.func @transform_13(%arg0: i32) -> (i32, i32, i32) {
    %c0_i32 = arith.constant 0 : i32
    %c0_i32_0 = arith.constant 0 : i32
    %c0_i32_1 = arith.constant 0 : i32
    return %arg0, %c0_i32, %c0_i32_0 : i32, i32, i32
  }
}

module attributes {stable_mosaic.version = 11 : i64} {
  func.func @_cross_block_kernel(%arg0: i32, %arg1: memref<1x9x32xf32, #tpu.memory_space<vmem>>, %arg2: memref<1x8x32xf32, #tpu.memory_space<vmem>>, %arg3: memref<1x32xf32, #tpu.memory_space<vmem>>, %arg4: memref<1x32xf32, #tpu.memory_space<vmem>>, %arg5: memref<1x32xf32, #tpu.memory_space<vmem>>, %arg6: memref<1x32xf32, #tpu.memory_space<vmem>>, %arg7: memref<32x32xf32, #tpu.memory_space<vmem>>, %arg8: memref<1x32xf32, #tpu.memory_space<vmem>>, %arg9: memref<32x64xf32, #tpu.memory_space<vmem>>, %arg10: memref<1x64xf32, #tpu.memory_space<vmem>>, %arg11: memref<32x32xf32, #tpu.memory_space<vmem>>, %arg12: memref<1x32xf32, #tpu.memory_space<vmem>>, %arg13: memref<1x32xf32, #tpu.memory_space<vmem>>, %arg14: memref<1x32xf32, #tpu.memory_space<vmem>>, %arg15: memref<32x128xf32, #tpu.memory_space<vmem>>, %arg16: memref<1x128xf32, #tpu.memory_space<vmem>>, %arg17: memref<128x32xf32, #tpu.memory_space<vmem>>, %arg18: memref<1x32xf32, #tpu.memory_space<vmem>>, %arg19: memref<1x9x32xf32, #tpu.memory_space<vmem>>) attributes {dimension_semantics = [#tpu.dimension_semantics<parallel>], iteration_bounds = array<i64: 2>, scalar_prefetch = 0 : i64, scratch_operands = 0 : i64, tpu.core_type = #tpu.core_type<tc>, window_params = [{transform_indices = @transform_0, window_bounds = array<i64: 1, 9, 32>}, {transform_indices = @transform_1, window_bounds = array<i64: 1, 8, 32>}, {pipeline_mode = #tpu.pipeline_mode<synchronous>, transform_indices = @transform_2, window_bounds = array<i64: 1, 32>}, {pipeline_mode = #tpu.pipeline_mode<synchronous>, transform_indices = @transform_3, window_bounds = array<i64: 1, 32>}, {pipeline_mode = #tpu.pipeline_mode<synchronous>, transform_indices = @transform_4, window_bounds = array<i64: 1, 32>}, {pipeline_mode = #tpu.pipeline_mode<synchronous>, transform_indices = @transform_5, window_bounds = array<i64: 1, 32>}, {pipeline_mode = #tpu.pipeline_mode<synchronous>, transform_indices = @transform_6, window_bounds = array<i64: 32, 32>}, {pipeline_mode = #tpu.pipeline_mode<synchronous>, transform_indices = @transform_7, window_bounds = array<i64: 1, 32>}, {pipeline_mode = #tpu.pipeline_mode<synchronous>, transform_indices = @transform_8, window_bounds = array<i64: 32, 64>}, {pipeline_mode = #tpu.pipeline_mode<synchronous>, transform_indices = @transform_9, window_bounds = array<i64: 1, 64>}, {pipeline_mode = #tpu.pipeline_mode<synchronous>, transform_indices = @transform_10, window_bounds = array<i64: 32, 32>}, {pipeline_mode = #tpu.pipeline_mode<synchronous>, transform_indices = @transform_11, window_bounds = array<i64: 1, 32>}, {pipeline_mode = #tpu.pipeline_mode<synchronous>, transform_indices = @transform_12, window_bounds = array<i64: 1, 32>}, {pipeline_mode = #tpu.pipeline_mode<synchronous>, transform_indices = @transform_13, window_bounds = array<i64: 1, 32>}, {pipeline_mode = #tpu.pipeline_mode<synchronous>, transform_indices = @transform_14, window_bounds = array<i64: 32, 128>}, {pipeline_mode = #tpu.pipeline_mode<synchronous>, transform_indices = @transform_15, window_bounds = array<i64: 1, 128>}, {pipeline_mode = #tpu.pipeline_mode<synchronous>, transform_indices = @transform_16, window_bounds = array<i64: 128, 32>}, {pipeline_mode = #tpu.pipeline_mode<synchronous>, transform_indices = @transform_17, window_bounds = array<i64: 1, 32>}, {transform_indices = @transform_18, window_bounds = array<i64: 1, 9, 32>}]} {
    %c0 = arith.constant 0 : index
    %c0_0 = arith.constant 0 : index
    %c0_1 = arith.constant 0 : index
    %0 = vector.load %arg1[%c0, %c0_0, %c0_1] : memref<1x9x32xf32, #tpu.memory_space<vmem>>, vector<1x9x32xf32>
    %1 = vector.shape_cast %0 : vector<1x9x32xf32> to vector<9x32xf32>
    %c0_2 = arith.constant 0 : index
    %c0_3 = arith.constant 0 : index
    %c0_4 = arith.constant 0 : index
    %2 = vector.load %arg2[%c0_2, %c0_3, %c0_4] : memref<1x8x32xf32, #tpu.memory_space<vmem>>, vector<1x8x32xf32>
    %3 = vector.shape_cast %2 : vector<1x8x32xf32> to vector<8x32xf32>
    %c0_5 = arith.constant 0 : index
    %c0_6 = arith.constant 0 : index
    %4 = vector.load %arg3[%c0_5, %c0_6] : memref<1x32xf32, #tpu.memory_space<vmem>>, vector<1x32xf32>
    %c0_7 = arith.constant 0 : index
    %c0_8 = arith.constant 0 : index
    %5 = vector.load %arg4[%c0_7, %c0_8] : memref<1x32xf32, #tpu.memory_space<vmem>>, vector<1x32xf32>
    %cst = arith.constant dense<0.000000e+00> : vector<9xf32>
    %6 = vector.multi_reduction <add>, %1, %cst [1] : vector<9x32xf32> to vector<9xf32>
    %7 = vector.shape_cast %6 : vector<9xf32> to vector<9x1xf32>
    %cst_9 = arith.constant 3.200000e+01 : f32
    %8 = vector.broadcast %cst_9 : f32 to vector<9x1xf32>
    %9 = arith.divf %7, %8 : vector<9x1xf32>
    %10 = vector.broadcast %9 : vector<9x1xf32> to vector<9x32xf32>
    %11 = arith.subf %1, %10 : vector<9x32xf32>
    %12 = arith.mulf %11, %11 : vector<9x32xf32>
    %cst_10 = arith.constant dense<0.000000e+00> : vector<9xf32>
    %13 = vector.multi_reduction <add>, %12, %cst_10 [1] : vector<9x32xf32> to vector<9xf32>
    %14 = vector.shape_cast %13 : vector<9xf32> to vector<9x1xf32>
    %cst_11 = arith.constant 3.200000e+01 : f32
    %15 = vector.broadcast %cst_11 : f32 to vector<9x1xf32>
    %16 = arith.divf %14, %15 : vector<9x1xf32>
    %17 = vector.broadcast %9 : vector<9x1xf32> to vector<9x32xf32>
    %18 = arith.subf %1, %17 : vector<9x32xf32>
    %cst_12 = arith.constant 9.99999974E-6 : f32
    %19 = vector.broadcast %cst_12 : f32 to vector<9x1xf32>
    %20 = arith.addf %16, %19 : vector<9x1xf32>
    %21 = math.rsqrt %20 : vector<9x1xf32>
    %22 = vector.broadcast %21 : vector<9x1xf32> to vector<9x32xf32>
    %23 = arith.mulf %18, %22 : vector<9x32xf32>
    %24 = vector.broadcast %4 : vector<1x32xf32> to vector<9x32xf32>
    %25 = arith.mulf %23, %24 : vector<9x32xf32>
    %26 = vector.broadcast %5 : vector<1x32xf32> to vector<9x32xf32>
    %27 = arith.addf %25, %26 : vector<9x32xf32>
    %c0_13 = arith.constant 0 : index
    %c0_14 = arith.constant 0 : index
    %28 = vector.load %arg5[%c0_13, %c0_14] : memref<1x32xf32, #tpu.memory_space<vmem>>, vector<1x32xf32>
    %c0_15 = arith.constant 0 : index
    %c0_16 = arith.constant 0 : index
    %29 = vector.load %arg6[%c0_15, %c0_16] : memref<1x32xf32, #tpu.memory_space<vmem>>, vector<1x32xf32>
    %cst_17 = arith.constant dense<0.000000e+00> : vector<8xf32>
    %30 = vector.multi_reduction <add>, %3, %cst_17 [1] : vector<8x32xf32> to vector<8xf32>
    %31 = vector.shape_cast %30 : vector<8xf32> to vector<8x1xf32>
    %cst_18 = arith.constant 3.200000e+01 : f32
    %32 = vector.broadcast %cst_18 : f32 to vector<8x1xf32>
    %33 = arith.divf %31, %32 : vector<8x1xf32>
    %34 = vector.broadcast %33 : vector<8x1xf32> to vector<8x32xf32>
    %35 = arith.subf %3, %34 : vector<8x32xf32>
    %36 = arith.mulf %35, %35 : vector<8x32xf32>
    %cst_19 = arith.constant dense<0.000000e+00> : vector<8xf32>
    %37 = vector.multi_reduction <add>, %36, %cst_19 [1] : vector<8x32xf32> to vector<8xf32>
    %38 = vector.shape_cast %37 : vector<8xf32> to vector<8x1xf32>
    %cst_20 = arith.constant 3.200000e+01 : f32
    %39 = vector.broadcast %cst_20 : f32 to vector<8x1xf32>
    %40 = arith.divf %38, %39 : vector<8x1xf32>
    %41 = vector.broadcast %33 : vector<8x1xf32> to vector<8x32xf32>
    %42 = arith.subf %3, %41 : vector<8x32xf32>
    %cst_21 = arith.constant 9.99999974E-6 : f32
    %43 = vector.broadcast %cst_21 : f32 to vector<8x1xf32>
    %44 = arith.addf %40, %43 : vector<8x1xf32>
    %45 = math.rsqrt %44 : vector<8x1xf32>
    %46 = vector.broadcast %45 : vector<8x1xf32> to vector<8x32xf32>
    %47 = arith.mulf %42, %46 : vector<8x32xf32>
    %48 = vector.broadcast %28 : vector<1x32xf32> to vector<8x32xf32>
    %49 = arith.mulf %47, %48 : vector<8x32xf32>
    %50 = vector.broadcast %29 : vector<1x32xf32> to vector<8x32xf32>
    %51 = arith.addf %49, %50 : vector<8x32xf32>
    %c0_22 = arith.constant 0 : index
    %c0_23 = arith.constant 0 : index
    %52 = vector.load %arg7[%c0_22, %c0_23] : memref<32x32xf32, #tpu.memory_space<vmem>>, vector<32x32xf32>
    %cst_24 = arith.constant dense<0.000000e+00> : vector<9x32xf32>
    %53 = tpu.matmul %27, %52, %cst_24 {dimension_numbers = #tpu.dot_dimension_numbers<[1], [0], [0], [1], [0, 0, 1, 1], [], []>} : vector<9x32xf32>, vector<32x32xf32>, vector<9x32xf32> -> vector<9x32xf32>
    %c0_25 = arith.constant 0 : index
    %c0_26 = arith.constant 0 : index
    %54 = vector.load %arg8[%c0_25, %c0_26] : memref<1x32xf32, #tpu.memory_space<vmem>>, vector<1x32xf32>
    %55 = vector.broadcast %54 : vector<1x32xf32> to vector<9x32xf32>
    %56 = arith.addf %53, %55 : vector<9x32xf32>
    %c0_27 = arith.constant 0 : index
    %c0_28 = arith.constant 0 : index
    %57 = vector.load %arg9[%c0_27, %c0_28] : memref<32x64xf32, #tpu.memory_space<vmem>>, vector<32x64xf32>
    %cst_29 = arith.constant dense<0.000000e+00> : vector<8x64xf32>
    %58 = tpu.matmul %51, %57, %cst_29 {dimension_numbers = #tpu.dot_dimension_numbers<[1], [0], [0], [1], [0, 0, 1, 1], [], []>} : vector<8x32xf32>, vector<32x64xf32>, vector<8x64xf32> -> vector<8x64xf32>
    %c0_30 = arith.constant 0 : index
    %c0_31 = arith.constant 0 : index
    %59 = vector.load %arg10[%c0_30, %c0_31] : memref<1x64xf32, #tpu.memory_space<vmem>>, vector<1x64xf32>
    %60 = vector.broadcast %59 : vector<1x64xf32> to vector<8x64xf32>
    %61 = arith.addf %58, %60 : vector<8x64xf32>
    %62 = vector.extract_strided_slice %61 {offsets = [0, 0], sizes = [8, 32], strides = [1, 1]} : vector<8x64xf32> to vector<8x32xf32>
    %63 = vector.extract_strided_slice %61 {offsets = [0, 32], sizes = [8, 32], strides = [1, 1]} : vector<8x64xf32> to vector<8x32xf32>
    %c0_32 = arith.constant 0 : index
    %c0_33 = arith.constant 0 : index
    %64 = vector.load %arg12[%c0_32, %c0_33] : memref<1x32xf32, #tpu.memory_space<vmem>>, vector<1x32xf32>
    %65 = vector.extract_strided_slice %56 {offsets = [0, 0], sizes = [9, 8], strides = [1, 1]} : vector<9x32xf32> to vector<9x8xf32>
    %cst_34 = arith.constant 0.353553385 : f32
    %66 = vector.broadcast %cst_34 : f32 to vector<9x8xf32>
    %67 = arith.mulf %65, %66 : vector<9x8xf32>
    %68 = vector.extract_strided_slice %62 {offsets = [0, 0], sizes = [8, 8], strides = [1, 1]} : vector<8x32xf32> to vector<8x8xf32>
    "tpu.trace_start"() <{level = 10 : i32, message = "qd,kd->qk"}> : () -> ()
    %cst_35 = arith.constant dense<0.000000e+00> : vector<9x8xf32>
    %69 = tpu.matmul %67, %68, %cst_35 {dimension_numbers = #tpu.dot_dimension_numbers<[1], [1], [0], [0], [0, 0, 1, 0], [], []>} : vector<9x8xf32>, vector<8x8xf32>, vector<9x8xf32> -> vector<9x8xf32>
    "tpu.trace_stop"() : () -> ()
    %cst_36 = arith.constant dense<0xFF800000> : vector<9xf32>
    %70 = vector.multi_reduction <maximumf>, %69, %cst_36 [1] : vector<9x8xf32> to vector<9xf32>
    %71 = vector.shape_cast %70 : vector<9xf32> to vector<9x1xf32>
    %72 = vector.broadcast %71 : vector<9x1xf32> to vector<9x8xf32>
    %73 = arith.subf %69, %72 : vector<9x8xf32>
    %74 = math.exp %73 : vector<9x8xf32>
    %cst_37 = arith.constant dense<0.000000e+00> : vector<9xf32>
    %75 = vector.multi_reduction <add>, %74, %cst_37 [1] : vector<9x8xf32> to vector<9xf32>
    %76 = vector.shape_cast %75 : vector<9xf32> to vector<9x1xf32>
    %77 = tpu.reciprocal %76 {approx = true} : vector<9x1xf32> -> vector<9x1xf32>
    %78 = vector.broadcast %77 : vector<9x1xf32> to vector<9x8xf32>
    %79 = arith.mulf %74, %78 : vector<9x8xf32>
    %80 = vector.extract_strided_slice %63 {offsets = [0, 0], sizes = [8, 8], strides = [1, 1]} : vector<8x32xf32> to vector<8x8xf32>
    %cst_38 = arith.constant dense<0.000000e+00> : vector<9x8xf32>
    %81 = tpu.matmul %79, %80, %cst_38 {dimension_numbers = #tpu.dot_dimension_numbers<[1], [0], [0], [1], [0, 0, 1, 1], [], []>} : vector<9x8xf32>, vector<8x8xf32>, vector<9x8xf32> -> vector<9x8xf32>
    %c0_39 = arith.constant 0 : index
    %c0_40 = arith.constant 0 : index
    %82 = vector.load %arg11[%c0_39, %c0_40] : memref<32x32xf32, #tpu.memory_space<vmem>>, vector<8x32xf32>
    %cst_41 = arith.constant dense<0.000000e+00> : vector<9x32xf32>
    %83 = tpu.matmul %81, %82, %cst_41 {dimension_numbers = #tpu.dot_dimension_numbers<[1], [0], [0], [1], [0, 0, 1, 1], [], []>} : vector<9x8xf32>, vector<8x32xf32>, vector<9x32xf32> -> vector<9x32xf32>
    %84 = vector.extract_strided_slice %56 {offsets = [0, 8], sizes = [9, 8], strides = [1, 1]} : vector<9x32xf32> to vector<9x8xf32>
    %cst_42 = arith.constant 0.353553385 : f32
    %85 = vector.broadcast %cst_42 : f32 to vector<9x8xf32>
    %86 = arith.mulf %84, %85 : vector<9x8xf32>
    %87 = vector.extract_strided_slice %62 {offsets = [0, 8], sizes = [8, 8], strides = [1, 1]} : vector<8x32xf32> to vector<8x8xf32>
    "tpu.trace_start"() <{level = 10 : i32, message = "qd,kd->qk"}> : () -> ()
    %cst_43 = arith.constant dense<0.000000e+00> : vector<9x8xf32>
    %88 = tpu.matmul %86, %87, %cst_43 {dimension_numbers = #tpu.dot_dimension_numbers<[1], [1], [0], [0], [0, 0, 1, 0], [], []>} : vector<9x8xf32>, vector<8x8xf32>, vector<9x8xf32> -> vector<9x8xf32>
    "tpu.trace_stop"() : () -> ()
    %cst_44 = arith.constant dense<0xFF800000> : vector<9xf32>
    %89 = vector.multi_reduction <maximumf>, %88, %cst_44 [1] : vector<9x8xf32> to vector<9xf32>
    %90 = vector.shape_cast %89 : vector<9xf32> to vector<9x1xf32>
    %91 = vector.broadcast %90 : vector<9x1xf32> to vector<9x8xf32>
    %92 = arith.subf %88, %91 : vector<9x8xf32>
    %93 = math.exp %92 : vector<9x8xf32>
    %cst_45 = arith.constant dense<0.000000e+00> : vector<9xf32>
    %94 = vector.multi_reduction <add>, %93, %cst_45 [1] : vector<9x8xf32> to vector<9xf32>
    %95 = vector.shape_cast %94 : vector<9xf32> to vector<9x1xf32>
    %96 = tpu.reciprocal %95 {approx = true} : vector<9x1xf32> -> vector<9x1xf32>
    %97 = vector.broadcast %96 : vector<9x1xf32> to vector<9x8xf32>
    %98 = arith.mulf %93, %97 : vector<9x8xf32>
    %99 = vector.extract_strided_slice %63 {offsets = [0, 8], sizes = [8, 8], strides = [1, 1]} : vector<8x32xf32> to vector<8x8xf32>
    %cst_46 = arith.constant dense<0.000000e+00> : vector<9x8xf32>
    %100 = tpu.matmul %98, %99, %cst_46 {dimension_numbers = #tpu.dot_dimension_numbers<[1], [0], [0], [1], [0, 0, 1, 1], [], []>} : vector<9x8xf32>, vector<8x8xf32>, vector<9x8xf32> -> vector<9x8xf32>
    %c8 = arith.constant 8 : index
    %c0_47 = arith.constant 0 : index
    %101 = vector.load %arg11[%c8, %c0_47] : memref<32x32xf32, #tpu.memory_space<vmem>>, vector<8x32xf32>
    %cst_48 = arith.constant dense<0.000000e+00> : vector<9x32xf32>
    %102 = tpu.matmul %100, %101, %cst_48 {dimension_numbers = #tpu.dot_dimension_numbers<[1], [0], [0], [1], [0, 0, 1, 1], [], []>} : vector<9x8xf32>, vector<8x32xf32>, vector<9x32xf32> -> vector<9x32xf32>
    %103 = arith.addf %83, %102 : vector<9x32xf32>
    %104 = vector.extract_strided_slice %56 {offsets = [0, 16], sizes = [9, 8], strides = [1, 1]} : vector<9x32xf32> to vector<9x8xf32>
    %cst_49 = arith.constant 0.353553385 : f32
    %105 = vector.broadcast %cst_49 : f32 to vector<9x8xf32>
    %106 = arith.mulf %104, %105 : vector<9x8xf32>
    %107 = vector.extract_strided_slice %62 {offsets = [0, 16], sizes = [8, 8], strides = [1, 1]} : vector<8x32xf32> to vector<8x8xf32>
    "tpu.trace_start"() <{level = 10 : i32, message = "qd,kd->qk"}> : () -> ()
    %cst_50 = arith.constant dense<0.000000e+00> : vector<9x8xf32>
    %108 = tpu.matmul %106, %107, %cst_50 {dimension_numbers = #tpu.dot_dimension_numbers<[1], [1], [0], [0], [0, 0, 1, 0], [], []>} : vector<9x8xf32>, vector<8x8xf32>, vector<9x8xf32> -> vector<9x8xf32>
    "tpu.trace_stop"() : () -> ()
    %cst_51 = arith.constant dense<0xFF800000> : vector<9xf32>
    %109 = vector.multi_reduction <maximumf>, %108, %cst_51 [1] : vector<9x8xf32> to vector<9xf32>
    %110 = vector.shape_cast %109 : vector<9xf32> to vector<9x1xf32>
    %111 = vector.broadcast %110 : vector<9x1xf32> to vector<9x8xf32>
    %112 = arith.subf %108, %111 : vector<9x8xf32>
    %113 = math.exp %112 : vector<9x8xf32>
    %cst_52 = arith.constant dense<0.000000e+00> : vector<9xf32>
    %114 = vector.multi_reduction <add>, %113, %cst_52 [1] : vector<9x8xf32> to vector<9xf32>
    %115 = vector.shape_cast %114 : vector<9xf32> to vector<9x1xf32>
    %116 = tpu.reciprocal %115 {approx = true} : vector<9x1xf32> -> vector<9x1xf32>
    %117 = vector.broadcast %116 : vector<9x1xf32> to vector<9x8xf32>
    %118 = arith.mulf %113, %117 : vector<9x8xf32>
    %119 = vector.extract_strided_slice %63 {offsets = [0, 16], sizes = [8, 8], strides = [1, 1]} : vector<8x32xf32> to vector<8x8xf32>
    %cst_53 = arith.constant dense<0.000000e+00> : vector<9x8xf32>
    %120 = tpu.matmul %118, %119, %cst_53 {dimension_numbers = #tpu.dot_dimension_numbers<[1], [0], [0], [1], [0, 0, 1, 1], [], []>} : vector<9x8xf32>, vector<8x8xf32>, vector<9x8xf32> -> vector<9x8xf32>
    %c16 = arith.constant 16 : index
    %c0_54 = arith.constant 0 : index
    %121 = vector.load %arg11[%c16, %c0_54] : memref<32x32xf32, #tpu.memory_space<vmem>>, vector<8x32xf32>
    %cst_55 = arith.constant dense<0.000000e+00> : vector<9x32xf32>
    %122 = tpu.matmul %120, %121, %cst_55 {dimension_numbers = #tpu.dot_dimension_numbers<[1], [0], [0], [1], [0, 0, 1, 1], [], []>} : vector<9x8xf32>, vector<8x32xf32>, vector<9x32xf32> -> vector<9x32xf32>
    %123 = arith.addf %103, %122 : vector<9x32xf32>
    %124 = vector.extract_strided_slice %56 {offsets = [0, 24], sizes = [9, 8], strides = [1, 1]} : vector<9x32xf32> to vector<9x8xf32>
    %cst_56 = arith.constant 0.353553385 : f32
    %125 = vector.broadcast %cst_56 : f32 to vector<9x8xf32>
    %126 = arith.mulf %124, %125 : vector<9x8xf32>
    %127 = vector.extract_strided_slice %62 {offsets = [0, 24], sizes = [8, 8], strides = [1, 1]} : vector<8x32xf32> to vector<8x8xf32>
    "tpu.trace_start"() <{level = 10 : i32, message = "qd,kd->qk"}> : () -> ()
    %cst_57 = arith.constant dense<0.000000e+00> : vector<9x8xf32>
    %128 = tpu.matmul %126, %127, %cst_57 {dimension_numbers = #tpu.dot_dimension_numbers<[1], [1], [0], [0], [0, 0, 1, 0], [], []>} : vector<9x8xf32>, vector<8x8xf32>, vector<9x8xf32> -> vector<9x8xf32>
    "tpu.trace_stop"() : () -> ()
    %cst_58 = arith.constant dense<0xFF800000> : vector<9xf32>
    %129 = vector.multi_reduction <maximumf>, %128, %cst_58 [1] : vector<9x8xf32> to vector<9xf32>
    %130 = vector.shape_cast %129 : vector<9xf32> to vector<9x1xf32>
    %131 = vector.broadcast %130 : vector<9x1xf32> to vector<9x8xf32>
    %132 = arith.subf %128, %131 : vector<9x8xf32>
    %133 = math.exp %132 : vector<9x8xf32>
    %cst_59 = arith.constant dense<0.000000e+00> : vector<9xf32>
    %134 = vector.multi_reduction <add>, %133, %cst_59 [1] : vector<9x8xf32> to vector<9xf32>
    %135 = vector.shape_cast %134 : vector<9xf32> to vector<9x1xf32>
    %136 = tpu.reciprocal %135 {approx = true} : vector<9x1xf32> -> vector<9x1xf32>
    %137 = vector.broadcast %136 : vector<9x1xf32> to vector<9x8xf32>
    %138 = arith.mulf %133, %137 : vector<9x8xf32>
    %139 = vector.extract_strided_slice %63 {offsets = [0, 24], sizes = [8, 8], strides = [1, 1]} : vector<8x32xf32> to vector<8x8xf32>
    %cst_60 = arith.constant dense<0.000000e+00> : vector<9x8xf32>
    %140 = tpu.matmul %138, %139, %cst_60 {dimension_numbers = #tpu.dot_dimension_numbers<[1], [0], [0], [1], [0, 0, 1, 1], [], []>} : vector<9x8xf32>, vector<8x8xf32>, vector<9x8xf32> -> vector<9x8xf32>
    %c24 = arith.constant 24 : index
    %c0_61 = arith.constant 0 : index
    %141 = vector.load %arg11[%c24, %c0_61] : memref<32x32xf32, #tpu.memory_space<vmem>>, vector<8x32xf32>
    %cst_62 = arith.constant dense<0.000000e+00> : vector<9x32xf32>
    %142 = tpu.matmul %140, %141, %cst_62 {dimension_numbers = #tpu.dot_dimension_numbers<[1], [0], [0], [1], [0, 0, 1, 1], [], []>} : vector<9x8xf32>, vector<8x32xf32>, vector<9x32xf32> -> vector<9x32xf32>
    %143 = arith.addf %123, %142 : vector<9x32xf32>
    %144 = vector.broadcast %64 : vector<1x32xf32> to vector<9x32xf32>
    %145 = arith.addf %143, %144 : vector<9x32xf32>
    %146 = arith.addf %1, %145 : vector<9x32xf32>
    %c0_63 = arith.constant 0 : index
    %c0_64 = arith.constant 0 : index
    %147 = vector.load %arg13[%c0_63, %c0_64] : memref<1x32xf32, #tpu.memory_space<vmem>>, vector<1x32xf32>
    %c0_65 = arith.constant 0 : index
    %c0_66 = arith.constant 0 : index
    %148 = vector.load %arg14[%c0_65, %c0_66] : memref<1x32xf32, #tpu.memory_space<vmem>>, vector<1x32xf32>
    %cst_67 = arith.constant dense<0.000000e+00> : vector<9xf32>
    %149 = vector.multi_reduction <add>, %146, %cst_67 [1] : vector<9x32xf32> to vector<9xf32>
    %150 = vector.shape_cast %149 : vector<9xf32> to vector<9x1xf32>
    %cst_68 = arith.constant 3.200000e+01 : f32
    %151 = vector.broadcast %cst_68 : f32 to vector<9x1xf32>
    %152 = arith.divf %150, %151 : vector<9x1xf32>
    %153 = vector.broadcast %152 : vector<9x1xf32> to vector<9x32xf32>
    %154 = arith.subf %146, %153 : vector<9x32xf32>
    %155 = arith.mulf %154, %154 : vector<9x32xf32>
    %cst_69 = arith.constant dense<0.000000e+00> : vector<9xf32>
    %156 = vector.multi_reduction <add>, %155, %cst_69 [1] : vector<9x32xf32> to vector<9xf32>
    %157 = vector.shape_cast %156 : vector<9xf32> to vector<9x1xf32>
    %cst_70 = arith.constant 3.200000e+01 : f32
    %158 = vector.broadcast %cst_70 : f32 to vector<9x1xf32>
    %159 = arith.divf %157, %158 : vector<9x1xf32>
    %160 = vector.broadcast %152 : vector<9x1xf32> to vector<9x32xf32>
    %161 = arith.subf %146, %160 : vector<9x32xf32>
    %cst_71 = arith.constant 9.99999974E-6 : f32
    %162 = vector.broadcast %cst_71 : f32 to vector<9x1xf32>
    %163 = arith.addf %159, %162 : vector<9x1xf32>
    %164 = math.rsqrt %163 : vector<9x1xf32>
    %165 = vector.broadcast %164 : vector<9x1xf32> to vector<9x32xf32>
    %166 = arith.mulf %161, %165 : vector<9x32xf32>
    %167 = vector.broadcast %147 : vector<1x32xf32> to vector<9x32xf32>
    %168 = arith.mulf %166, %167 : vector<9x32xf32>
    %169 = vector.broadcast %148 : vector<1x32xf32> to vector<9x32xf32>
    %170 = arith.addf %168, %169 : vector<9x32xf32>
    %c0_72 = arith.constant 0 : index
    %c0_73 = arith.constant 0 : index
    %171 = vector.load %arg15[%c0_72, %c0_73] : memref<32x128xf32, #tpu.memory_space<vmem>>, vector<32x128xf32>
    %c0_74 = arith.constant 0 : index
    %c0_75 = arith.constant 0 : index
    %172 = vector.load %arg16[%c0_74, %c0_75] : memref<1x128xf32, #tpu.memory_space<vmem>>, vector<1x128xf32>
    %c0_76 = arith.constant 0 : index
    %c0_77 = arith.constant 0 : index
    %173 = vector.load %arg17[%c0_76, %c0_77] : memref<128x32xf32, #tpu.memory_space<vmem>>, vector<128x32xf32>
    %c0_78 = arith.constant 0 : index
    %c0_79 = arith.constant 0 : index
    %174 = vector.load %arg18[%c0_78, %c0_79] : memref<1x32xf32, #tpu.memory_space<vmem>>, vector<1x32xf32>
    %cst_80 = arith.constant dense<0.000000e+00> : vector<9x128xf32>
    %175 = tpu.matmul %170, %171, %cst_80 {dimension_numbers = #tpu.dot_dimension_numbers<[1], [0], [0], [1], [0, 0, 1, 1], [], []>} : vector<9x32xf32>, vector<32x128xf32>, vector<9x128xf32> -> vector<9x128xf32>
    %176 = vector.broadcast %172 : vector<1x128xf32> to vector<9x128xf32>
    %177 = arith.addf %175, %176 : vector<9x128xf32>
    %178 = arith.mulf %177, %177 : vector<9x128xf32>
    %179 = arith.mulf %177, %178 : vector<9x128xf32>
    %cst_81 = arith.constant 4.471500e-02 : f32
    %180 = vector.broadcast %cst_81 : f32 to vector<9x128xf32>
    %181 = arith.mulf %180, %179 : vector<9x128xf32>
    %182 = arith.addf %177, %181 : vector<9x128xf32>
    %cst_82 = arith.constant 0.797884583 : f32
    %183 = vector.broadcast %cst_82 : f32 to vector<9x128xf32>
    %184 = arith.mulf %183, %182 : vector<9x128xf32>
    %185 = math.tanh %184 : vector<9x128xf32>
    %cst_83 = arith.constant 1.000000e+00 : f32
    %186 = vector.broadcast %cst_83 : f32 to vector<9x128xf32>
    %187 = arith.addf %186, %185 : vector<9x128xf32>
    %cst_84 = arith.constant 5.000000e-01 : f32
    %188 = vector.broadcast %cst_84 : f32 to vector<9x128xf32>
    %189 = arith.mulf %188, %187 : vector<9x128xf32>
    %190 = arith.mulf %177, %189 : vector<9x128xf32>
    %cst_85 = arith.constant dense<0.000000e+00> : vector<9x32xf32>
    %191 = tpu.matmul %190, %173, %cst_85 {dimension_numbers = #tpu.dot_dimension_numbers<[1], [0], [0], [1], [0, 0, 1, 1], [], []>} : vector<9x128xf32>, vector<128x32xf32>, vector<9x32xf32> -> vector<9x32xf32>
    %192 = vector.broadcast %174 : vector<1x32xf32> to vector<9x32xf32>
    %193 = arith.addf %191, %192 : vector<9x32xf32>
    %194 = arith.addf %146, %193 : vector<9x32xf32>
    %c0_86 = arith.constant 0 : index
    %c0_87 = arith.constant 0 : index
    %c0_88 = arith.constant 0 : index
    %195 = vector.load %arg19[%c0_86, %c0_87, %c0_88] : memref<1x9x32xf32, #tpu.memory_space<vmem>>, vector<1x9x32xf32>
    %196 = vector.shape_cast %195 : vector<1x9x32xf32> to vector<9x32xf32>
    %197 = vector.shape_cast %194 : vector<9x32xf32> to vector<1x9x32xf32>
    tpu.vector_store %arg19[%c0_86, %c0_87, %c0_88], %197 {strides = array<i32>} : memref<1x9x32xf32, #tpu.memory_space<vmem>>, vector<1x9x32xf32>,
    return
  }
  func.func @transform_0(%arg0: i32) -> (i32, i32, i32) {
    %c0_i32 = arith.constant 0 : i32
    %c0_i32_0 = arith.constant 0 : i32
    %c0_i32_1 = arith.constant 0 : i32
    return %arg0, %c0_i32, %c0_i32_0 : i32, i32, i32
  }
  func.func @transform_1(%arg0: i32) -> (i32, i32, i32) {
    %c0_i32 = arith.constant 0 : i32
    %c0_i32_0 = arith.constant 0 : i32
    %c0_i32_1 = arith.constant 0 : i32
    return %arg0, %c0_i32, %c0_i32_0 : i32, i32, i32
  }
  func.func @transform_2(%arg0: i32) -> (i32, i32) {
    %c0_i32 = arith.constant 0 : i32
    %c0_i32_0 = arith.constant 0 : i32
    %c0_i32_1 = arith.constant 0 : i32
    return %c0_i32, %c0_i32_0 : i32, i32
  }
  func.func @transform_3(%arg0: i32) -> (i32, i32) {
    %c0_i32 = arith.constant 0 : i32
    %c0_i32_0 = arith.constant 0 : i32
    %c0_i32_1 = arith.constant 0 : i32
    return %c0_i32, %c0_i32_0 : i32, i32
  }
  func.func @transform_4(%arg0: i32) -> (i32, i32) {
    %c0_i32 = arith.constant 0 : i32
    %c0_i32_0 = arith.constant 0 : i32
    %c0_i32_1 = arith.constant 0 : i32
    return %c0_i32, %c0_i32_0 : i32, i32
  }
  func.func @transform_5(%arg0: i32) -> (i32, i32) {
    %c0_i32 = arith.constant 0 : i32
    %c0_i32_0 = arith.constant 0 : i32
    %c0_i32_1 = arith.constant 0 : i32
    return %c0_i32, %c0_i32_0 : i32, i32
  }
  func.func @transform_6(%arg0: i32) -> (i32, i32) {
    %c0_i32 = arith.constant 0 : i32
    %c0_i32_0 = arith.constant 0 : i32
    %c0_i32_1 = arith.constant 0 : i32
    return %c0_i32, %c0_i32_0 : i32, i32
  }
  func.func @transform_7(%arg0: i32) -> (i32, i32) {
    %c0_i32 = arith.constant 0 : i32
    %c0_i32_0 = arith.constant 0 : i32
    %c0_i32_1 = arith.constant 0 : i32
    return %c0_i32, %c0_i32_0 : i32, i32
  }
  func.func @transform_8(%arg0: i32) -> (i32, i32) {
    %c0_i32 = arith.constant 0 : i32
    %c0_i32_0 = arith.constant 0 : i32
    %c0_i32_1 = arith.constant 0 : i32
    return %c0_i32, %c0_i32_0 : i32, i32
  }
  func.func @transform_9(%arg0: i32) -> (i32, i32) {
    %c0_i32 = arith.constant 0 : i32
    %c0_i32_0 = arith.constant 0 : i32
    %c0_i32_1 = arith.constant 0 : i32
    return %c0_i32, %c0_i32_0 : i32, i32
  }
  func.func @transform_10(%arg0: i32) -> (i32, i32) {
    %c0_i32 = arith.constant 0 : i32
    %c0_i32_0 = arith.constant 0 : i32
    %c0_i32_1 = arith.constant 0 : i32
    return %c0_i32, %c0_i32_0 : i32, i32
  }
  func.func @transform_11(%arg0: i32) -> (i32, i32) {
    %c0_i32 = arith.constant 0 : i32
    %c0_i32_0 = arith.constant 0 : i32
    %c0_i32_1 = arith.constant 0 : i32
    return %c0_i32, %c0_i32_0 : i32, i32
  }
  func.func @transform_12(%arg0: i32) -> (i32, i32) {
    %c0_i32 = arith.constant 0 : i32
    %c0_i32_0 = arith.constant 0 : i32
    %c0_i32_1 = arith.constant 0 : i32
    return %c0_i32, %c0_i32_0 : i32, i32
  }
  func.func @transform_13(%arg0: i32) -> (i32, i32) {
    %c0_i32 = arith.constant 0 : i32
    %c0_i32_0 = arith.constant 0 : i32
    %c0_i32_1 = arith.constant 0 : i32
    return %c0_i32, %c0_i32_0 : i32, i32
  }
  func.func @transform_14(%arg0: i32) -> (i32, i32) {
    %c0_i32 = arith.constant 0 : i32
    %c0_i32_0 = arith.constant 0 : i32
    %c0_i32_1 = arith.constant 0 : i32
    return %c0_i32, %c0_i32_0 : i32, i32
  }
  func.func @transform_15(%arg0: i32) -> (i32, i32) {
    %c0_i32 = arith.constant 0 : i32
    %c0_i32_0 = arith.constant 0 : i32
    %c0_i32_1 = arith.constant 0 : i32
    return %c0_i32, %c0_i32_0 : i32, i32
  }
  func.func @transform_16(%arg0: i32) -> (i32, i32) {
    %c0_i32 = arith.constant 0 : i32
    %c0_i32_0 = arith.constant 0 : i32
    %c0_i32_1 = arith.constant 0 : i32
    return %c0_i32, %c0_i32_0 : i32, i32
  }
  func.func @transform_17(%arg0: i32) -> (i32, i32) {
    %c0_i32 = arith.constant 0 : i32
    %c0_i32_0 = arith.constant 0 : i32
    %c0_i32_1 = arith.constant 0 : i32
    return %c0_i32, %c0_i32_0 : i32, i32
  }
  func.func @transform_18(%arg0: i32) -> (i32, i32, i32) {
    %c0_i32 = arith.constant 0 : i32
    %c0_i32_0 = arith.constant 0 : i32
    %c0_i32_1 = arith.constant 0 : i32
    return %arg0, %c0_i32, %c0_i32_0 : i32, i32, i32
  }
}

module attributes {stable_mosaic.version = 11 : i64} {
  func.func @_mlp_kernel(%arg0: memref<16x32xf32, #tpu.memory_space<vmem>>, %arg1: memref<32x64xf32, #tpu.memory_space<vmem>>, %arg2: memref<1x64xf32, #tpu.memory_space<vmem>>, %arg3: memref<16x64xf32, #tpu.memory_space<vmem>>) attributes {dimension_semantics = [], scalar_prefetch = 0 : i64, scratch_operands = 0 : i64, tpu.core_type = #tpu.core_type<tc>} {
    %c0 = arith.constant 0 : index
    %c0_0 = arith.constant 0 : index
    %0 = vector.load %arg0[%c0, %c0_0] : memref<16x32xf32, #tpu.memory_space<vmem>>, vector<16x32xf32>
    %c0_1 = arith.constant 0 : index
    %c0_2 = arith.constant 0 : index
    %1 = vector.load %arg1[%c0_1, %c0_2] : memref<32x64xf32, #tpu.memory_space<vmem>>, vector<32x64xf32>
    %c0_3 = arith.constant 0 : index
    %c0_4 = arith.constant 0 : index
    %2 = vector.load %arg2[%c0_3, %c0_4] : memref<1x64xf32, #tpu.memory_space<vmem>>, vector<1x64xf32>
    %cst = arith.constant dense<0.000000e+00> : vector<16x64xf32>
    %3 = tpu.matmul %0, %1, %cst {dimension_numbers = #tpu.dot_dimension_numbers<[1], [0], [0], [1], [0, 0, 1, 1], [], []>} : vector<16x32xf32>, vector<32x64xf32>, vector<16x64xf32> -> vector<16x64xf32>
    %4 = vector.broadcast %2 : vector<1x64xf32> to vector<16x64xf32>
    %5 = arith.addf %3, %4 : vector<16x64xf32>
    %c0_5 = arith.constant 0 : index
    %c0_6 = arith.constant 0 : index
    %6 = vector.load %arg3[%c0_5, %c0_6] : memref<16x64xf32, #tpu.memory_space<vmem>>, vector<16x64xf32>
    tpu.vector_store %arg3[%c0_5, %c0_6], %5 {strides = array<i32>} : memref<16x64xf32, #tpu.memory_space<vmem>>, vector<16x64xf32>,
    return
  }
}

module attributes {stable_mosaic.version = 11 : i64} {
  func.func @_self_block_kernel(%arg0: i32, %arg1: memref<1x8x32xf32, #tpu.memory_space<vmem>>, %arg2: memref<1x32xf32, #tpu.memory_space<vmem>>, %arg3: memref<1x32xf32, #tpu.memory_space<vmem>>, %arg4: memref<32x96xf32, #tpu.memory_space<vmem>>, %arg5: memref<1x96xf32, #tpu.memory_space<vmem>>, %arg6: memref<32x32xf32, #tpu.memory_space<vmem>>, %arg7: memref<1x32xf32, #tpu.memory_space<vmem>>, %arg8: memref<1x32xf32, #tpu.memory_space<vmem>>, %arg9: memref<1x32xf32, #tpu.memory_space<vmem>>, %arg10: memref<32x128xf32, #tpu.memory_space<vmem>>, %arg11: memref<1x128xf32, #tpu.memory_space<vmem>>, %arg12: memref<128x32xf32, #tpu.memory_space<vmem>>, %arg13: memref<1x32xf32, #tpu.memory_space<vmem>>, %arg14: memref<1x8x32xf32, #tpu.memory_space<vmem>>) attributes {dimension_semantics = [#tpu.dimension_semantics<parallel>], iteration_bounds = array<i64: 2>, scalar_prefetch = 0 : i64, scratch_operands = 0 : i64, tpu.core_type = #tpu.core_type<tc>, window_params = [{transform_indices = @transform_0, window_bounds = array<i64: 1, 8, 32>}, {pipeline_mode = #tpu.pipeline_mode<synchronous>, transform_indices = @transform_1, window_bounds = array<i64: 1, 32>}, {pipeline_mode = #tpu.pipeline_mode<synchronous>, transform_indices = @transform_2, window_bounds = array<i64: 1, 32>}, {pipeline_mode = #tpu.pipeline_mode<synchronous>, transform_indices = @transform_3, window_bounds = array<i64: 32, 96>}, {pipeline_mode = #tpu.pipeline_mode<synchronous>, transform_indices = @transform_4, window_bounds = array<i64: 1, 96>}, {pipeline_mode = #tpu.pipeline_mode<synchronous>, transform_indices = @transform_5, window_bounds = array<i64: 32, 32>}, {pipeline_mode = #tpu.pipeline_mode<synchronous>, transform_indices = @transform_6, window_bounds = array<i64: 1, 32>}, {pipeline_mode = #tpu.pipeline_mode<synchronous>, transform_indices = @transform_7, window_bounds = array<i64: 1, 32>}, {pipeline_mode = #tpu.pipeline_mode<synchronous>, transform_indices = @transform_8, window_bounds = array<i64: 1, 32>}, {pipeline_mode = #tpu.pipeline_mode<synchronous>, transform_indices = @transform_9, window_bounds = array<i64: 32, 128>}, {pipeline_mode = #tpu.pipeline_mode<synchronous>, transform_indices = @transform_10, window_bounds = array<i64: 1, 128>}, {pipeline_mode = #tpu.pipeline_mode<synchronous>, transform_indices = @transform_11, window_bounds = array<i64: 128, 32>}, {pipeline_mode = #tpu.pipeline_mode<synchronous>, transform_indices = @transform_12, window_bounds = array<i64: 1, 32>}, {transform_indices = @transform_13, window_bounds = array<i64: 1, 8, 32>}]} {
    %c0 = arith.constant 0 : index
    %c0_0 = arith.constant 0 : index
    %c0_1 = arith.constant 0 : index
    %0 = vector.load %arg1[%c0, %c0_0, %c0_1] : memref<1x8x32xf32, #tpu.memory_space<vmem>>, vector<1x8x32xf32>
    %1 = vector.shape_cast %0 : vector<1x8x32xf32> to vector<8x32xf32>
    %c0_2 = arith.constant 0 : index
    %c0_3 = arith.constant 0 : index
    %2 = vector.load %arg2[%c0_2, %c0_3] : memref<1x32xf32, #tpu.memory_space<vmem>>, vector<1x32xf32>
    %c0_4 = arith.constant 0 : index
    %c0_5 = arith.constant 0 : index
    %3 = vector.load %arg3[%c0_4, %c0_5] : memref<1x32xf32, #tpu.memory_space<vmem>>, vector<1x32xf32>
    %cst = arith.constant dense<0.000000e+00> : vector<8xf32>
    %4 = vector.multi_reduction <add>, %1, %cst [1] : vector<8x32xf32> to vector<8xf32>
    %5 = vector.shape_cast %4 : vector<8xf32> to vector<8x1xf32>
    %cst_6 = arith.constant 3.200000e+01 : f32
    %6 = vector.broadcast %cst_6 : f32 to vector<8x1xf32>
    %7 = arith.divf %5, %6 : vector<8x1xf32>
    %8 = vector.broadcast %7 : vector<8x1xf32> to vector<8x32xf32>
    %9 = arith.subf %1, %8 : vector<8x32xf32>
    %10 = arith.mulf %9, %9 : vector<8x32xf32>
    %cst_7 = arith.constant dense<0.000000e+00> : vector<8xf32>
    %11 = vector.multi_reduction <add>, %10, %cst_7 [1] : vector<8x32xf32> to vector<8xf32>
    %12 = vector.shape_cast %11 : vector<8xf32> to vector<8x1xf32>
    %cst_8 = arith.constant 3.200000e+01 : f32
    %13 = vector.broadcast %cst_8 : f32 to vector<8x1xf32>
    %14 = arith.divf %12, %13 : vector<8x1xf32>
    %15 = vector.broadcast %7 : vector<8x1xf32> to vector<8x32xf32>
    %16 = arith.subf %1, %15 : vector<8x32xf32>
    %cst_9 = arith.constant 9.99999974E-6 : f32
    %17 = vector.broadcast %cst_9 : f32 to vector<8x1xf32>
    %18 = arith.addf %14, %17 : vector<8x1xf32>
    %19 = math.rsqrt %18 : vector<8x1xf32>
    %20 = vector.broadcast %19 : vector<8x1xf32> to vector<8x32xf32>
    %21 = arith.mulf %16, %20 : vector<8x32xf32>
    %22 = vector.broadcast %2 : vector<1x32xf32> to vector<8x32xf32>
    %23 = arith.mulf %21, %22 : vector<8x32xf32>
    %24 = vector.broadcast %3 : vector<1x32xf32> to vector<8x32xf32>
    %25 = arith.addf %23, %24 : vector<8x32xf32>
    %c0_10 = arith.constant 0 : index
    %c0_11 = arith.constant 0 : index
    %26 = vector.load %arg4[%c0_10, %c0_11] : memref<32x96xf32, #tpu.memory_space<vmem>>, vector<32x96xf32>
    %cst_12 = arith.constant dense<0.000000e+00> : vector<8x96xf32>
    %27 = tpu.matmul %25, %26, %cst_12 {dimension_numbers = #tpu.dot_dimension_numbers<[1], [0], [0], [1], [0, 0, 1, 1], [], []>} : vector<8x32xf32>, vector<32x96xf32>, vector<8x96xf32> -> vector<8x96xf32>
    %c0_13 = arith.constant 0 : index
    %c0_14 = arith.constant 0 : index
    %28 = vector.load %arg5[%c0_13, %c0_14] : memref<1x96xf32, #tpu.memory_space<vmem>>, vector<1x96xf32>
    %29 = vector.broadcast %28 : vector<1x96xf32> to vector<8x96xf32>
    %30 = arith.addf %27, %29 : vector<8x96xf32>
    %31 = vector.extract_strided_slice %30 {offsets = [0, 0], sizes = [8, 32], strides = [1, 1]} : vector<8x96xf32> to vector<8x32xf32>
    %32 = vector.extract_strided_slice %30 {offsets = [0, 32], sizes = [8, 32], strides = [1, 1]} : vector<8x96xf32> to vector<8x32xf32>
    %33 = vector.extract_strided_slice %30 {offsets = [0, 64], sizes = [8, 32], strides = [1, 1]} : vector<8x96xf32> to vector<8x32xf32>
    %c0_15 = arith.constant 0 : index
    %c0_16 = arith.constant 0 : index
    %34 = vector.load %arg7[%c0_15, %c0_16] : memref<1x32xf32, #tpu.memory_space<vmem>>, vector<1x32xf32>
    %35 = vector.extract_strided_slice %31 {offsets = [0, 0], sizes = [8, 8], strides = [1, 1]} : vector<8x32xf32> to vector<8x8xf32>
    %cst_17 = arith.constant 0.353553385 : f32
    %36 = vector.broadcast %cst_17 : f32 to vector<8x8xf32>
    %37 = arith.mulf %35, %36 : vector<8x8xf32>
    %38 = vector.extract_strided_slice %32 {offsets = [0, 0], sizes = [8, 8], strides = [1, 1]} : vector<8x32xf32> to vector<8x8xf32>
    "tpu.trace_start"() <{level = 10 : i32, message = "qd,kd->qk"}> : () -> ()
    %cst_18 = arith.constant dense<0.000000e+00> : vector<8x8xf32>
    %39 = tpu.matmul %37, %38, %cst_18 {dimension_numbers = #tpu.dot_dimension_numbers<[1], [1], [0], [0], [0, 0, 1, 0], [], []>} : vector<8x8xf32>, vector<8x8xf32>, vector<8x8xf32> -> vector<8x8xf32>
    "tpu.trace_stop"() : () -> ()
    %cst_19 = arith.constant dense<0xFF800000> : vector<8xf32>
    %40 = vector.multi_reduction <maximumf>, %39, %cst_19 [1] : vector<8x8xf32> to vector<8xf32>
    %41 = vector.shape_cast %40 : vector<8xf32> to vector<8x1xf32>
    %42 = vector.broadcast %41 : vector<8x1xf32> to vector<8x8xf32>
    %43 = arith.subf %39, %42 : vector<8x8xf32>
    %44 = math.exp %43 : vector<8x8xf32>
    %cst_20 = arith.constant dense<0.000000e+00> : vector<8xf32>
    %45 = vector.multi_reduction <add>, %44, %cst_20 [1] : vector<8x8xf32> to vector<8xf32>
    %46 = vector.shape_cast %45 : vector<8xf32> to vector<8x1xf32>
    %47 = tpu.reciprocal %46 {approx = true} : vector<8x1xf32> -> vector<8x1xf32>
    %48 = vector.broadcast %47 : vector<8x1xf32> to vector<8x8xf32>
    %49 = arith.mulf %44, %48 : vector<8x8xf32>
    %50 = vector.extract_strided_slice %33 {offsets = [0, 0], sizes = [8, 8], strides = [1, 1]} : vector<8x32xf32> to vector<8x8xf32>
    %cst_21 = arith.constant dense<0.000000e+00> : vector<8x8xf32>
    %51 = tpu.matmul %49, %50, %cst_21 {dimension_numbers = #tpu.dot_dimension_numbers<[1], [0], [0], [1], [0, 0, 1, 1], [], []>} : vector<8x8xf32>, vector<8x8xf32>, vector<8x8xf32> -> vector<8x8xf32>
    %c0_22 = arith.constant 0 : index
    %c0_23 = arith.constant 0 : index
    %52 = vector.load %arg6[%c0_22, %c0_23] : memref<32x32xf32, #tpu.memory_space<vmem>>, vector<8x32xf32>
    %cst_24 = arith.constant dense<0.000000e+00> : vector<8x32xf32>
    %53 = tpu.matmul %51, %52, %cst_24 {dimension_numbers = #tpu.dot_dimension_numbers<[1], [0], [0], [1], [0, 0, 1, 1], [], []>} : vector<8x8xf32>, vector<8x32xf32>, vector<8x32xf32> -> vector<8x32xf32>
    %54 = vector.extract_strided_slice %31 {offsets = [0, 8], sizes = [8, 8], strides = [1, 1]} : vector<8x32xf32> to vector<8x8xf32>
    %cst_25 = arith.constant 0.353553385 : f32
    %55 = vector.broadcast %cst_25 : f32 to vector<8x8xf32>
    %56 = arith.mulf %54, %55 : vector<8x8xf32>
    %57 = vector.extract_strided_slice %32 {offsets = [0, 8], sizes = [8, 8], strides = [1, 1]} : vector<8x32xf32> to vector<8x8xf32>
    "tpu.trace_start"() <{level = 10 : i32, message = "qd,kd->qk"}> : () -> ()
    %cst_26 = arith.constant dense<0.000000e+00> : vector<8x8xf32>
    %58 = tpu.matmul %56, %57, %cst_26 {dimension_numbers = #tpu.dot_dimension_numbers<[1], [1], [0], [0], [0, 0, 1, 0], [], []>} : vector<8x8xf32>, vector<8x8xf32>, vector<8x8xf32> -> vector<8x8xf32>
    "tpu.trace_stop"() : () -> ()
    %cst_27 = arith.constant dense<0xFF800000> : vector<8xf32>
    %59 = vector.multi_reduction <maximumf>, %58, %cst_27 [1] : vector<8x8xf32> to vector<8xf32>
    %60 = vector.shape_cast %59 : vector<8xf32> to vector<8x1xf32>
    %61 = vector.broadcast %60 : vector<8x1xf32> to vector<8x8xf32>
    %62 = arith.subf %58, %61 : vector<8x8xf32>
    %63 = math.exp %62 : vector<8x8xf32>
    %cst_28 = arith.constant dense<0.000000e+00> : vector<8xf32>
    %64 = vector.multi_reduction <add>, %63, %cst_28 [1] : vector<8x8xf32> to vector<8xf32>
    %65 = vector.shape_cast %64 : vector<8xf32> to vector<8x1xf32>
    %66 = tpu.reciprocal %65 {approx = true} : vector<8x1xf32> -> vector<8x1xf32>
    %67 = vector.broadcast %66 : vector<8x1xf32> to vector<8x8xf32>
    %68 = arith.mulf %63, %67 : vector<8x8xf32>
    %69 = vector.extract_strided_slice %33 {offsets = [0, 8], sizes = [8, 8], strides = [1, 1]} : vector<8x32xf32> to vector<8x8xf32>
    %cst_29 = arith.constant dense<0.000000e+00> : vector<8x8xf32>
    %70 = tpu.matmul %68, %69, %cst_29 {dimension_numbers = #tpu.dot_dimension_numbers<[1], [0], [0], [1], [0, 0, 1, 1], [], []>} : vector<8x8xf32>, vector<8x8xf32>, vector<8x8xf32> -> vector<8x8xf32>
    %c8 = arith.constant 8 : index
    %c0_30 = arith.constant 0 : index
    %71 = vector.load %arg6[%c8, %c0_30] : memref<32x32xf32, #tpu.memory_space<vmem>>, vector<8x32xf32>
    %cst_31 = arith.constant dense<0.000000e+00> : vector<8x32xf32>
    %72 = tpu.matmul %70, %71, %cst_31 {dimension_numbers = #tpu.dot_dimension_numbers<[1], [0], [0], [1], [0, 0, 1, 1], [], []>} : vector<8x8xf32>, vector<8x32xf32>, vector<8x32xf32> -> vector<8x32xf32>
    %73 = arith.addf %53, %72 : vector<8x32xf32>
    %74 = vector.extract_strided_slice %31 {offsets = [0, 16], sizes = [8, 8], strides = [1, 1]} : vector<8x32xf32> to vector<8x8xf32>
    %cst_32 = arith.constant 0.353553385 : f32
    %75 = vector.broadcast %cst_32 : f32 to vector<8x8xf32>
    %76 = arith.mulf %74, %75 : vector<8x8xf32>
    %77 = vector.extract_strided_slice %32 {offsets = [0, 16], sizes = [8, 8], strides = [1, 1]} : vector<8x32xf32> to vector<8x8xf32>
    "tpu.trace_start"() <{level = 10 : i32, message = "qd,kd->qk"}> : () -> ()
    %cst_33 = arith.constant dense<0.000000e+00> : vector<8x8xf32>
    %78 = tpu.matmul %76, %77, %cst_33 {dimension_numbers = #tpu.dot_dimension_numbers<[1], [1], [0], [0], [0, 0, 1, 0], [], []>} : vector<8x8xf32>, vector<8x8xf32>, vector<8x8xf32> -> vector<8x8xf32>
    "tpu.trace_stop"() : () -> ()
    %cst_34 = arith.constant dense<0xFF800000> : vector<8xf32>
    %79 = vector.multi_reduction <maximumf>, %78, %cst_34 [1] : vector<8x8xf32> to vector<8xf32>
    %80 = vector.shape_cast %79 : vector<8xf32> to vector<8x1xf32>
    %81 = vector.broadcast %80 : vector<8x1xf32> to vector<8x8xf32>
    %82 = arith.subf %78, %81 : vector<8x8xf32>
    %83 = math.exp %82 : vector<8x8xf32>
    %cst_35 = arith.constant dense<0.000000e+00> : vector<8xf32>
    %84 = vector.multi_reduction <add>, %83, %cst_35 [1] : vector<8x8xf32> to vector<8xf32>
    %85 = vector.shape_cast %84 : vector<8xf32> to vector<8x1xf32>
    %86 = tpu.reciprocal %85 {approx = true} : vector<8x1xf32> -> vector<8x1xf32>
    %87 = vector.broadcast %86 : vector<8x1xf32> to vector<8x8xf32>
    %88 = arith.mulf %83, %87 : vector<8x8xf32>
    %89 = vector.extract_strided_slice %33 {offsets = [0, 16], sizes = [8, 8], strides = [1, 1]} : vector<8x32xf32> to vector<8x8xf32>
    %cst_36 = arith.constant dense<0.000000e+00> : vector<8x8xf32>
    %90 = tpu.matmul %88, %89, %cst_36 {dimension_numbers = #tpu.dot_dimension_numbers<[1], [0], [0], [1], [0, 0, 1, 1], [], []>} : vector<8x8xf32>, vector<8x8xf32>, vector<8x8xf32> -> vector<8x8xf32>
    %c16 = arith.constant 16 : index
    %c0_37 = arith.constant 0 : index
    %91 = vector.load %arg6[%c16, %c0_37] : memref<32x32xf32, #tpu.memory_space<vmem>>, vector<8x32xf32>
    %cst_38 = arith.constant dense<0.000000e+00> : vector<8x32xf32>
    %92 = tpu.matmul %90, %91, %cst_38 {dimension_numbers = #tpu.dot_dimension_numbers<[1], [0], [0], [1], [0, 0, 1, 1], [], []>} : vector<8x8xf32>, vector<8x32xf32>, vector<8x32xf32> -> vector<8x32xf32>
    %93 = arith.addf %73, %92 : vector<8x32xf32>
    %94 = vector.extract_strided_slice %31 {offsets = [0, 24], sizes = [8, 8], strides = [1, 1]} : vector<8x32xf32> to vector<8x8xf32>
    %cst_39 = arith.constant 0.353553385 : f32
    %95 = vector.broadcast %cst_39 : f32 to vector<8x8xf32>
    %96 = arith.mulf %94, %95 : vector<8x8xf32>
    %97 = vector.extract_strided_slice %32 {offsets = [0, 24], sizes = [8, 8], strides = [1, 1]} : vector<8x32xf32> to vector<8x8xf32>
    "tpu.trace_start"() <{level = 10 : i32, message = "qd,kd->qk"}> : () -> ()
    %cst_40 = arith.constant dense<0.000000e+00> : vector<8x8xf32>
    %98 = tpu.matmul %96, %97, %cst_40 {dimension_numbers = #tpu.dot_dimension_numbers<[1], [1], [0], [0], [0, 0, 1, 0], [], []>} : vector<8x8xf32>, vector<8x8xf32>, vector<8x8xf32> -> vector<8x8xf32>
    "tpu.trace_stop"() : () -> ()
    %cst_41 = arith.constant dense<0xFF800000> : vector<8xf32>
    %99 = vector.multi_reduction <maximumf>, %98, %cst_41 [1] : vector<8x8xf32> to vector<8xf32>
    %100 = vector.shape_cast %99 : vector<8xf32> to vector<8x1xf32>
    %101 = vector.broadcast %100 : vector<8x1xf32> to vector<8x8xf32>
    %102 = arith.subf %98, %101 : vector<8x8xf32>
    %103 = math.exp %102 : vector<8x8xf32>
    %cst_42 = arith.constant dense<0.000000e+00> : vector<8xf32>
    %104 = vector.multi_reduction <add>, %103, %cst_42 [1] : vector<8x8xf32> to vector<8xf32>
    %105 = vector.shape_cast %104 : vector<8xf32> to vector<8x1xf32>
    %106 = tpu.reciprocal %105 {approx = true} : vector<8x1xf32> -> vector<8x1xf32>
    %107 = vector.broadcast %106 : vector<8x1xf32> to vector<8x8xf32>
    %108 = arith.mulf %103, %107 : vector<8x8xf32>
    %109 = vector.extract_strided_slice %33 {offsets = [0, 24], sizes = [8, 8], strides = [1, 1]} : vector<8x32xf32> to vector<8x8xf32>
    %cst_43 = arith.constant dense<0.000000e+00> : vector<8x8xf32>
    %110 = tpu.matmul %108, %109, %cst_43 {dimension_numbers = #tpu.dot_dimension_numbers<[1], [0], [0], [1], [0, 0, 1, 1], [], []>} : vector<8x8xf32>, vector<8x8xf32>, vector<8x8xf32> -> vector<8x8xf32>
    %c24 = arith.constant 24 : index
    %c0_44 = arith.constant 0 : index
    %111 = vector.load %arg6[%c24, %c0_44] : memref<32x32xf32, #tpu.memory_space<vmem>>, vector<8x32xf32>
    %cst_45 = arith.constant dense<0.000000e+00> : vector<8x32xf32>
    %112 = tpu.matmul %110, %111, %cst_45 {dimension_numbers = #tpu.dot_dimension_numbers<[1], [0], [0], [1], [0, 0, 1, 1], [], []>} : vector<8x8xf32>, vector<8x32xf32>, vector<8x32xf32> -> vector<8x32xf32>
    %113 = arith.addf %93, %112 : vector<8x32xf32>
    %114 = vector.broadcast %34 : vector<1x32xf32> to vector<8x32xf32>
    %115 = arith.addf %113, %114 : vector<8x32xf32>
    %116 = arith.addf %1, %115 : vector<8x32xf32>
    %c0_46 = arith.constant 0 : index
    %c0_47 = arith.constant 0 : index
    %117 = vector.load %arg8[%c0_46, %c0_47] : memref<1x32xf32, #tpu.memory_space<vmem>>, vector<1x32xf32>
    %c0_48 = arith.constant 0 : index
    %c0_49 = arith.constant 0 : index
    %118 = vector.load %arg9[%c0_48, %c0_49] : memref<1x32xf32, #tpu.memory_space<vmem>>, vector<1x32xf32>
    %cst_50 = arith.constant dense<0.000000e+00> : vector<8xf32>
    %119 = vector.multi_reduction <add>, %116, %cst_50 [1] : vector<8x32xf32> to vector<8xf32>
    %120 = vector.shape_cast %119 : vector<8xf32> to vector<8x1xf32>
    %cst_51 = arith.constant 3.200000e+01 : f32
    %121 = vector.broadcast %cst_51 : f32 to vector<8x1xf32>
    %122 = arith.divf %120, %121 : vector<8x1xf32>
    %123 = vector.broadcast %122 : vector<8x1xf32> to vector<8x32xf32>
    %124 = arith.subf %116, %123 : vector<8x32xf32>
    %125 = arith.mulf %124, %124 : vector<8x32xf32>
    %cst_52 = arith.constant dense<0.000000e+00> : vector<8xf32>
    %126 = vector.multi_reduction <add>, %125, %cst_52 [1] : vector<8x32xf32> to vector<8xf32>
    %127 = vector.shape_cast %126 : vector<8xf32> to vector<8x1xf32>
    %cst_53 = arith.constant 3.200000e+01 : f32
    %128 = vector.broadcast %cst_53 : f32 to vector<8x1xf32>
    %129 = arith.divf %127, %128 : vector<8x1xf32>
    %130 = vector.broadcast %122 : vector<8x1xf32> to vector<8x32xf32>
    %131 = arith.subf %116, %130 : vector<8x32xf32>
    %cst_54 = arith.constant 9.99999974E-6 : f32
    %132 = vector.broadcast %cst_54 : f32 to vector<8x1xf32>
    %133 = arith.addf %129, %132 : vector<8x1xf32>
    %134 = math.rsqrt %133 : vector<8x1xf32>
    %135 = vector.broadcast %134 : vector<8x1xf32> to vector<8x32xf32>
    %136 = arith.mulf %131, %135 : vector<8x32xf32>
    %137 = vector.broadcast %117 : vector<1x32xf32> to vector<8x32xf32>
    %138 = arith.mulf %136, %137 : vector<8x32xf32>
    %139 = vector.broadcast %118 : vector<1x32xf32> to vector<8x32xf32>
    %140 = arith.addf %138, %139 : vector<8x32xf32>
    %c0_55 = arith.constant 0 : index
    %c0_56 = arith.constant 0 : index
    %141 = vector.load %arg10[%c0_55, %c0_56] : memref<32x128xf32, #tpu.memory_space<vmem>>, vector<32x128xf32>
    %c0_57 = arith.constant 0 : index
    %c0_58 = arith.constant 0 : index
    %142 = vector.load %arg11[%c0_57, %c0_58] : memref<1x128xf32, #tpu.memory_space<vmem>>, vector<1x128xf32>
    %c0_59 = arith.constant 0 : index
    %c0_60 = arith.constant 0 : index
    %143 = vector.load %arg12[%c0_59, %c0_60] : memref<128x32xf32, #tpu.memory_space<vmem>>, vector<128x32xf32>
    %c0_61 = arith.constant 0 : index
    %c0_62 = arith.constant 0 : index
    %144 = vector.load %arg13[%c0_61, %c0_62] : memref<1x32xf32, #tpu.memory_space<vmem>>, vector<1x32xf32>
    %cst_63 = arith.constant dense<0.000000e+00> : vector<8x128xf32>
    %145 = tpu.matmul %140, %141, %cst_63 {dimension_numbers = #tpu.dot_dimension_numbers<[1], [0], [0], [1], [0, 0, 1, 1], [], []>} : vector<8x32xf32>, vector<32x128xf32>, vector<8x128xf32> -> vector<8x128xf32>
    %146 = vector.broadcast %142 : vector<1x128xf32> to vector<8x128xf32>
    %147 = arith.addf %145, %146 : vector<8x128xf32>
    %148 = arith.mulf %147, %147 : vector<8x128xf32>
    %149 = arith.mulf %147, %148 : vector<8x128xf32>
    %cst_64 = arith.constant 4.471500e-02 : f32
    %150 = vector.broadcast %cst_64 : f32 to vector<8x128xf32>
    %151 = arith.mulf %150, %149 : vector<8x128xf32>
    %152 = arith.addf %147, %151 : vector<8x128xf32>
    %cst_65 = arith.constant 0.797884583 : f32
    %153 = vector.broadcast %cst_65 : f32 to vector<8x128xf32>
    %154 = arith.mulf %153, %152 : vector<8x128xf32>
    %155 = math.tanh %154 : vector<8x128xf32>
    %cst_66 = arith.constant 1.000000e+00 : f32
    %156 = vector.broadcast %cst_66 : f32 to vector<8x128xf32>
    %157 = arith.addf %156, %155 : vector<8x128xf32>
    %cst_67 = arith.constant 5.000000e-01 : f32
    %158 = vector.broadcast %cst_67 : f32 to vector<8x128xf32>
    %159 = arith.mulf %158, %157 : vector<8x128xf32>
    %160 = arith.mulf %147, %159 : vector<8x128xf32>
    %cst_68 = arith.constant dense<0.000000e+00> : vector<8x32xf32>
    %161 = tpu.matmul %160, %143, %cst_68 {dimension_numbers = #tpu.dot_dimension_numbers<[1], [0], [0], [1], [0, 0, 1, 1], [], []>} : vector<8x128xf32>, vector<128x32xf32>, vector<8x32xf32> -> vector<8x32xf32>
    %162 = vector.broadcast %144 : vector<1x32xf32> to vector<8x32xf32>
    %163 = arith.addf %161, %162 : vector<8x32xf32>
    %164 = arith.addf %116, %163 : vector<8x32xf32>
    %c0_69 = arith.constant 0 : index
    %c0_70 = arith.constant 0 : index
    %c0_71 = arith.constant 0 : index
    %165 = vector.load %arg14[%c0_69, %c0_70, %c0_71] : memref<1x8x32xf32, #tpu.memory_space<vmem>>, vector<1x8x32xf32>
    %166 = vector.shape_cast %165 : vector<1x8x32xf32> to vector<8x32xf32>
    %167 = vector.shape_cast %164 : vector<8x32xf32> to vector<1x8x32xf32>
    tpu.vector_store %arg14[%c0_69, %c0_70, %c0_71], %167 {strides = array<i32>} : memref<1x8x32xf32, #tpu.memory_space<vmem>>, vector<1x8x32xf32>,
    return
  }
  func.func @transform_0(%arg0: i32) -> (i32, i32, i32) {
    %c0_i32 = arith.constant 0 : i32
    %c0_i32_0 = arith.constant 0 : i32
    %c0_i32_1 = arith.constant 0 : i32
    return %arg0, %c0_i32, %c0_i32_0 : i32, i32, i32
  }
  func.func @transform_1(%arg0: i32) -> (i32, i32) {
    %c0_i32 = arith.constant 0 : i32
    %c0_i32_0 = arith.constant 0 : i32
    %c0_i32_1 = arith.constant 0 : i32
    return %c0_i32, %c0_i32_0 : i32, i32
  }
  func.func @transform_2(%arg0: i32) -> (i32, i32) {
    %c0_i32 = arith.constant 0 : i32
    %c0_i32_0 = arith.constant 0 : i32
    %c0_i32_1 = arith.constant 0 : i32
    return %c0_i32, %c0_i32_0 : i32, i32
  }
  func.func @transform_3(%arg0: i32) -> (i32, i32) {
    %c0_i32 = arith.constant 0 : i32
    %c0_i32_0 = arith.constant 0 : i32
    %c0_i32_1 = arith.constant 0 : i32
    return %c0_i32, %c0_i32_0 : i32, i32
  }
  func.func @transform_4(%arg0: i32) -> (i32, i32) {
    %c0_i32 = arith.constant 0 : i32
    %c0_i32_0 = arith.constant 0 : i32
    %c0_i32_1 = arith.constant 0 : i32
    return %c0_i32, %c0_i32_0 : i32, i32
  }
  func.func @transform_5(%arg0: i32) -> (i32, i32) {
    %c0_i32 = arith.constant 0 : i32
    %c0_i32_0 = arith.constant 0 : i32
    %c0_i32_1 = arith.constant 0 : i32
    return %c0_i32, %c0_i32_0 : i32, i32
  }
  func.func @transform_6(%arg0: i32) -> (i32, i32) {
    %c0_i32 = arith.constant 0 : i32
    %c0_i32_0 = arith.constant 0 : i32
    %c0_i32_1 = arith.constant 0 : i32
    return %c0_i32, %c0_i32_0 : i32, i32
  }
  func.func @transform_7(%arg0: i32) -> (i32, i32) {
    %c0_i32 = arith.constant 0 : i32
    %c0_i32_0 = arith.constant 0 : i32
    %c0_i32_1 = arith.constant 0 : i32
    return %c0_i32, %c0_i32_0 : i32, i32
  }
  func.func @transform_8(%arg0: i32) -> (i32, i32) {
    %c0_i32 = arith.constant 0 : i32
    %c0_i32_0 = arith.constant 0 : i32
    %c0_i32_1 = arith.constant 0 : i32
    return %c0_i32, %c0_i32_0 : i32, i32
  }
  func.func @transform_9(%arg0: i32) -> (i32, i32) {
    %c0_i32 = arith.constant 0 : i32
    %c0_i32_0 = arith.constant 0 : i32
    %c0_i32_1 = arith.constant 0 : i32
    return %c0_i32, %c0_i32_0 : i32, i32
  }
  func.func @transform_10(%arg0: i32) -> (i32, i32) {
    %c0_i32 = arith.constant 0 : i32
    %c0_i32_0 = arith.constant 0 : i32
    %c0_i32_1 = arith.constant 0 : i32
    return %c0_i32, %c0_i32_0 : i32, i32
  }
  func.func @transform_11(%arg0: i32) -> (i32, i32) {
    %c0_i32 = arith.constant 0 : i32
    %c0_i32_0 = arith.constant 0 : i32
    %c0_i32_1 = arith.constant 0 : i32
    return %c0_i32, %c0_i32_0 : i32, i32
  }
  func.func @transform_12(%arg0: i32) -> (i32, i32) {
    %c0_i32 = arith.constant 0 : i32
    %c0_i32_0 = arith.constant 0 : i32
    %c0_i32_1 = arith.constant 0 : i32
    return %c0_i32, %c0_i32_0 : i32, i32
  }
  func.func @transform_13(%arg0: i32) -> (i32, i32, i32) {
    %c0_i32 = arith.constant 0 : i32
    %c0_i32_0 = arith.constant 0 : i32
    %c0_i32_1 = arith.constant 0 : i32
    return %arg0, %c0_i32, %c0_i32_0 : i32, i32, i32
  }
}

module attributes {stable_mosaic.version = 11 : i64} {
  func.func @_mlp_kernel(%arg0: memref<32x32xf32, #tpu.memory_space<vmem>>, %arg1: memref<32x16xf32, #tpu.memory_space<vmem>>, %arg2: memref<1x16xf32, #tpu.memory_space<vmem>>, %arg3: memref<16x32xf32, #tpu.memory_space<vmem>>, %arg4: memref<1x32xf32, #tpu.memory_space<vmem>>, %arg5: memref<32x32xf32, #tpu.memory_space<vmem>>) attributes {dimension_semantics = [], scalar_prefetch = 0 : i64, scratch_operands = 0 : i64, tpu.core_type = #tpu.core_type<tc>} {
    %c0 = arith.constant 0 : index
    %c0_0 = arith.constant 0 : index
    %0 = vector.load %arg0[%c0, %c0_0] : memref<32x32xf32, #tpu.memory_space<vmem>>, vector<32x32xf32>
    %c0_1 = arith.constant 0 : index
    %c0_2 = arith.constant 0 : index
    %1 = vector.load %arg1[%c0_1, %c0_2] : memref<32x16xf32, #tpu.memory_space<vmem>>, vector<32x16xf32>
    %c0_3 = arith.constant 0 : index
    %c0_4 = arith.constant 0 : index
    %2 = vector.load %arg2[%c0_3, %c0_4] : memref<1x16xf32, #tpu.memory_space<vmem>>, vector<1x16xf32>
    %cst = arith.constant dense<0.000000e+00> : vector<32x16xf32>
    %3 = tpu.matmul %0, %1, %cst {dimension_numbers = #tpu.dot_dimension_numbers<[1], [0], [0], [1], [0, 0, 1, 1], [], []>} : vector<32x32xf32>, vector<32x16xf32>, vector<32x16xf32> -> vector<32x16xf32>
    %4 = vector.broadcast %2 : vector<1x16xf32> to vector<32x16xf32>
    %5 = arith.addf %3, %4 : vector<32x16xf32>
    %cst_5 = arith.constant 0.000000e+00 : f32
    %6 = vector.broadcast %cst_5 : f32 to vector<32x16xf32>
    %7 = arith.maximumf %5, %6 : vector<32x16xf32>
    %c0_6 = arith.constant 0 : index
    %c0_7 = arith.constant 0 : index
    %8 = vector.load %arg3[%c0_6, %c0_7] : memref<16x32xf32, #tpu.memory_space<vmem>>, vector<16x32xf32>
    %c0_8 = arith.constant 0 : index
    %c0_9 = arith.constant 0 : index
    %9 = vector.load %arg4[%c0_8, %c0_9] : memref<1x32xf32, #tpu.memory_space<vmem>>, vector<1x32xf32>
    %cst_10 = arith.constant dense<0.000000e+00> : vector<32x32xf32>
    %10 = tpu.matmul %7, %8, %cst_10 {dimension_numbers = #tpu.dot_dimension_numbers<[1], [0], [0], [1], [0, 0, 1, 1], [], []>} : vector<32x16xf32>, vector<16x32xf32>, vector<32x32xf32> -> vector<32x32xf32>
    %11 = vector.broadcast %9 : vector<1x32xf32> to vector<32x32xf32>
    %12 = arith.addf %10, %11 : vector<32x32xf32>
    %c0_11 = arith.constant 0 : index
    %c0_12 = arith.constant 0 : index
    %13 = vector.load %arg5[%c0_11, %c0_12] : memref<32x32xf32, #tpu.memory_space<vmem>>, vector<32x32xf32>
    tpu.vector_store %arg5[%c0_11, %c0_12], %12 {strides = array<i32>} : memref<32x32xf32, #tpu.memory_space<vmem>>, vector<32x32xf32>,
    return
  }
}

module attributes {stable_mosaic.version = 11 : i64} {
  func.func @_mlp_kernel(%arg0: memref<32x80xf32, #tpu.memory_space<vmem>>, %arg1: memref<80x32xf32, #tpu.memory_space<vmem>>, %arg2: memref<1x32xf32, #tpu.memory_space<vmem>>, %arg3: memref<32x16xf32, #tpu.memory_space<vmem>>, %arg4: memref<1x16xf32, #tpu.memory_space<vmem>>, %arg5: memref<16x3xf32, #tpu.memory_space<vmem>>, %arg6: memref<1x3xf32, #tpu.memory_space<vmem>>, %arg7: memref<32x3xf32, #tpu.memory_space<vmem>>) attributes {dimension_semantics = [], scalar_prefetch = 0 : i64, scratch_operands = 0 : i64, tpu.core_type = #tpu.core_type<tc>} {
    %c0 = arith.constant 0 : index
    %c0_0 = arith.constant 0 : index
    %0 = vector.load %arg0[%c0, %c0_0] : memref<32x80xf32, #tpu.memory_space<vmem>>, vector<32x80xf32>
    %c0_1 = arith.constant 0 : index
    %c0_2 = arith.constant 0 : index
    %1 = vector.load %arg1[%c0_1, %c0_2] : memref<80x32xf32, #tpu.memory_space<vmem>>, vector<80x32xf32>
    %c0_3 = arith.constant 0 : index
    %c0_4 = arith.constant 0 : index
    %2 = vector.load %arg2[%c0_3, %c0_4] : memref<1x32xf32, #tpu.memory_space<vmem>>, vector<1x32xf32>
    %cst = arith.constant dense<0.000000e+00> : vector<32x32xf32>
    %3 = tpu.matmul %0, %1, %cst {dimension_numbers = #tpu.dot_dimension_numbers<[1], [0], [0], [1], [0, 0, 1, 1], [], []>} : vector<32x80xf32>, vector<80x32xf32>, vector<32x32xf32> -> vector<32x32xf32>
    %4 = vector.broadcast %2 : vector<1x32xf32> to vector<32x32xf32>
    %5 = arith.addf %3, %4 : vector<32x32xf32>
    %cst_5 = arith.constant 0.000000e+00 : f32
    %6 = vector.broadcast %cst_5 : f32 to vector<32x32xf32>
    %7 = arith.maximumf %5, %6 : vector<32x32xf32>
    %c0_6 = arith.constant 0 : index
    %c0_7 = arith.constant 0 : index
    %8 = vector.load %arg3[%c0_6, %c0_7] : memref<32x16xf32, #tpu.memory_space<vmem>>, vector<32x16xf32>
    %c0_8 = arith.constant 0 : index
    %c0_9 = arith.constant 0 : index
    %9 = vector.load %arg4[%c0_8, %c0_9] : memref<1x16xf32, #tpu.memory_space<vmem>>, vector<1x16xf32>
    %cst_10 = arith.constant dense<0.000000e+00> : vector<32x16xf32>
    %10 = tpu.matmul %7, %8, %cst_10 {dimension_numbers = #tpu.dot_dimension_numbers<[1], [0], [0], [1], [0, 0, 1, 1], [], []>} : vector<32x32xf32>, vector<32x16xf32>, vector<32x16xf32> -> vector<32x16xf32>
    %11 = vector.broadcast %9 : vector<1x16xf32> to vector<32x16xf32>
    %12 = arith.addf %10, %11 : vector<32x16xf32>
    %cst_11 = arith.constant 0.000000e+00 : f32
    %13 = vector.broadcast %cst_11 : f32 to vector<32x16xf32>
    %14 = arith.maximumf %12, %13 : vector<32x16xf32>
    %c0_12 = arith.constant 0 : index
    %c0_13 = arith.constant 0 : index
    %15 = vector.load %arg5[%c0_12, %c0_13] : memref<16x3xf32, #tpu.memory_space<vmem>>, vector<16x3xf32>
    %c0_14 = arith.constant 0 : index
    %c0_15 = arith.constant 0 : index
    %16 = vector.load %arg6[%c0_14, %c0_15] : memref<1x3xf32, #tpu.memory_space<vmem>>, vector<1x3xf32>
    %cst_16 = arith.constant dense<0.000000e+00> : vector<32x3xf32>
    %17 = tpu.matmul %14, %15, %cst_16 {dimension_numbers = #tpu.dot_dimension_numbers<[1], [0], [0], [1], [0, 0, 1, 1], [], []>} : vector<32x16xf32>, vector<16x3xf32>, vector<32x3xf32> -> vector<32x3xf32>
    %18 = vector.broadcast %16 : vector<1x3xf32> to vector<32x3xf32>
    %19 = arith.addf %17, %18 : vector<32x3xf32>
    %c0_17 = arith.constant 0 : index
    %c0_18 = arith.constant 0 : index
    %20 = vector.load %arg7[%c0_17, %c0_18] : memref<32x3xf32, #tpu.memory_space<vmem>>, vector<32x3xf32>
    tpu.vector_store %arg7[%c0_17, %c0_18], %19 {strides = array<i32>} : memref<32x3xf32, #tpu.memory_space<vmem>>, vector<32x3xf32>,
    return
  }
}

module attributes {stable_mosaic.version = 11 : i64} {
  func.func @_mlp_kernel(%arg0: memref<2x48xf32, #tpu.memory_space<vmem>>, %arg1: memref<48x32xf32, #tpu.memory_space<vmem>>, %arg2: memref<1x32xf32, #tpu.memory_space<vmem>>, %arg3: memref<32x16xf32, #tpu.memory_space<vmem>>, %arg4: memref<1x16xf32, #tpu.memory_space<vmem>>, %arg5: memref<16x3xf32, #tpu.memory_space<vmem>>, %arg6: memref<1x3xf32, #tpu.memory_space<vmem>>, %arg7: memref<2x3xf32, #tpu.memory_space<vmem>>) attributes {dimension_semantics = [], scalar_prefetch = 0 : i64, scratch_operands = 0 : i64, tpu.core_type = #tpu.core_type<tc>} {
    %c0 = arith.constant 0 : index
    %c0_0 = arith.constant 0 : index
    %0 = vector.load %arg0[%c0, %c0_0] : memref<2x48xf32, #tpu.memory_space<vmem>>, vector<2x48xf32>
    %c0_1 = arith.constant 0 : index
    %c0_2 = arith.constant 0 : index
    %1 = vector.load %arg1[%c0_1, %c0_2] : memref<48x32xf32, #tpu.memory_space<vmem>>, vector<48x32xf32>
    %c0_3 = arith.constant 0 : index
    %c0_4 = arith.constant 0 : index
    %2 = vector.load %arg2[%c0_3, %c0_4] : memref<1x32xf32, #tpu.memory_space<vmem>>, vector<1x32xf32>
    %cst = arith.constant dense<0.000000e+00> : vector<2x32xf32>
    %3 = tpu.matmul %0, %1, %cst {dimension_numbers = #tpu.dot_dimension_numbers<[1], [0], [0], [1], [0, 0, 1, 1], [], []>} : vector<2x48xf32>, vector<48x32xf32>, vector<2x32xf32> -> vector<2x32xf32>
    %4 = vector.broadcast %2 : vector<1x32xf32> to vector<2x32xf32>
    %5 = arith.addf %3, %4 : vector<2x32xf32>
    %cst_5 = arith.constant 0.000000e+00 : f32
    %6 = vector.broadcast %cst_5 : f32 to vector<2x32xf32>
    %7 = arith.maximumf %5, %6 : vector<2x32xf32>
    %c0_6 = arith.constant 0 : index
    %c0_7 = arith.constant 0 : index
    %8 = vector.load %arg3[%c0_6, %c0_7] : memref<32x16xf32, #tpu.memory_space<vmem>>, vector<32x16xf32>
    %c0_8 = arith.constant 0 : index
    %c0_9 = arith.constant 0 : index
    %9 = vector.load %arg4[%c0_8, %c0_9] : memref<1x16xf32, #tpu.memory_space<vmem>>, vector<1x16xf32>
    %cst_10 = arith.constant dense<0.000000e+00> : vector<2x16xf32>
    %10 = tpu.matmul %7, %8, %cst_10 {dimension_numbers = #tpu.dot_dimension_numbers<[1], [0], [0], [1], [0, 0, 1, 1], [], []>} : vector<2x32xf32>, vector<32x16xf32>, vector<2x16xf32> -> vector<2x16xf32>
    %11 = vector.broadcast %9 : vector<1x16xf32> to vector<2x16xf32>
    %12 = arith.addf %10, %11 : vector<2x16xf32>
    %cst_11 = arith.constant 0.000000e+00 : f32
    %13 = vector.broadcast %cst_11 : f32 to vector<2x16xf32>
    %14 = arith.maximumf %12, %13 : vector<2x16xf32>
    %c0_12 = arith.constant 0 : index
    %c0_13 = arith.constant 0 : index
    %15 = vector.load %arg5[%c0_12, %c0_13] : memref<16x3xf32, #tpu.memory_space<vmem>>, vector<16x3xf32>
    %c0_14 = arith.constant 0 : index
    %c0_15 = arith.constant 0 : index
    %16 = vector.load %arg6[%c0_14, %c0_15] : memref<1x3xf32, #tpu.memory_space<vmem>>, vector<1x3xf32>
    %cst_16 = arith.constant dense<0.000000e+00> : vector<2x3xf32>
    %17 = tpu.matmul %14, %15, %cst_16 {dimension_numbers = #tpu.dot_dimension_numbers<[1], [0], [0], [1], [0, 0, 1, 1], [], []>} : vector<2x16xf32>, vector<16x3xf32>, vector<2x3xf32> -> vector<2x3xf32>
    %18 = vector.broadcast %16 : vector<1x3xf32> to vector<2x3xf32>
    %19 = arith.addf %17, %18 : vector<2x3xf32>
    %c0_17 = arith.constant 0 : index
    %c0_18 = arith.constant 0 : index
    %20 = vector.load %arg7[%c0_17, %c0_18] : memref<2x3xf32, #tpu.memory_space<vmem>>, vector<2x3xf32>
    tpu.vector_store %arg7[%c0_17, %c0_18], %19 {strides = array<i32>} : memref<2x3xf32, #tpu.memory_space<vmem>>, vector<2x3xf32>,
    return
  }
}

</mosaic_0001>

<bundles_post_ra>
// kernel: constrained_seed_generator_forward.10
= control target key start
LH: loop header
LB: loop body
LE: loop exit
PB: predicated region body
PF: predicated region fallthrough
CT: control target
= control target key end

     0   :  { %vm45_vm0 = vcmask 1042432   ;;  %vm32_vm1 = vcmask 23552   ;;  %vm147_vm2 = vcmask 130048   ;;  %vm245_vm3 = vcmask 261120   ;;  %s363_s1 = inlined_call_operand.vmem [shape: f32[3,16], index: 1, kind: input, shape index: {}]   ;;  %s364_s0 = inlined_call_operand.vmem [shape: f32[32,3], index: 0, kind: input, shape index: {}]   ;;  %s365_s3 = inlined_call_operand.vmem [shape: f32[16,32], index: 3, kind: input, shape index: {}]   ;;  %s366_s2 = inlined_call_operand.vmem [shape: f32[1,16], index: 2, kind: input, shape index: {}]   ;;  %s367_s4 = inlined_call_operand.vmem [shape: f32[1,32], index: 4, kind: input, shape index: {}]   ;;  %s368_s5 = inlined_call_operand.vmem [shape: f32[32,32], index: 5, kind: output, shape index: {}]  }
   0x1   :  { %v24_v0 = vld [vmem:[%s363_s1] sm:$0x7]  ;;  %v21_v2 = vld [vmem:[%s364_s0 + $0x8] sm:$0xff]  ;;  %v22_v3 = vld [vmem:[%s364_s0 + $0x10] sm:$0xff] }
   0x2   :  { %v20_v1 = vld [vmem:[%s364_s0] sm:$0xff]  ;;  %276 = vmatprep.subr.msk.mxu0 %vm45_vm0, %v24_v0  ;;  %v23_v4 = vld [vmem:[%s364_s0 + $0x18] sm:$0xff]  ;;  %v139_v5 = vld [vmem:[%s365_s3 + $0x8] sm:$0xff] }
   0x3   :  { %278 = vmatprep.mubr.msk.f32.mxu0 %vm32_vm1, %v20_v1  ;;  %277 = vmatpush3.msk.msra.mxu0 %vm45_vm0, %v24_v0  ;;  %v138_v6 = vld [vmem:[%s365_s3] sm:$0xff] }
   0x4   :  { %279 = vmatmul.mubr.msk.f32.vlgmr.msra.gmra.mxu0 %vm32_vm1, %v21_v2  ;;  %284 = vmatprep.subr.mxu1 %v139_v5  ;;  %v254_v7 = vld [vmem:[%s366_s2] ss:$0 sm:$0xff] }
   0x5   :  { %281 = vmatprep.mubr.msk.f32.mxu0 %vm32_vm1, %v22_v3  ;;  %285 = vmatpush3.msra.mxu1 %v139_v5  ;;  %v260_v20 = vld [vmem:[%s367_s4] ss:$0 sm:$0xff] }
   0x6   :  { %286 = vmatprep.subr.mxu1 %v138_v6 }
   0x7   :  { %287 = vmatpush3.msra.mxu1 %v138_v6 }
   0x8   :  { %282 = vmatmul.mubr.msk.f32.gmra.mxu0 %vm32_vm1, %v23_v4 }
  0xc4   :  { %v280_v8 = vpop.f32.mrf.mxu0 }
  0xc5   :  { %v121_v9 = vadd.f32 %v280_v8, %v254_v7 }
  0xc6   :  { %v115_v10 = vpop.f32.mrf.mxu0 }
  0xc7   :  { %v116_v11 = vadd.f32 %v254_v7, %v115_v10  ;;  %v135_v14 = vmax.f32 %v121_v9, 0.0 }
  0xc8   :  { %v283_v12 = vpop.f32.mrf.mxu0 }
  0xc9   :  { %v134_v13 = vmax.f32 %v116_v11, 0.0  ;;  %v131_v15 = vadd.f32 %v283_v12, %v254_v7 }
  0xca   :  { %v125_v16 = vpop.f32.mrf.mxu0 }
  0xcb   :  { %v126_v17 = vadd.f32 %v254_v7, %v125_v16  ;;  %288 = vmatprep.mubr.msk.f32.mxu1 %vm147_vm2, %v134_v13  ;;  %v137_v19 = vmax.f32 %v131_v15, 0.0 }
  0xcc   :  { %289 = vmatmul.mubr.msk.f32.vlgmr.msra.gmra.mxu1 %vm147_vm2, %v135_v14 }
  0xcd   :  { %v136_v18 = vmax.f32 %v126_v17, 0.0 }
  0xcf   :  { %291 = vmatprep.mubr.msk.f32.mxu1 %vm147_vm2, %v136_v18 }
  0xd0   :  { %292 = vmatmul.mubr.msk.f32.gmra.mxu1 %vm147_vm2, %v137_v19 }
 0x18c   :  { %v290_v21 = vpop.f32.mrf.mxu1 }
 0x18d   :  { %v232_v22 = vadd.f32 %v290_v21, %v260_v20 }
 0x18e   :  { %v226_v23 = vpop.f32.mrf.mxu1 }
 0x18f   :  { %247 = vst.msk [vmem:[%s368_s5 + $0x8] sm:$0xff] %vm245_vm3, %v232_v22  ;;  %v227_v24 = vadd.f32 %v260_v20, %v226_v23 }
 0x190   :  { %v293_v25 = vpop.f32.mrf.mxu1 }
 0x191   :  { %246 = vst.msk [vmem:[%s368_s5] sm:$0xff] %vm245_vm3, %v227_v24  ;;  %v242_v26 = vadd.f32 %v293_v25, %v260_v20 }
 0x192   :  { %v236_v27 = vpop.f32.mrf.mxu1 }
 0x193   :  { %249 = vst.msk [vmem:[%s368_s5 + $0x18] sm:$0xff] %vm245_vm3, %v242_v26  ;;  %v237_v28 = vadd.f32 %v260_v20, %v236_v27 }
 0x195   :  { %248 = vst.msk [vmem:[%s368_s5 + $0x10] sm:$0xff] %vm245_vm3, %v237_v28 }

// kernel: constrained_seed_generator_forward.11
= control target key start
LH: loop header
LB: loop body
LE: loop exit
PB: predicated region body
PF: predicated region fallthrough
CT: control target
= control target key end

     0   :  { %vm33_vm0 = vcmask 261120   ;;  %vm126_vm1 = vcmask 130048   ;;  %s318_s1 = inlined_call_operand.vmem [shape: f32[32,16], index: 1, kind: input, shape index: {}]   ;;  %s319_s0 = inlined_call_operand.vmem [shape: f32[16,32], index: 0, kind: input, shape index: {}]   ;;  %s320_s3 = inlined_call_operand.vmem [shape: f32[16,32], index: 3, kind: input, shape index: {}]   ;;  %s321_s2 = inlined_call_operand.vmem [shape: f32[1,16], index: 2, kind: input, shape index: {}]   ;;  %s322_s4 = inlined_call_operand.vmem [shape: f32[1,32], index: 4, kind: input, shape index: {}]   ;;  %s323_s5 = inlined_call_operand.vmem [shape: f32[16,32], index: 5, kind: output, shape index: {}]  }
   0x1   :  { %v25_v0 = vld [vmem:[%s318_s1 + $0x18] sm:$0xff]  ;;  %v24_v1 = vld [vmem:[%s318_s1 + $0x10] sm:$0xff]  ;;  %v20_v2 = vld [vmem:[%s319_s0] sm:$0xff] }
   0x2   :  { %230 = vmatprep.subr.mxu0 %v25_v0  ;;  %v23_v3 = vld [vmem:[%s318_s1 + $0x8] sm:$0xff]  ;;  %238 = vmatprep.mubr.msk.f32.mxu0 %vm33_vm0, %v20_v2  ;;  %v22_v4 = vld [vmem:[%s318_s1] sm:$0xff] }
   0x3   :  { %231 = vmatpush3.msra.mxu0 %v25_v0  ;;  %v21_v5 = vld [vmem:[%s319_s0 + $0x8] sm:$0xff]  ;;  %v117_v7 = vld [vmem:[%s320_s3] sm:$0xff] }
   0x4   :  { %232 = vmatprep.subr.mxu0 %v24_v1  ;;  %v118_v6 = vld [vmem:[%s320_s3 + $0x8] sm:$0xff]  ;;  %v214_v8 = vld [vmem:[%s321_s2] ss:$0 sm:$0xff] }
   0x5   :  { %233 = vmatpush3.msra.mxu0 %v24_v1  ;;  %241 = vmatprep.subr.mxu1 %v118_v6  ;;  %v217_v15 = vld [vmem:[%s322_s4] ss:$0 sm:$0xff] }
   0x6   :  { %234 = vmatprep.subr.mxu0 %v23_v3  ;;  %242 = vmatpush3.msra.mxu1 %v118_v6 }
   0x7   :  { %235 = vmatpush3.msra.mxu0 %v23_v3  ;;  %243 = vmatprep.subr.mxu1 %v117_v7 }
   0x8   :  { %236 = vmatprep.subr.mxu0 %v22_v4  ;;  %244 = vmatpush3.msra.mxu1 %v117_v7 }
   0x9   :  { %237 = vmatpush3.msra.mxu0 %v22_v4 }
   0xa   :  { %239 = vmatmul.mubr.msk.f32.vlgmr.msra.gmra.mxu0 %vm33_vm0, %v21_v5 }
  0xca   :  { %v240_v9 = vpop.f32.mrf.mxu0 }
  0xcb   :  { %v112_v10 = vadd.f32 %v240_v9, %v214_v8 }
  0xcc   :  { %v106_v11 = vpop.f32.mrf.mxu0 }
  0xcd   :  { %v107_v12 = vadd.f32 %v214_v8, %v106_v11  ;;  %v116_v14 = vmax.f32 %v112_v10, 0.0 }
  0xcf   :  { %v115_v13 = vmax.f32 %v107_v12, 0.0 }
  0xd1   :  { %245 = vmatprep.mubr.msk.f32.mxu1 %vm126_vm1, %v115_v13 }
  0xd2   :  { %246 = vmatmul.mubr.msk.f32.vlgmr.msra.gmra.mxu1 %vm126_vm1, %v116_v14 }
 0x192   :  { %v247_v16 = vpop.f32.mrf.mxu1 }
 0x193   :  { %v205_v17 = vadd.f32 %v247_v16, %v217_v15 }
 0x194   :  { %v199_v18 = vpop.f32.mrf.mxu1 }
 0x195   :  { %209 = vst.msk [vmem:[%s323_s5 + $0x8] sm:$0xff] %vm33_vm0, %v205_v17  ;;  %v200_v19 = vadd.f32 %v217_v15, %v199_v18 }
 0x197   :  { %208 = vst.msk [vmem:[%s323_s5] sm:$0xff] %vm33_vm0, %v200_v19 }

// kernel: constrained_seed_generator_forward.14
= control target key start
LH: loop header
LB: loop body
LE: loop exit
PB: predicated region body
PF: predicated region fallthrough
CT: control target
= control target key end

     0   :  { %s2719_s27 = smov 0   ;;  %s2990_s0 = inlined_call_operand.vmem [shape: f32[2,9,32], index: 0, kind: input, shape index: {}]   ;;  %s2991_s1 = inlined_call_operand.vmem [shape: f32[2,8,32], index: 1, kind: input, shape index: {}]   ;;  %s2992_s2 = inlined_call_operand.vmem [shape: f32[1,32], index: 2, kind: input, shape index: {}]   ;;  %s2993_s3 = inlined_call_operand.vmem [shape: f32[1,32], index: 3, kind: input, shape index: {}]   ;;  %s2994_s4 = inlined_call_operand.vmem [shape: f32[1,32], index: 4, kind: input, shape index: {}]   ;;  %s2995_s5 = inlined_call_operand.vmem [shape: f32[1,32], index: 5, kind: input, shape index: {}]   ;;  %s2996_s6 = inlined_call_operand.vmem [shape: f32[32,32], index: 6, kind: input, shape index: {}]   ;;  %s2997_s7 = inlined_call_operand.vmem [shape: f32[1,32], index: 7, kind: input, shape index: {}]   ;;  %s2998_s8 = inlined_call_operand.vmem [shape: f32[32,64], index: 8, kind: input, shape index: {}]   ;;  %s2999_s9 = inlined_call_operand.vmem [shape: f32[1,64], index: 9, kind: input, shape index: {}]   ;;  %s3000_s10 = inlined_call_operand.vmem [shape: f32[32,32], index: 10, kind: input, shape index: {}]   ;;  %s3001_s11 = inlined_call_operand.vmem [shape: f32[1,32], index: 11, kind: input, shape index: {}]   ;;  %s3002_s12 = inlined_call_operand.vmem [shape: f32[1,32], index: 12, kind: input, shape index: {}]   ;;  %s3003_s13 = inlined_call_operand.vmem [shape: f32[1,32], index: 13, kind: input, shape index: {}]   ;;  %s3004_s14 = inlined_call_operand.vmem [shape: f32[32,128], index: 14, kind: input, shape index: {}]   ;;  %s3005_s15 = inlined_call_operand.vmem [shape: f32[1,128], index: 15, kind: input, shape index: {}]   ;;  %s3006_s16 = inlined_call_operand.vmem [shape: f32[128,32], index: 16, kind: input, shape index: {}]   ;;  %s3007_s17 = inlined_call_operand.vmem [shape: f32[1,32], index: 17, kind: input, shape index: {}]   ;;  %s3008_s18 = inlined_call_operand.vmem [shape: f32[2,9,32], index: 18, kind: output, shape index: {}]  }
   0x1   :  { %3009 = sst [smem:[#allocation2_spill]] %s2990_s0 }
   0x2   :  { %3010 = sst [smem:[#allocation3_spill]] %s2991_s1 }
   0x3   :  { %3011 = sst [smem:[#allocation4_spill]] %s2992_s2 }
   0x4 LB: > { %s2287_s28 = sadd.s32 4294967295, %s2613_s27   ;;  %p2291_p0 = scmp.ge.s32.totalorder %s2613_s27, 1  ;;  %s2613_s27 = sphi %s2719_s27, %s28_s27  }
   0x5   : > { %p521_p1 = scmp.lt.s32.totalorder %s2613_s27, 3 }
   0x7   : > { %p522_p2 = pnand %p2291_p0, %p521_p1 }
   0x8   : > { %p579_p3 = scmp.lt.s32.totalorder (!%p522_p2), %s2287_s28, 1  ;;  %s3012_s1 = sld [smem:[#allocation2_spill]] (!%p522_p2) }
   0x9   : > { %525 = sbr.rel (%p522_p2) target bundleno = 3920 (0xf50), region = 92  ;;  %s3013_s2 = sld [smem:[#allocation3_spill]] (!%p522_p2) }
   0xa   : > { %s2617_s19 = smov (!%p522_p2), 120   ;;  %s2619_s22 = smov (!%p522_p2), 112  }
   0xb   : > { %s2621_s25 = smov (!%p522_p2), 104   ;;  %s2622_s26 = smov (!%p522_p2), 80  }
   0xe   : > { %s3016_s28 = smov (!%p579_p3, %s2287_s28), 1  ;;  %vm598_vm0 = vcmask 261120   ;;  %vm602_vm1 = vcmask 253952   ;;  %v675_v21 = vld [vmem:[%s2996_s6 + $0x18] sm:$0xff]  ;;  %v674_v22 = vld [vmem:[%s2996_s6 + $0x10] sm:$0xff]  ;;  %v673_v23 = vld [vmem:[%s2996_s6 + $0x8] sm:$0xff] }
   0xf   : > { %s2343_s29 = sshll.u32 %s3016_s28, 4  ;;  %s2294_s30 = sshll.u32 %s3016_s28, 3  ;;  %2416 = vmatprep.subr.mxu0 %v675_v21  ;;  %v672_v24 = vld [vmem:[%s2996_s6] sm:$0xff]  ;;  %v2615_v25 = vmov 0.0   ;;  %v767_v47 = vld [vmem:[%s2998_s8 + $0x18] sm:$0xff]  ;;  %v766_v49 = vld [vmem:[%s2998_s8 + $0x10] sm:$0xff] }
  0x10   : > { %s583_s20 = scalar_lea.vmem %s3012_s1, %s2343_s29  ;;  %s587_s23 = scalar_lea.vmem %s3013_s2, %s2294_s30  ;;  %2417 = vmatpush3.msra.mxu0 %v675_v21  ;;  %v2298_v38 = vld [vmem:[%s2993_s3] ss:$0 sm:$0xff]  ;;  %vm2616_vm2 = vmmov 0   ;;  %v765_v50 = vld [vmem:[%s2998_s8 + $0x8] sm:$0xff]  ;;  %vm851_vm3 = vcmask 64512   ;;  %vm939_vm4 = vcmask 57344  }
  0x11   : > { %v2736_v0 = vld [vmem:[%s583_s20] sm:$0xff]  ;;  %v2741_v1 = vld [vmem:[%s583_s20 + $0x8] sm:$0x1]  ;;  %2418 = vmatprep.subr.mxu0 %v674_v22  ;;  %s3014_s2 = sld [smem:[#allocation4_spill]]  ;;  %s2618_s1 = smov 96  }
  0x12   : > { %v599_v2 = vsel %vm598_vm0, %v2736_v0, 0.0  ;;  %v595_v3 = vld [vmem:[%s587_s23] sm:$0xff]  ;;  %v603_v5 = vsel %vm602_vm1, %v2741_v1, 0.0  ;;  %2419 = vmatpush3.msra.mxu0 %v674_v22  ;;  %s592_s24 = scalar_lea.vmem %s3008_s18, %s2343_s29 }
  0x13   : > { %600 = vadd.xlane.f32.xlu0 %v599_v2  ;;  %v645_v4 = vsel %vm598_vm0, %v595_v3, 0.0  ;;  %2420 = vmatprep.subr.mxu0 %v673_v23  ;;  %v2299_v48 = vld [vmem:[%s2994_s4] ss:$0 sm:$0xff] }
  0x14   : > { %646 = vadd.xlane.f32.xlu1 %v645_v4  ;;  %2421 = vmatpush3.msra.mxu0 %v673_v23  ;;  %v2300_v52 = vld [vmem:[%s2995_s5] ss:$0 sm:$0xff] }
  0x15   : > { %2422 = vmatprep.subr.mxu0 %v672_v24  ;;  %v764_v53 = vld [vmem:[%s2998_s8] sm:$0xff] }
  0x16   : > { %2423 = vmatpush3.msra.mxu0 %v672_v24  ;;  %v2301_v56 = vld [vmem:[%s2997_s7] ss:$0 sm:$0xff] }
  0x17   : > { %604 = vadd.xlane.f32.xlu0 %v603_v5  ;;  %2427 = vmatprep.subr.mxu0 %v2615_v25  ;;  %v2297_v36 = vld [vmem:[%s3014_s2] ss:$0 sm:$0xff]  ;;  %s2620_s2 = smov 88  }
  0x18   : > { %v2304_v60 = vld [vmem:[%s2999_s9] ss:$0 sm:$0xff] }
  0x9c   : > { %v601_v6 = vpop.xlane.xlu0 %600 }
  0x9d   : > { %v607_v7 = vmul.f32 0.03125, %v601_v6  ;;  %v647_v8 = vpop.xlane.xlu1 %646 }
  0x9e   : > { %v648_v9 = vmul.f32 0.03125, %v647_v8 }
  0x9f   : > { %v609_v10 = vsub.f32 %v2736_v0, %v607_v7 }
  0xa0   : > { %v649_v11 = vsub.f32 %v595_v3, %v648_v9  ;;  %v605_v12 = vpop.xlane.xlu0 %604 }
  0xa1   : > { %v608_v13 = vmul.f32 0.03125, %v605_v12  ;;  %v611_v14 = vmul.f32 %v609_v10, %v609_v10 }
  0xa2   : > { %v650_v15 = vmul.f32 %v649_v11, %v649_v11 }
  0xa3   : > { %v610_v16 = vsub.f32 %v2741_v1, %v608_v13  ;;  %v613_v17 = vsel %vm598_vm0, %v611_v14, 0.0 }
  0xa4   : > { %614 = vadd.xlane.f32.xlu1 %v613_v17  ;;  %v651_v18 = vsel %vm598_vm0, %v650_v15, 0.0 }
  0xa5   : > { %v612_v19 = vmul.f32 %v610_v16, %v610_v16 }
  0xa7   : > { %v616_v20 = vsel %vm602_vm1, %v612_v19, 0.0 }
  0xa8   : > { %652 = vadd.xlane.f32.xlu1 %v651_v18  ;;  %617 = vadd.xlane.f32.xlu0 %v616_v20 }
 0x12d   : > { %v615_v26 = vpop.xlane.xlu1 %614 }
 0x12e   : > { %v619_v27 = vmul.f32 0.03125, %v615_v26 }
 0x130   : > { %v621_v28 = vadd.f32 1e-05, %v619_v27 }
 0x131   : > { %v653_v29 = vpop.xlane.xlu1 %652  ;;  %v618_v30 = vpop.xlane.xlu0 %617 }
 0x132   : > { %2561 = vrsqrt.f32 %v621_v28  ;;  %v654_v31 = vmul.f32 0.03125, %v653_v29  ;;  %v620_v32 = vmul.f32 0.03125, %v618_v30 }
 0x134   : > { %v622_v33 = vadd.f32 1e-05, %v620_v32  ;;  %v655_v34 = vadd.f32 1e-05, %v654_v31 }
 0x136   : > { %2563 = vrsqrt.f32 %v622_v33 }
 0x137   : > { %2565 = vrsqrt.f32 %v655_v34  ;;  %v1237_v34 = vld [vmem:[%s3000_s10 + $0x8] sm:$0xff] }
 0x13f   : > { %v2562_v35 = vpop.eup %2561 }
 0x140   : > { %v625_v37 = vmul.f32 %v2562_v35, %v609_v10 }
 0x142   : > { %v633_v39 = vmul.f32 %v2297_v36, %v625_v37 }
 0x143   : > { %v2564_v40 = vpop.eup %2563 }
 0x144   : > { %v641_v41 = vadd.f32 %v2298_v38, %v633_v39  ;;  %v626_v42 = vmul.f32 %v2564_v40, %v610_v16  ;;  %v2566_v43 = vpop.eup %2565 }
 0x145   : > { %v657_v45 = vmul.f32 %v2566_v43, %v649_v11 }
 0x146   : > { %2424 = vmatprep.mubr.msk.f32.mxu0 %vm598_vm0, %v641_v41  ;;  %v634_v44 = vmul.f32 %v2297_v36, %v626_v42 }
 0x147   : > { %v664_v51 = vmul.f32 %v2299_v48, %v657_v45 }
 0x148   : > { %v642_v46 = vadd.f32 %v2298_v38, %v634_v44 }
 0x149   : > { %v671_v54 = vadd.f32 %v2300_v52, %v664_v51 }
 0x14a   : > { %2425 = vmatmul.mubr.msk.f32.vlgmr.msra.gmra.mxu0 %vm598_vm0, %v642_v46 }
 0x14b   : > { %2428 = vmatpush3.msra.mxu0 %v767_v47  ;;  %2435 = vmatprep.mubr.msk.f32.mxu0 %vm2616_vm2, %v2615_v25 }
 0x14c   : > { %2429 = vmatprep.subr.mxu0 %v2615_v25 }
 0x14d   : > { %2430 = vmatpush3.msra.mxu0 %v766_v49  ;;  %v1043_v49 = vld [vmem:[%s3000_s10] sm:$0xff] }
 0x14e   : > { %2431 = vmatprep.subr.mxu0 %v2615_v25 }
 0x14f   : > { %2432 = vmatpush3.msra.mxu0 %v765_v50 }
 0x150   : > { %2433 = vmatprep.subr.mxu0 %v2615_v25 }
 0x151   : > { %2434 = vmatpush3.msra.mxu0 %v764_v53 }
 0x152   : > { %2436 = vmatmul.mubr.msk.f32.vlgmr.msra.gmra.mxu0 %vm598_vm0, %v671_v54 }
 0x20a   : > { %v2426_v55 = vpop.f32.mrf.mxu0 }
 0x20b   : > { %v761_v62 = vadd.f32 %v2426_v55, %v2301_v56 }
 0x20c   : > { %v755_v57 = vpop.f32.mrf.mxu0 }
 0x20d   : > { %v756_v58 = vadd.f32 %v2301_v56, %v755_v57  ;;  %v2808_v3 = vmul.f32 0.35355338, %v761_v62 }
 0x20f   : > { %v2795_v59 = vmul.f32 0.35355338, %v756_v58 }
 0x211   : > { %2440 = vmatprep.mubr.msk.f32.mxu0 %vm851_vm3, %v2795_v59 }
 0x212   : > { %v844_v61 = vpop.f32.mrf.mxu0 }
 0x213   : > { %v2802_v63 = vadd.f32 %v2304_v60, %v844_v61 }
 0x214   : > { %v2437_v2 = vpop.f32.mrf.mxu0 }
 0x215   : > { %2438 = vmatprep.subr.msk.mxu0 %vm851_vm3, %v2802_v63 }
 0x216   : > { %2439 = vmatpush3.xpose.msk.msra.mxu0 %vm851_vm3, %v2802_v63 }
 0x219   : > { %2441 = vmatmul.mubr.msk.f32.vlgmr.msra.gmra.mxu0 %vm851_vm3, %v2808_v3 }
 0x2d9   : > { %v2442_v4 = vpop.f32.mrf.mxu0 }
 0x2da   : > { %v940_v5 = vsel %vm939_vm4, %v2442_v4, -inf }
 0x2db   : > { %941 = vmax.xlane.f32.xlu1 %v940_v5  ;;  %v927_v6 = vpop.f32.mrf.mxu0 }
 0x2dc   : > { %v936_v7 = vsel %vm851_vm3, %v927_v6, -inf }
 0x2dd   : > { %937 = vmax.xlane.f32.xlu0 %v936_v7 }
 0x364   : > { %v942_v8 = vpop.xlane.xlu1 %941 }
 0x365   : > { %v944_v9 = vsub.f32 %v2442_v4, %v942_v8 }
 0x366   : > { %v938_v10 = vpop.xlane.xlu0 %937 }
 0x367   : > { %v947_v11 = vmul.f32 1.442695, %v944_v9  ;;  %v943_v12 = vsub.f32 %v927_v6, %v938_v10 }
 0x369   : > { %2567 = vpow2.f32 %v947_v11  ;;  %v945_v13 = vmul.f32 1.442695, %v943_v12 }
 0x36b   : > { %2569 = vpow2.f32 %v945_v13 }
 0x376   : > { %v2568_v14 = vpop.eup %2567 }
 0x377   : > { %v952_v15 = vsel %vm939_vm4, %v2568_v14, 0.0 }
 0x378   : > { %v2570_v16 = vpop.eup %2569  ;;  %953 = vadd.xlane.f32.xlu1 %v952_v15 }
 0x379   : > { %v949_v17 = vsel %vm851_vm3, %v2570_v16, 0.0 }
 0x37a   : > { %950 = vadd.xlane.f32.xlu0 %v949_v17 }
 0x389   : > { %1048 = vrot.lane.b32.xlu1 %v2802_v63, %s2617_s19 }
 0x38d   : > { %1044 = vrot.lane.b32.xlu1 %v2795_v59, %s2617_s19 }
 0x390   : > { %959 = vrot.lane.b32.xlu0 %v2802_v63, %s2618_s1 }
 0x391   : > { %1046 = vrot.lane.b32.xlu1 %v2808_v3, %s2617_s19  ;;  %s2623_s19 = smov 72  }
 0x401   : > { %v954_v18 = vpop.xlane.xlu1 %953 }
 0x402   : > { %2571 = vrcp.f32 %v954_v18 }
 0x403   : > { %v951_v19 = vpop.xlane.xlu0 %950 }
 0x404   : > { %2573 = vrcp.f32 %v951_v19 }
 0x405   : > { %v1049_v21 = vpop.permute.xlu1 %1048 }
 0x407   : > { %v960_v20 = vpop.permute.xlu0 %959 }
 0x408   : > { %2443 = vmatprep.subr.mxu0 %v960_v20 }
 0x409   : > { %2444 = vmatpush3.msra.mxu0 %v960_v20  ;;  %v1045_v24 = vpop.permute.xlu1 %1044 }
 0x40a   : > { %2448 = vmatprep.subr.msk.mxu0 %vm851_vm3, %v1049_v21 }
 0x40d   : > { %v1047_v27 = vpop.permute.xlu1 %1046 }
 0x40f   : > { %v2572_v22 = vpop.eup %2571 }
 0x410   : > { %v958_v26 = vmul.f32 %v2572_v22, %v2568_v14 }
 0x411   : > { %v2574_v23 = vpop.eup %2573 }
 0x412   : > { %v957_v25 = vmul.f32 %v2574_v23, %v2570_v16  ;;  %v1593_v23 = vld [vmem:[%s3000_s10 + $0x10] sm:$0xff] }
 0x414   : > { %2445 = vmatprep.mubr.msk.f32.mxu0 %vm851_vm3, %v957_v25 }
 0x415   : > { %2446 = vmatmul.mubr.msk.f32.vlgmr.msra.gmra.mxu0 %vm851_vm3, %v958_v26 }
 0x416   : > { %2449 = vmatpush3.xpose.msk.msra.mxu0 %vm851_vm3, %v1049_v21  ;;  %2450 = vmatprep.mubr.msk.f32.mxu0 %vm851_vm3, %v1045_v24 }
 0x417   : > { %2458 = vmatprep.subr.mxu0 %v1237_v34 }
 0x419   : > { %2451 = vmatmul.mubr.msk.f32.vlgmr.msra.gmra.mxu0 %vm851_vm3, %v1047_v27 }
 0x41a   : > { %2459 = vmatpush3.msra.mxu0 %v1237_v34 }
 0x4d5   : > { %v2447_v28 = vpop.f32.mrf.mxu0 }
 0x4d7   : > { %v1034_v29 = vpop.f32.mrf.mxu0 }
 0x4d9   : > { %v2452_v30 = vpop.f32.mrf.mxu0 }
 0x4da   : > { %v1134_v31 = vsel %vm939_vm4, %v2452_v30, -inf }
 0x4db   : > { %1135 = vmax.xlane.f32.xlu1 %v1134_v31  ;;  %v1122_v32 = vpop.f32.mrf.mxu0 }
 0x4dc   : > { %v1131_v33 = vsel %vm851_vm3, %v1122_v32, -inf }
 0x4dd   : > { %1132 = vmax.xlane.f32.xlu0 %v1131_v33 }
 0x4ec   : > { %1404 = vrot.lane.b32.xlu1 %v2802_v63, %s2619_s22 }
 0x4f0   : > { %1400 = vrot.lane.b32.xlu1 %v2795_v59, %s2619_s22 }
 0x4f4   : > { %1402 = vrot.lane.b32.xlu1 %v2808_v3, %s2619_s22 }
 0x564   : > { %v1136_v35 = vpop.xlane.xlu1 %1135 }
 0x565   : > { %v1138_v36 = vsub.f32 %v2452_v30, %v1136_v35 }
 0x566   : > { %v1133_v37 = vpop.xlane.xlu0 %1132 }
 0x567   : > { %v1141_v38 = vmul.f32 1.442695, %v1138_v36  ;;  %v1137_v39 = vsub.f32 %v1122_v32, %v1133_v37 }
 0x568   : > { %v1405_v40 = vpop.permute.xlu1 %1404 }
 0x569   : > { %2575 = vpow2.f32 %v1141_v38  ;;  %v1139_v41 = vmul.f32 1.442695, %v1137_v39  ;;  %2468 = vmatprep.subr.msk.mxu0 %vm851_vm3, %v1405_v40 }
 0x56b   : > { %2577 = vpow2.f32 %v1139_v41 }
 0x56c   : > { %v1401_v55 = vpop.permute.xlu1 %1400 }
 0x570   : > { %v1403_v57 = vpop.permute.xlu1 %1402 }
 0x576   : > { %v2576_v42 = vpop.eup %2575 }
 0x577   : > { %v1146_v43 = vsel %vm939_vm4, %v2576_v42, 0.0 }
 0x578   : > { %v2578_v44 = vpop.eup %2577  ;;  %1147 = vadd.xlane.f32.xlu0 %v1146_v43 }
 0x579   : > { %v1143_v45 = vsel %vm851_vm3, %v2578_v44, 0.0 }
 0x57c   : > { %1144 = vadd.xlane.f32.xlu0 %v1143_v45 }
 0x592   : > { %1153 = vrot.lane.b32.xlu0 %v2802_v63, %s2620_s2 }
 0x601   : > { %v1148_v46 = vpop.xlane.xlu0 %1147 }
 0x602   : > { %2579 = vrcp.f32 %v1148_v46 }
 0x605   : > { %v1145_v47 = vpop.xlane.xlu0 %1144 }
 0x606   : > { %2581 = vrcp.f32 %v1145_v47 }
 0x609   : > { %v1154_v48 = vpop.permute.xlu0 %1153 }
 0x60a   : > { %2453 = vmatprep.subr.mxu1 %v1154_v48 }
 0x60b   : > { %2454 = vmatpush3.msra.mxu1 %v1154_v48 }
 0x60c   : > { %2463 = vmatprep.subr.mxu1 %v1043_v49 }
 0x60f   : > { %v2580_v50 = vpop.eup %2579 }
 0x610   : > { %v1152_v53 = vmul.f32 %v2580_v50, %v2576_v42 }
 0x613   : > { %v2582_v51 = vpop.eup %2581 }
 0x614   : > { %v1151_v52 = vmul.f32 %v2582_v51, %v2578_v44 }
 0x616   : > { %2455 = vmatprep.mubr.msk.f32.mxu1 %vm851_vm3, %v1151_v52 }
 0x617   : > { %2456 = vmatmul.mubr.msk.f32.vlgmr.msra.gmra.mxu1 %vm851_vm3, %v1152_v53 }
 0x618   : > { %2465 = vmatprep.mubr.msk.f32.mxu1 %vm851_vm3, %v1034_v29  ;;  %2464 = vmatpush3.msra.mxu1 %v1043_v49 }
 0x61b   : > { %2466 = vmatmul.mubr.msk.f32.vlgmr.msra.gmra.mxu1 %vm851_vm3, %v2447_v28 }
 0x6d7   : > { %v2457_v54 = vpop.f32.mrf.mxu1 }
 0x6d9   : > { %v1228_v56 = vpop.f32.mrf.mxu1 }
 0x6da   : > { %2460 = vmatprep.mubr.msk.f32.mxu0 %vm851_vm3, %v1228_v56 }
 0x6db   : > { %2461 = vmatmul.mubr.msk.f32.vlgmr.msra.gmra.mxu0 %vm851_vm3, %v2457_v54  ;;  %v2467_v24 = vpop.f32.mrf.mxu1 }
 0x6dc   : > { %2469 = vmatpush3.xpose.msk.msra.mxu0 %vm851_vm3, %v1405_v40  ;;  %2470 = vmatprep.mubr.msk.f32.mxu0 %vm851_vm3, %v1401_v55 }
 0x6dd   : > { %2478 = vmatprep.subr.mxu0 %v1593_v23  ;;  %v1391_v25 = vpop.f32.mrf.mxu1 }
 0x6df   : > { %2471 = vmatmul.mubr.msk.f32.vlgmr.msra.gmra.mxu0 %vm851_vm3, %v1403_v57 }
 0x6e0   : > { %2479 = vmatpush3.msra.mxu0 %v1593_v23 }
 0x79b   : > { %v2850_v58 = vpop.f32.mrf.mxu0 }
 0x79c   : > { %v1397_v42 = vadd.f32 %v2467_v24, %v2850_v58 }
 0x79d   : > { %v2852_v60 = vpop.f32.mrf.mxu0 }
 0x79e   : > { %v1392_v55 = vadd.f32 %v1391_v25, %v2852_v60 }
 0x79f   : > { %v2472_v61 = vpop.f32.mrf.mxu0 }
 0x7a0   : > { %v1490_v62 = vsel %vm939_vm4, %v2472_v61, -inf }
 0x7a1   : > { %1491 = vmax.xlane.f32.xlu1 %v1490_v62  ;;  %v1478_v2 = vpop.f32.mrf.mxu0 }
 0x7a2   : > { %v1487_v4 = vsel %vm851_vm3, %v1478_v2, -inf }
 0x7a3   : > { %1488 = vmax.xlane.f32.xlu0 %v1487_v4 }
 0x7b2   : > { %1681 = vrot.lane.b32.xlu1 %v2802_v63, %s2621_s25 }
 0x7b6   : > { %1677 = vrot.lane.b32.xlu1 %v2795_v59, %s2621_s25 }
 0x7ba   : > { %1679 = vrot.lane.b32.xlu1 %v2808_v3, %s2621_s25 }
 0x82a   : > { %v1492_v5 = vpop.xlane.xlu1 %1491 }
 0x82b   : > { %v1494_v6 = vsub.f32 %v2472_v61, %v1492_v5  ;;  %v2334_v61 = vld [vmem:[%s3001_s11] ss:$0 sm:$0xff] }
 0x82c   : > { %v1489_v7 = vpop.xlane.xlu0 %1488 }
 0x82d   : > { %v1497_v8 = vmul.f32 1.442695, %v1494_v6  ;;  %v1493_v9 = vsub.f32 %v1478_v2, %v1489_v7 }
 0x82e   : > { %v1682_v16 = vpop.permute.xlu1 %1681 }
 0x82f   : > { %2583 = vpow2.f32 %v1497_v8  ;;  %v1495_v10 = vmul.f32 1.442695, %v1493_v9 }
 0x831   : > { %2585 = vpow2.f32 %v1495_v10 }
 0x832   : > { %v1678_v19 = vpop.permute.xlu1 %1677 }
 0x836   : > { %v1680_v22 = vpop.permute.xlu1 %1679 }
 0x83c   : > { %v2584_v11 = vpop.eup %2583 }
 0x83d   : > { %v1502_v12 = vsel %vm939_vm4, %v2584_v11, 0.0 }
 0x83e   : > { %v2586_v13 = vpop.eup %2585  ;;  %1503 = vadd.xlane.f32.xlu0 %v1502_v12 }
 0x83f   : > { %v1499_v14 = vsel %vm851_vm3, %v2586_v13, 0.0 }
 0x842   : > { %1500 = vadd.xlane.f32.xlu0 %v1499_v14 }
 0x858   : > { %1509 = vrot.lane.b32.xlu0 %v2802_v63, %s2622_s26 }
 0x8c7   : > { %v1504_v59 = vpop.xlane.xlu0 %1503 }
 0x8c8   : > { %2587 = vrcp.f32 %v1504_v59 }
 0x8cb   : > { %v1501_v3 = vpop.xlane.xlu0 %1500 }
 0x8cc   : > { %2589 = vrcp.f32 %v1501_v3 }
 0x8cf   : > { %v1510_v15 = vpop.permute.xlu0 %1509 }
 0x8d0   : > { %2473 = vmatprep.subr.mxu1 %v1510_v15 }
 0x8d1   : > { %2474 = vmatpush3.msra.mxu1 %v1510_v15  ;;  %v2011_v15 = vld [vmem:[%s3004_s14 + $0x18] sm:$0xff] }
 0x8d2   : > { %2483 = vmatprep.subr.msk.mxu1 %vm851_vm3, %v1682_v16 }
 0x8d5   : > { %v2588_v17 = vpop.eup %2587 }
 0x8d6   : > { %v1508_v21 = vmul.f32 %v2588_v17, %v2584_v11  ;;  %v2009_v17 = vld [vmem:[%s3004_s14 + $0x8] sm:$0xff] }
 0x8d9   : > { %v2590_v18 = vpop.eup %2589 }
 0x8da   : > { %v1507_v20 = vmul.f32 %v2590_v18, %v2586_v13  ;;  %v2008_v18 = vld [vmem:[%s3004_s14] sm:$0xff] }
 0x8dc   : > { %2475 = vmatprep.mubr.msk.f32.mxu1 %vm851_vm3, %v1507_v20 }
 0x8dd   : > { %2476 = vmatmul.mubr.msk.f32.vlgmr.msra.gmra.mxu1 %vm851_vm3, %v1508_v21 }
 0x8de   : > { %2484 = vmatpush3.xpose.msk.msra.mxu1 %vm851_vm3, %v1682_v16  ;;  %2485 = vmatprep.mubr.msk.f32.mxu1 %vm851_vm3, %v1678_v19  ;;  %v2010_v16 = vld [vmem:[%s3004_s14 + $0x10] sm:$0xff] }
 0x8e1   : > { %2486 = vmatmul.mubr.msk.f32.vlgmr.msra.gmra.mxu1 %vm851_vm3, %v1680_v22 }
 0x99d   : > { %v2477_v26 = vpop.f32.mrf.mxu1 }
 0x99f   : > { %v1584_v27 = vpop.f32.mrf.mxu1 }
 0x9a0   : > { %2480 = vmatprep.mubr.msk.f32.mxu0 %vm851_vm3, %v1584_v27 }
 0x9a1   : > { %2481 = vmatmul.mubr.msk.f32.vlgmr.msra.gmra.mxu0 %vm851_vm3, %v2477_v26  ;;  %v2487_v28 = vpop.f32.mrf.mxu1  ;;  %v2335_v26 = vld [vmem:[%s3002_s12] ss:$0 sm:$0xff] }
 0x9a2   : > { %v1767_v29 = vsel %vm939_vm4, %v2487_v28, -inf }
 0x9a3   : > { %1768 = vmax.xlane.f32.xlu1 %v1767_v29  ;;  %v1755_v30 = vpop.f32.mrf.mxu1 }
 0x9a4   : > { %v1764_v31 = vsel %vm851_vm3, %v1755_v30, -inf }
 0x9a5   : > { %1765 = vmax.xlane.f32.xlu0 %v1764_v31 }
 0xa2c   : > { %v1769_v32 = vpop.xlane.xlu1 %1768 }
 0xa2d   : > { %v1771_v33 = vsub.f32 %v2487_v28, %v1769_v32  ;;  %v2336_v28 = vld [vmem:[%s3003_s13] ss:$0 sm:$0xff] }
 0xa2e   : > { %v1766_v34 = vpop.xlane.xlu0 %1765 }
 0xa2f   : > { %v1774_v35 = vmul.f32 1.442695, %v1771_v33  ;;  %v1770_v36 = vsub.f32 %v1755_v30, %v1766_v34 }
 0xa31   : > { %2591 = vpow2.f32 %v1774_v35  ;;  %v1772_v37 = vmul.f32 1.442695, %v1770_v36  ;;  %v2028_v35 = vld [vmem:[%s3006_s16 + $0x78] sm:$0xff]  ;;  %v2027_v36 = vld [vmem:[%s3006_s16 + $0x70] sm:$0xff] }
 0xa33   : > { %2593 = vpow2.f32 %v1772_v37  ;;  %v2026_v37 = vld [vmem:[%s3006_s16 + $0x68] sm:$0xff] }
 0xa3e   : > { %v2592_v38 = vpop.eup %2591 }
 0xa3f   : > { %v1779_v39 = vsel %vm939_vm4, %v2592_v38, 0.0 }
 0xa40   : > { %v2594_v40 = vpop.eup %2593  ;;  %1780 = vadd.xlane.f32.xlu0 %v1779_v39  ;;  %v2024_v39 = vld [vmem:[%s3006_s16 + $0x58] sm:$0xff] }
 0xa41   : > { %v1776_v41 = vsel %vm851_vm3, %v2594_v40, 0.0 }
 0xa44   : > { %1777 = vadd.xlane.f32.xlu0 %v1776_v41  ;;  %v2022_v41 = vld [vmem:[%s3006_s16 + $0x48] sm:$0xff] }
 0xa5a   : > { %1786 = vrot.lane.b32.xlu0 %v2802_v63, %s2623_s19  ;;  %v1870_v63 = vld [vmem:[%s3000_s10 + $0x18] sm:$0xff] }
 0xa5b   : > { %2493 = vmatprep.subr.mxu1 %v1870_v63 }
 0xa5c   : > { %2494 = vmatpush3.msra.mxu1 %v1870_v63 }
 0xa5d   : > { %2509 = vmatprep.subr.mxu1 %v2028_v35 }
 0xa61   : > { %v2482_v43 = vpop.f32.mrf.mxu0 }
 0xa62   : > { %v1676_v44 = vadd.f32 %v2482_v43, %v1397_v42  ;;  %v2021_v42 = vld [vmem:[%s3006_s16 + $0x40] sm:$0xff]  ;;  %v2020_v43 = vld [vmem:[%s3006_s16 + $0x38] sm:$0xff] }
 0xa63   : > { %v1666_v52 = vpop.f32.mrf.mxu0 }
 0xa64   : > { %v1675_v57 = vadd.f32 %v1666_v52, %v1392_v55 }
 0xac9   : > { %v1781_v45 = vpop.xlane.xlu0 %1780 }
 0xaca   : > { %2595 = vrcp.f32 %v1781_v45  ;;  %v2018_v45 = vld [vmem:[%s3006_s16 + $0x28] sm:$0xff] }
 0xacd   : > { %v1778_v46 = vpop.xlane.xlu0 %1777 }
 0xace   : > { %2597 = vrcp.f32 %v1778_v46  ;;  %v2017_v46 = vld [vmem:[%s3006_s16 + $0x20] sm:$0xff] }
 0xad1   : > { %v1787_v47 = vpop.permute.xlu0 %1786 }
 0xad2   : > { %2488 = vmatprep.subr.mxu0 %v1787_v47 }
 0xad3   : > { %2489 = vmatpush3.msra.mxu0 %v1787_v47  ;;  %v2016_v47 = vld [vmem:[%s3006_s16 + $0x18] sm:$0xff] }
 0xad4   : > { %2498 = vmatprep.subr.mxu0 %v2011_v15 }
 0xad7   : > { %v2596_v48 = vpop.eup %2595 }
 0xad8   : > { %v1785_v51 = vmul.f32 %v2596_v48, %v2592_v38  ;;  %v2025_v38 = vld [vmem:[%s3006_s16 + $0x60] sm:$0xff]  ;;  %v2015_v48 = vld [vmem:[%s3006_s16 + $0x10] sm:$0xff] }
 0xadb   : > { %v2598_v49 = vpop.eup %2597 }
 0xadc   : > { %v1784_v50 = vmul.f32 %v2598_v49, %v2594_v40  ;;  %v2023_v40 = vld [vmem:[%s3006_s16 + $0x50] sm:$0xff]  ;;  %v2014_v49 = vld [vmem:[%s3006_s16 + $0x8] sm:$0xff] }
 0xade   : > { %2490 = vmatprep.mubr.msk.f32.mxu0 %vm851_vm3, %v1784_v50  ;;  %v2013_v50 = vld [vmem:[%s3006_s16] sm:$0xff] }
 0xadf   : > { %2491 = vmatmul.mubr.msk.f32.vlgmr.msra.gmra.mxu0 %vm851_vm3, %v1785_v51  ;;  %v2337_v51 = vld [vmem:[%s3005_s15] ss:$0 sm:$0xff] }
 0xae0   : > { %2499 = vmatpush3.msra.mxu0 %v2011_v15 }
 0xae1   : > { %2500 = vmatprep.subr.mxu0 %v2010_v16 }
 0xae2   : > { %2501 = vmatpush3.msra.mxu0 %v2010_v16 }
 0xae3   : > { %2502 = vmatprep.subr.mxu0 %v2009_v17 }
 0xae4   : > { %2503 = vmatpush3.msra.mxu0 %v2009_v17 }
 0xae5   : > { %2504 = vmatprep.subr.mxu0 %v2008_v18 }
 0xae6   : > { %2505 = vmatpush3.msra.mxu0 %v2008_v18 }
 0xb9f   : > { %v2492_v53 = vpop.f32.mrf.mxu0 }
 0xba1   : > { %v1861_v54 = vpop.f32.mrf.mxu0 }
 0xba2   : > { %2495 = vmatprep.mubr.msk.f32.mxu1 %vm851_vm3, %v1861_v54 }
 0xba3   : > { %2496 = vmatmul.mubr.msk.f32.vlgmr.msra.gmra.mxu1 %vm851_vm3, %v2492_v53 }
 0xba4   : > { %2510 = vmatpush3.msra.mxu1 %v2028_v35 }
 0xba5   : > { %2511 = vmatprep.subr.mxu1 %v2027_v36 }
 0xba6   : > { %2512 = vmatpush3.msra.mxu1 %v2027_v36 }
 0xba7   : > { %2513 = vmatprep.subr.mxu1 %v2026_v37 }
 0xba8   : > { %2514 = vmatpush3.msra.mxu1 %v2026_v37 }
 0xba9   : > { %2515 = vmatprep.subr.mxu1 %v2025_v38 }
 0xbaa   : > { %2516 = vmatpush3.msra.mxu1 %v2025_v38 }
 0xbab   : > { %2517 = vmatprep.subr.mxu1 %v2024_v39 }
 0xbac   : > { %2518 = vmatpush3.msra.mxu1 %v2024_v39 }
 0xbad   : > { %2519 = vmatprep.subr.mxu1 %v2023_v40 }
 0xbae   : > { %2520 = vmatpush3.msra.mxu1 %v2023_v40 }
 0xbaf   : > { %2521 = vmatprep.subr.mxu1 %v2022_v41 }
 0xbb0   : > { %2522 = vmatpush3.msra.mxu1 %v2022_v41 }
 0xbb1   : > { %2523 = vmatprep.subr.mxu1 %v2021_v42 }
 0xbb2   : > { %2524 = vmatpush3.msra.mxu1 %v2021_v42 }
 0xbb3   : > { %2525 = vmatprep.subr.mxu1 %v2020_v43 }
 0xbb4   : > { %2526 = vmatpush3.msra.mxu1 %v2020_v43 }
 0xc63   : > { %v2497_v56 = vpop.f32.mrf.mxu1 }
 0xc64   : > { %v1953_v58 = vadd.f32 %v2497_v56, %v1676_v44  ;;  %v2019_v44 = vld [vmem:[%s3006_s16 + $0x30] sm:$0xff] }
 0xc65   : > { %v1943_v62 = vpop.f32.mrf.mxu1  ;;  %2527 = vmatprep.subr.mxu1 %v2019_v44 }
 0xc66   : > { %v1952_v2 = vadd.f32 %v1943_v62, %v1675_v57  ;;  %v1961_v4 = vadd.f32 %v2334_v61, %v1953_v58  ;;  %2528 = vmatpush3.msra.mxu1 %v2019_v44 }
 0xc67   : > { %2529 = vmatprep.subr.mxu1 %v2018_v45 }
 0xc68   : > { %v1960_v5 = vadd.f32 %v2334_v61, %v1952_v2  ;;  %v2894_v7 = vadd.f32 %v1961_v4, %v2741_v1  ;;  %2530 = vmatpush3.msra.mxu1 %v2018_v45 }
 0xc69   : > { %2531 = vmatprep.subr.mxu1 %v2017_v46 }
 0xc6a   : > { %v2891_v6 = vadd.f32 %v1960_v5, %v2736_v0  ;;  %v1969_v8 = vsel %vm602_vm1, %v2894_v7, 0.0  ;;  %2532 = vmatpush3.msra.mxu1 %v2017_v46 }
 0xc6b   : > { %2533 = vmatprep.subr.mxu1 %v2016_v47 }
 0xc6c   : > { %v1966_v60 = vsel %vm598_vm0, %v2891_v6, 0.0  ;;  %2534 = vmatpush3.msra.mxu1 %v2016_v47 }
 0xc6d   : > { %1967 = vadd.xlane.f32.xlu1 %v1966_v60  ;;  %2535 = vmatprep.subr.mxu1 %v2015_v48 }
 0xc6e   : > { %2536 = vmatpush3.msra.mxu1 %v2015_v48 }
 0xc6f   : > { %2537 = vmatprep.subr.mxu1 %v2014_v49 }
 0xc70   : > { %2538 = vmatpush3.msra.mxu1 %v2014_v49 }
 0xc71   : > { %1970 = vadd.xlane.f32.xlu1 %v1969_v8  ;;  %2539 = vmatprep.subr.mxu1 %v2013_v50 }
 0xc72   : > { %2540 = vmatpush3.msra.mxu1 %v2013_v50 }
 0xcf6   : > { %v1968_v9 = vpop.xlane.xlu1 %1967 }
 0xcf7   : > { %v1972_v10 = vmul.f32 0.03125, %v1968_v9 }
 0xcf9   : > { %v1974_v11 = vsub.f32 %v2891_v6, %v1972_v10 }
 0xcfa   : > { %v1971_v12 = vpop.xlane.xlu1 %1970 }
 0xcfb   : > { %v1973_v13 = vmul.f32 0.03125, %v1971_v12  ;;  %v1976_v14 = vmul.f32 %v1974_v11, %v1974_v11 }
 0xcfd   : > { %v1975_v0 = vsub.f32 %v2894_v7, %v1973_v13  ;;  %v1978_v1 = vsel %vm598_vm0, %v1976_v14, 0.0 }
 0xcfe   : > { %1979 = vadd.xlane.f32.xlu1 %v1978_v1  ;;  %v2340_v1 = vld [vmem:[%s3007_s17] ss:$0 sm:$0xff] }
 0xcff   : > { %v1977_v59 = vmul.f32 %v1975_v0, %v1975_v0 }
 0xd01   : > { %v1981_v3 = vsel %vm602_vm1, %v1977_v59, 0.0 }
 0xd02   : > { %1982 = vadd.xlane.f32.xlu1 %v1981_v3 }
 0xd87   : > { %v1980_v19 = vpop.xlane.xlu1 %1979 }
 0xd88   : > { %v1984_v20 = vmul.f32 0.03125, %v1980_v19 }
 0xd8a   : > { %v1986_v21 = vadd.f32 1e-05, %v1984_v20 }
 0xd8b   : > { %v1983_v22 = vpop.xlane.xlu1 %1982 }
 0xd8c   : > { %2599 = vrsqrt.f32 %v1986_v21  ;;  %v1985_v23 = vmul.f32 0.03125, %v1983_v22 }
 0xd8e   : > { %v1987_v24 = vadd.f32 1e-05, %v1985_v23 }
 0xd90   : > { %2601 = vrsqrt.f32 %v1987_v24 }
 0xd99   : > { %v2600_v25 = vpop.eup %2599 }
 0xd9a   : > { %v1990_v27 = vmul.f32 %v2600_v25, %v1974_v11 }
 0xd9c   : > { %v1998_v29 = vmul.f32 %v2335_v26, %v1990_v27 }
 0xd9d   : > { %v2602_v30 = vpop.eup %2601 }
 0xd9e   : > { %v1991_v31 = vmul.f32 %v2602_v30, %v1975_v0  ;;  %v2006_v32 = vadd.f32 %v2336_v28, %v1998_v29 }
 0xda0   : > { %v1999_v33 = vmul.f32 %v2335_v26, %v1991_v31  ;;  %2506 = vmatprep.mubr.msk.f32.mxu0 %vm598_vm0, %v2006_v32 }
 0xda2   : > { %v2007_v34 = vadd.f32 %v2336_v28, %v1999_v33 }
 0xda4   : > { %2507 = vmatmul.mubr.msk.f32.vlgmr.msra.gmra.mxu0 %vm598_vm0, %v2007_v34 }
 0xe64   : > { %v2508_v63 = vpop.f32.mrf.mxu0 }
 0xe65   : > { %v2114_v52 = vadd.f32 %v2508_v63, %v2337_v51 }
 0xe66   : > { %v2108_v53 = vpop.f32.mrf.mxu0 }
 0xe67   : > { %v2118_v54 = vmul.f32 %v2114_v52, %v2114_v52  ;;  %v2109_v55 = vadd.f32 %v2337_v51, %v2108_v53 }
 0xe69   : > { %v2120_v56 = vmul.f32 %v2118_v54, %v2114_v52  ;;  %v2117_v57 = vmul.f32 %v2109_v55, %v2109_v55 }
 0xe6b   : > { %v2122_v58 = vmul.f32 0.044715, %v2120_v56  ;;  %v2119_v61 = vmul.f32 %v2117_v57, %v2109_v55 }
 0xe6d   : > { %v2124_v62 = vadd.f32 %v2122_v58, %v2114_v52  ;;  %v2121_v2 = vmul.f32 0.044715, %v2119_v61 }
 0xe6f   : > { %v2126_v4 = vmul.f32 0.7978846, %v2124_v62  ;;  %v2123_v5 = vadd.f32 %v2121_v2, %v2109_v55 }
 0xe71   : > { %2603 = vtanh.f32 %v2126_v4  ;;  %v2125_v60 = vmul.f32 0.7978846, %v2123_v5 }
 0xe73   : > { %2605 = vtanh.f32 %v2125_v60 }
 0xe7e   : > { %v2604_v8 = vpop.eup %2603 }
 0xe7f   : > { %v2130_v9 = vadd.f32 1.0, %v2604_v8 }
 0xe80   : > { %v2606_v10 = vpop.eup %2605 }
 0xe81   : > { %v2129_v11 = vadd.f32 1.0, %v2606_v10  ;;  %v2132_v12 = vmul.f32 0.5, %v2130_v9 }
 0xe83   : > { %v2131_v13 = vmul.f32 0.5, %v2129_v11  ;;  %v2134_v0 = vmul.f32 %v2132_v12, %v2114_v52 }
 0xe85   : > { %v2133_v14 = vmul.f32 %v2131_v13, %v2109_v55 }
 0xe87   : > { %2541 = vmatprep.mubr.f32.mxu1 %v2133_v14 }
 0xe88   : > { %2542 = vmatmul.mubr.f32.vlgmr.msra.gmra.mxu1 %v2134_v0 }
 0xf48   : > { %v2543_v59 = vpop.f32.mrf.mxu1 }
 0xf49   : > { %v2213_v3 = vadd.f32 %v2543_v59, %v2340_v1 }
 0xf4a   : > { %v2207_v15 = vpop.f32.mrf.mxu1 }
 0xf4b   : > { %v2217_v16 = vadd.f32 %v2213_v3, %v2894_v7  ;;  %v2208_v17 = vadd.f32 %v2340_v1, %v2207_v15 }
 0xf4d   : > { %2219 = vst.msk [vmem:[%s592_s24 + $0x8] sm:$0x1] %vm602_vm1, %v2217_v16  ;;  %v2216_v18 = vadd.f32 %v2208_v17, %v2891_v6 }
 0xf4f   : > { %2218 = vst.msk [vmem:[%s592_s24] sm:$0xff] %vm598_vm0, %v2216_v18 }
 0xf50 PF: > { %s28_s27 = sadd.s32 1, %s2613_s27  }
 0xf51   : > { %p25_p4 = scmp.ge.s32.totalorder %s28_s27, 4  }
 0xf53   :  { %27 = sbr.rel (!%p25_p4) target bundleno = 4 (0x4), region = 125 }

// kernel: constrained_seed_generator_forward.16
= control target key start
LH: loop header
LB: loop body
LE: loop exit
PB: predicated region body
PF: predicated region fallthrough
CT: control target
= control target key end

     0   :  { %vm27_vm0 = vcmask 261120   ;;  %vm109_vm1 = vcmask 523264   ;;  %s185_s1 = inlined_call_operand.vmem [shape: f32[32,64], index: 1, kind: input, shape index: {}]   ;;  %s186_s0 = inlined_call_operand.vmem [shape: f32[16,32], index: 0, kind: input, shape index: {}]   ;;  %s187_s2 = inlined_call_operand.vmem [shape: f32[1,64], index: 2, kind: input, shape index: {}]   ;;  %s188_s3 = inlined_call_operand.vmem [shape: f32[16,64], index: 3, kind: output, shape index: {}]  }
   0x1   :  { %v19_v0 = vld [vmem:[%s185_s1 + $0x18] sm:$0xff]  ;;  %v18_v1 = vld [vmem:[%s185_s1 + $0x10] sm:$0xff]  ;;  %v14_v2 = vld [vmem:[%s186_s0] sm:$0xff] }
   0x2   :  { %125 = vmatprep.subr.mxu0 %v19_v0  ;;  %v17_v3 = vld [vmem:[%s185_s1 + $0x8] sm:$0xff]  ;;  %133 = vmatprep.mubr.msk.f32.mxu0 %vm27_vm0, %v14_v2  ;;  %v16_v4 = vld [vmem:[%s185_s1] sm:$0xff] }
   0x3   :  { %126 = vmatpush3.msra.mxu0 %v19_v0  ;;  %v15_v5 = vld [vmem:[%s186_s0 + $0x8] sm:$0xff]  ;;  %v116_v6 = vld [vmem:[%s187_s2] ss:$0 sm:$0xff] }
   0x4   :  { %127 = vmatprep.subr.mxu0 %v18_v1 }
   0x5   :  { %128 = vmatpush3.msra.mxu0 %v18_v1 }
   0x6   :  { %129 = vmatprep.subr.mxu0 %v17_v3 }
   0x7   :  { %130 = vmatpush3.msra.mxu0 %v17_v3 }
   0x8   :  { %131 = vmatprep.subr.mxu0 %v16_v4 }
   0x9   :  { %132 = vmatpush3.msra.mxu0 %v16_v4 }
   0xa   :  { %134 = vmatmul.mubr.msk.f32.vlgmr.msra.gmra.mxu0 %vm27_vm0, %v15_v5 }
  0xca   :  { %v135_v7 = vpop.f32.mrf.mxu0 }
  0xcb   :  { %v106_v8 = vadd.f32 %v135_v7, %v116_v6 }
  0xcc   :  { %v100_v9 = vpop.f32.mrf.mxu0 }
  0xcd   :  { %111 = vst.msk [vmem:[%s188_s3 + $0x8] sm:$0xff] %vm109_vm1, %v106_v8  ;;  %v101_v10 = vadd.f32 %v116_v6, %v100_v9 }
  0xcf   :  { %110 = vst.msk [vmem:[%s188_s3] sm:$0xff] %vm109_vm1, %v101_v10 }

// kernel: constrained_seed_generator_forward.12
= control target key start
LH: loop header
LB: loop body
LE: loop exit
PB: predicated region body
PF: predicated region fallthrough
CT: control target
= control target key end

     0   :  { %s2466_s25 = smov 0   ;;  %s2736_s0 = inlined_call_operand.vmem [shape: f32[2,9,32], index: 0, kind: input, shape index: {}]   ;;  %s2737_s1 = inlined_call_operand.vmem [shape: f32[1,32], index: 1, kind: input, shape index: {}]   ;;  %s2738_s2 = inlined_call_operand.vmem [shape: f32[1,32], index: 2, kind: input, shape index: {}]   ;;  %s2739_s3 = inlined_call_operand.vmem [shape: f32[32,96], index: 3, kind: input, shape index: {}]   ;;  %s2740_s4 = inlined_call_operand.vmem [shape: f32[1,96], index: 4, kind: input, shape index: {}]   ;;  %s2741_s5 = inlined_call_operand.vmem [shape: f32[32,32], index: 5, kind: input, shape index: {}]   ;;  %s2742_s6 = inlined_call_operand.vmem [shape: f32[1,32], index: 6, kind: input, shape index: {}]   ;;  %s2743_s7 = inlined_call_operand.vmem [shape: f32[1,32], index: 7, kind: input, shape index: {}]   ;;  %s2744_s8 = inlined_call_operand.vmem [shape: f32[1,32], index: 8, kind: input, shape index: {}]   ;;  %s2745_s9 = inlined_call_operand.vmem [shape: f32[32,128], index: 9, kind: input, shape index: {}]   ;;  %s2746_s10 = inlined_call_operand.vmem [shape: f32[1,128], index: 10, kind: input, shape index: {}]   ;;  %s2747_s11 = inlined_call_operand.vmem [shape: f32[128,32], index: 11, kind: input, shape index: {}]   ;;  %s2748_s12 = inlined_call_operand.vmem [shape: f32[1,32], index: 12, kind: input, shape index: {}]   ;;  %s2749_s13 = inlined_call_operand.vmem [shape: f32[2,9,32], index: 13, kind: output, shape index: {}]  }
   0x1 LB: > { %s2046_s26 = sadd.s32 4294967295, %s2383_s25   ;;  %p2050_p0 = scmp.ge.s32.totalorder %s2383_s25, 1  ;;  %s2383_s25 = sphi %s2466_s25, %s23_s25  }
   0x2   : > { %p387_p1 = scmp.lt.s32.totalorder %s2383_s25, 3 }
   0x4   : > { %p388_p2 = pnand %p2050_p0, %p387_p1 }
   0x5   : > { %p431_p3 = scmp.lt.s32.totalorder (!%p388_p2), %s2046_s26, 1  ;;  %s2385_s14 = smov (!%p388_p2), 88  }
   0x6   : > { %391 = sbr.rel (%p388_p2) target bundleno = 3221 (0xc95), region = 72  ;;  %s2386_s15 = smov (!%p388_p2), 96  }
   0x7   : > { %s2387_s16 = smov (!%p388_p2), 120   ;;  %s2388_s17 = smov (!%p388_p2), 64  }
   0x8   : > { %s2389_s18 = smov (!%p388_p2), 56   ;;  %s2390_s19 = smov (!%p388_p2), 80  }
   0x9   : > { %s2391_s20 = smov (!%p388_p2), 112   ;;  %s2392_s21 = smov (!%p388_p2), 72  }
   0xa   : > { %s2393_s22 = smov (!%p388_p2), 104  }
   0xb   : > { %s2751_s26 = smov (!%p431_p3, %s2046_s26), 1  ;;  %vm445_vm0 = vcmask 261120   ;;  %vm449_vm1 = vcmask 253952   ;;  %v493_v14 = vld [vmem:[%s2739_s3 + $0x18] sm:$0xff]  ;;  %v492_v15 = vld [vmem:[%s2739_s3 + $0x10] sm:$0xff]  ;;  %v491_v16 = vld [vmem:[%s2739_s3 + $0x8] sm:$0xff] }
   0xc   : > { %s2105_s27 = sshll.u32 %s2751_s26, 4  ;;  %2181 = vmatprep.subr.mxu0 %v493_v14  ;;  %v490_v17 = vld [vmem:[%s2739_s3] sm:$0xff]  ;;  %vm591_vm2 = vcmask 64512   ;;  %vm681_vm3 = vcmask 65536   ;;  %vm677_vm4 = vcmask 72704   ;;  %vm712_vm5 = vcmask 1040384  }
   0xd   : > { %s435_s30 = scalar_lea.vmem %s2736_s0, %s2105_s27  ;;  %2182 = vmatpush3.msra.mxu0 %v493_v14  ;;  %v2055_v25 = vld [vmem:[%s2737_s1] ss:$0 sm:$0xff] }
   0xe   : > { %v2482_v0 = vld [vmem:[%s435_s30] sm:$0xff]  ;;  %v2484_v1 = vld [vmem:[%s435_s30 + $0x8] sm:$0x1]  ;;  %2183 = vmatprep.subr.mxu0 %v492_v15  ;;  %s2394_s30 = smov 48  }
   0xf   : > { %v446_v2 = vsel %vm445_vm0, %v2482_v0, 0.0  ;;  %v450_v3 = vsel %vm449_vm1, %v2484_v1, 0.0  ;;  %2184 = vmatpush3.msra.mxu0 %v492_v15  ;;  %v2056_v27 = vld [vmem:[%s2738_s2] ss:$0 sm:$0xff] }
  0x10   : > { %447 = vadd.xlane.f32.xlu0 %v446_v2  ;;  %2185 = vmatprep.subr.mxu0 %v491_v16  ;;  %v2057_v34 = vld [vmem:[%s2740_s4] ss:$0 sm:$0xff] }
  0x11   : > { %2186 = vmatpush3.msra.mxu0 %v491_v16 }
  0x12   : > { %2187 = vmatprep.subr.mxu0 %v490_v17 }
  0x13   : > { %2188 = vmatpush3.msra.mxu0 %v490_v17 }
  0x14   : > { %451 = vadd.xlane.f32.xlu0 %v450_v3 }
  0x99   : > { %v448_v4 = vpop.xlane.xlu0 %447 }
  0x9a   : > { %v454_v5 = vmul.f32 0.03125, %v448_v4 }
  0x9c   : > { %v456_v6 = vsub.f32 %v2482_v0, %v454_v5 }
  0x9d   : > { %v452_v7 = vpop.xlane.xlu0 %451 }
  0x9e   : > { %v455_v8 = vmul.f32 0.03125, %v452_v7  ;;  %v458_v9 = vmul.f32 %v456_v6, %v456_v6 }
  0xa0   : > { %v457_v10 = vsub.f32 %v2484_v1, %v455_v8  ;;  %v460_v11 = vsel %vm445_vm0, %v458_v9, 0.0 }
  0xa1   : > { %461 = vadd.xlane.f32.xlu1 %v460_v11 }
  0xa2   : > { %v459_v12 = vmul.f32 %v457_v10, %v457_v10 }
  0xa4   : > { %v463_v13 = vsel %vm449_vm1, %v459_v12, 0.0 }
  0xa5   : > { %464 = vadd.xlane.f32.xlu1 %v463_v13 }
 0x12a   : > { %v462_v18 = vpop.xlane.xlu1 %461 }
 0x12b   : > { %v466_v19 = vmul.f32 0.03125, %v462_v18 }
 0x12d   : > { %v468_v20 = vadd.f32 1e-05, %v466_v19 }
 0x12e   : > { %v465_v21 = vpop.xlane.xlu1 %464 }
 0x12f   : > { %2333 = vrsqrt.f32 %v468_v20  ;;  %v467_v22 = vmul.f32 0.03125, %v465_v21 }
 0x131   : > { %v469_v23 = vadd.f32 1e-05, %v467_v22 }
 0x133   : > { %2335 = vrsqrt.f32 %v469_v23 }
 0x13c   : > { %v2334_v24 = vpop.eup %2333 }
 0x13d   : > { %v472_v26 = vmul.f32 %v2334_v24, %v456_v6 }
 0x13f   : > { %v480_v28 = vmul.f32 %v2055_v25, %v472_v26 }
 0x140   : > { %v2336_v29 = vpop.eup %2335 }
 0x141   : > { %v473_v30 = vmul.f32 %v2336_v29, %v457_v10  ;;  %v488_v31 = vadd.f32 %v2056_v27, %v480_v28  ;;  %v992_v29 = vld [vmem:[%s2741_s5 + $0x8] sm:$0xff] }
 0x143   : > { %v481_v32 = vmul.f32 %v2055_v25, %v473_v30  ;;  %2189 = vmatprep.mubr.msk.f32.mxu0 %vm445_vm0, %v488_v31  ;;  %v790_v30 = vld [vmem:[%s2741_s5] sm:$0xff] }
 0x145   : > { %v489_v33 = vadd.f32 %v2056_v27, %v481_v32 }
 0x147   : > { %2190 = vmatmul.mubr.msk.f32.vlgmr.msra.gmra.mxu0 %vm445_vm0, %v489_v33 }
 0x207   : > { %v2191_v35 = vpop.f32.mrf.mxu0 }
 0x208   : > { %v2517_v36 = vadd.f32 %v2191_v35, %v2057_v34 }
 0x209   : > { %v573_v37 = vpop.f32.mrf.mxu0 }
 0x20a   : > { %v2519_v38 = vadd.f32 %v2057_v34, %v573_v37  ;;  %797 = vrot.lane.b32.xlu1 %v2517_v36, %s2385_s14  ;;  %589 = vrot.lane.b32.xlu0 %v2517_v36, %s2386_s15  ;;  %v2532_v40 = vmul.f32 0.35355338, %v2517_v36 }
 0x20c   : > { %v2524_v39 = vmul.f32 0.35355338, %v2519_v38 }
 0x20e   : > { %587 = vrot.lane.b32.xlu1 %v2519_v38, %s2386_s15  ;;  %791 = vrot.lane.b32.xlu0 %v2524_v39, %s2387_s16  ;;  %s440_s15 = scalar_lea.vmem %s2749_s13, %s2105_s27 }
 0x20f   : > { %2196 = vmatprep.mubr.msk.f32.mxu0 %vm591_vm2, %v2524_v39 }
 0x212   : > { %795 = vrot.lane.b32.xlu1 %v2519_v38, %s2385_s14  ;;  %s2395_s14 = smov 40  }
 0x216   : > { %793 = vrot.lane.b32.xlu1 %v2532_v40, %s2387_s16 }
 0x27c   : > { %v798_v41 = vpop.permute.xlu1 %797  ;;  %v590_v42 = vpop.permute.xlu0 %589 }
 0x27d   : > { %2192 = vmatprep.subr.msk.mxu0 %vm591_vm2, %v590_v42  ;;  %2206 = vmatprep.subr.msk.mxu1 %vm591_vm2, %v798_v41 }
 0x27e   : > { %2193 = vmatpush3.xpose.msk.msra.mxu0 %vm591_vm2, %v590_v42  ;;  %2207 = vmatpush3.xpose.msk.msra.mxu1 %vm591_vm2, %v798_v41 }
 0x280   : > { %v588_v43 = vpop.permute.xlu1 %587  ;;  %v792_v44 = vpop.permute.xlu0 %791 }
 0x281   : > { %2194 = vmatprep.subr.msk.mxu0 %vm591_vm2, %v588_v43  ;;  %2210 = vmatprep.mubr.msk.f32.mxu1 %vm591_vm2, %v792_v44 }
 0x282   : > { %2195 = vmatpush3.xpose.msk.msra.mxu0 %vm591_vm2, %v588_v43 }
 0x284   : > { %v796_v45 = vpop.permute.xlu1 %795 }
 0x285   : > { %2197 = vmatmul.mubr.msk.f32.vlgmr.msra.gmra.mxu0 %vm591_vm2, %v2532_v40  ;;  %2208 = vmatprep.subr.msk.mxu1 %vm591_vm2, %v796_v45 }
 0x286   : > { %2209 = vmatpush3.xpose.msk.msra.mxu1 %vm591_vm2, %v796_v45 }
 0x288   : > { %v794_v46 = vpop.permute.xlu1 %793 }
 0x289   : > { %2211 = vmatmul.mubr.msk.f32.vlgmr.msra.gmra.mxu1 %vm591_vm2, %v794_v46 }
 0x345   : > { %v2198_v47 = vpop.f32.mrf.mxu0 }
 0x346   : > { %v682_v48 = vsel %vm681_vm3, %v2198_v47, -inf }
 0x347   : > { %683 = vmax.xlane.f32.xlu1 %v682_v48  ;;  %v668_v49 = vpop.f32.mrf.mxu0 }
 0x348   : > { %v678_v50 = vsel %vm677_vm4, %v668_v49, -inf }
 0x349   : > { %v2212_v51 = vpop.f32.mrf.mxu1  ;;  %679 = vmax.xlane.f32.xlu0 %v678_v50 }
 0x34a   : > { %v885_v54 = vsel %vm681_vm3, %v2212_v51, -inf }
 0x34b   : > { %v873_v52 = vpop.f32.mrf.mxu1 }
 0x34c   : > { %v882_v53 = vsel %vm677_vm4, %v873_v52, -inf }
 0x34d   : > { %883 = vmax.xlane.f32.xlu0 %v882_v53 }
 0x351   : > { %886 = vmax.xlane.f32.xlu0 %v885_v54 }
 0x3d0   : > { %v684_v55 = vpop.xlane.xlu1 %683 }
 0x3d1   : > { %v686_v56 = vsub.f32 %v2198_v47, %v684_v55 }
 0x3d2   : > { %v680_v57 = vpop.xlane.xlu0 %679 }
 0x3d3   : > { %v689_v58 = vmul.f32 1.442695, %v686_v56  ;;  %v685_v59 = vsub.f32 %v668_v49, %v680_v57 }
 0x3d5   : > { %2337 = vpow2.f32 %v689_v58  ;;  %v687_v60 = vmul.f32 1.442695, %v685_v59 }
 0x3d6   : > { %v884_v61 = vpop.xlane.xlu0 %883 }
 0x3d7   : > { %2339 = vpow2.f32 %v687_v60  ;;  %v888_v62 = vsub.f32 %v873_v52, %v884_v61 }
 0x3d9   : > { %v890_v63 = vmul.f32 1.442695, %v888_v62 }
 0x3da   : > { %v887_v2 = vpop.xlane.xlu0 %886 }
 0x3db   : > { %2341 = vpow2.f32 %v890_v63  ;;  %v889_v3 = vsub.f32 %v2212_v51, %v887_v2 }
 0x3dd   : > { %v892_v4 = vmul.f32 1.442695, %v889_v3 }
 0x3df   : > { %2343 = vpow2.f32 %v892_v4 }
 0x3e2   : > { %v2338_v5 = vpop.eup %2337 }
 0x3e3   : > { %v694_v6 = vsel %vm681_vm3, %v2338_v5, 0.0 }
 0x3e4   : > { %v2340_v7 = vpop.eup %2339  ;;  %695 = vadd.xlane.f32.xlu1 %v694_v6 }
 0x3e5   : > { %v691_v8 = vsel %vm677_vm4, %v2340_v7, 0.0 }
 0x3e6   : > { %692 = vadd.xlane.f32.xlu0 %v691_v8 }
 0x3e8   : > { %v2342_v9 = vpop.eup %2341 }
 0x3e9   : > { %v894_v10 = vsel %vm677_vm4, %v2342_v9, 0.0 }
 0x3ea   : > { %895 = vadd.xlane.f32.xlu0 %v894_v10 }
 0x3ec   : > { %v2344_v11 = vpop.eup %2343 }
 0x3ed   : > { %v897_v12 = vsel %vm681_vm3, %v2344_v11, 0.0 }
 0x3ee   : > { %898 = vadd.xlane.f32.xlu1 %v897_v12 }
 0x3ff   : > { %701 = vrot.lane.b32.xlu1 %v2519_v38, %s2388_s17 }
 0x400   : > { %703 = vrot.lane.b32.xlu0 %v2517_v36, %s2388_s17 }
 0x403   : > { %906 = vrot.lane.b32.xlu1 %v2517_v36, %s2389_s18 }
 0x404   : > { %1161 = vrot.lane.b32.xlu0 %v2517_v36, %s2390_s19 }
 0x407   : > { %904 = vrot.lane.b32.xlu1 %v2519_v38, %s2389_s18 }
 0x408   : > { %1155 = vrot.lane.b32.xlu0 %v2524_v39, %s2391_s20 }
 0x40b   : > { %1159 = vrot.lane.b32.xlu1 %v2519_v38, %s2390_s19 }
 0x40c   : > { %1446 = vrot.lane.b32.xlu0 %v2517_v36, %s2392_s21 }
 0x40f   : > { %1157 = vrot.lane.b32.xlu1 %v2532_v40, %s2391_s20 }
 0x410   : > { %1440 = vrot.lane.b32.xlu0 %v2524_v39, %s2393_s22 }
 0x413   : > { %1444 = vrot.lane.b32.xlu1 %v2519_v38, %s2392_s21 }
 0x417   : > { %1442 = vrot.lane.b32.xlu1 %v2532_v40, %s2393_s22 }
 0x46d   : > { %v696_v13 = vpop.xlane.xlu1 %695 }
 0x46e   : > { %2345 = vrcp.f32 %v696_v13 }
 0x46f   : > { %v693_v14 = vpop.xlane.xlu0 %692 }
 0x470   : > { %2347 = vrcp.f32 %v693_v14 }
 0x473   : > { %v896_v15 = vpop.xlane.xlu0 %895 }
 0x474   : > { %2349 = vrcp.f32 %v896_v15 }
 0x477   : > { %v899_v16 = vpop.xlane.xlu1 %898  ;;  %v704_v17 = vpop.permute.xlu0 %703 }
 0x478   : > { %2351 = vrcp.f32 %v899_v16  ;;  %2199 = vmatprep.subr.msk.mxu0 %vm712_vm5, %v704_v17  ;;  %v1356_v16 = vld [vmem:[%s2741_s5 + $0x10] sm:$0xff] }
 0x479   : > { %2200 = vmatpush3.msk.msra.mxu0 %vm712_vm5, %v704_v17 }
 0x47b   : > { %v702_v18 = vpop.permute.xlu1 %701  ;;  %v2346_v19 = vpop.eup %2345 }
 0x47c   : > { %2201 = vmatprep.subr.mxu0 %v702_v18  ;;  %v700_v23 = vmul.f32 %v2346_v19, %v2338_v5  ;;  %v1162_v32 = vpop.permute.xlu0 %1161 }
 0x47d   : > { %v2348_v20 = vpop.eup %2347  ;;  %2202 = vmatpush3.msra.mxu0 %v702_v18 }
 0x47e   : > { %v699_v21 = vmul.f32 %v2348_v20, %v2340_v7 }
 0x47f   : > { %v907_v22 = vpop.permute.xlu1 %906 }
 0x480   : > { %2203 = vmatprep.mubr.msk.f32.mxu0 %vm677_vm4, %v699_v21  ;;  %2213 = vmatprep.subr.msk.mxu0 %vm712_vm5, %v907_v22  ;;  %v1156_v37 = vpop.permute.xlu0 %1155 }
 0x481   : > { %v2350_v24 = vpop.eup %2349  ;;  %2204 = vmatmul.mubr.msk.f32.vlgmr.msra.gmra.mxu0 %vm677_vm4, %v700_v23 }
 0x482   : > { %2214 = vmatpush3.msk.msra.mxu0 %vm712_vm5, %v907_v22  ;;  %v902_v25 = vmul.f32 %v2350_v24, %v2342_v9 }
 0x483   : > { %v905_v26 = vpop.permute.xlu1 %904 }
 0x484   : > { %2215 = vmatprep.subr.mxu0 %v905_v26  ;;  %2217 = vmatprep.mubr.msk.f32.mxu0 %vm677_vm4, %v902_v25  ;;  %v1447_v40 = vpop.permute.xlu0 %1446 }
 0x485   : > { %v2352_v27 = vpop.eup %2351  ;;  %2216 = vmatpush3.msra.mxu0 %v905_v26 }
 0x486   : > { %v903_v28 = vmul.f32 %v2352_v27, %v2344_v11  ;;  %2220 = vmatprep.subr.mxu0 %v992_v29 }
 0x487   : > { %v1160_v39 = vpop.permute.xlu1 %1159 }
 0x488   : > { %2218 = vmatmul.mubr.msk.f32.vlgmr.msra.gmra.mxu0 %vm677_vm4, %v903_v28  ;;  %v1441_v42 = vpop.permute.xlu0 %1440 }
 0x489   : > { %2221 = vmatpush3.msra.mxu0 %v992_v29 }
 0x48a   : > { %2225 = vmatprep.subr.mxu0 %v790_v30 }
 0x48b   : > { %v1158_v41 = vpop.permute.xlu1 %1157 }
 0x48f   : > { %v1445_v43 = vpop.permute.xlu1 %1444 }
 0x493   : > { %v1443_v44 = vpop.permute.xlu1 %1442 }
 0x541   : > { %v2205_v31 = vpop.f32.mrf.mxu0 }
 0x543   : > { %v781_v33 = vpop.f32.mrf.mxu0 }
 0x548   : > { %v2219_v34 = vpop.f32.mrf.mxu0 }
 0x54a   : > { %v983_v35 = vpop.f32.mrf.mxu0 }
 0x54b   : > { %2222 = vmatprep.mubr.msk.f32.mxu0 %vm591_vm2, %v983_v35 }
 0x54c   : > { %2223 = vmatmul.mubr.msk.f32.vlgmr.msra.gmra.mxu0 %vm591_vm2, %v2219_v34  ;;  %v1641_v34 = vld [vmem:[%s2741_s5 + $0x18] sm:$0xff] }
 0x54d   : > { %2226 = vmatpush3.msra.mxu0 %v790_v30  ;;  %2227 = vmatprep.mubr.msk.f32.mxu0 %vm591_vm2, %v781_v33 }
 0x54e   : > { %2230 = vmatprep.subr.msk.mxu0 %vm591_vm2, %v1162_v32 }
 0x550   : > { %2228 = vmatmul.mubr.msk.f32.vlgmr.msra.gmra.mxu0 %vm591_vm2, %v2205_v31 }
 0x551   : > { %2231 = vmatpush3.xpose.msk.msra.mxu0 %vm591_vm2, %v1162_v32  ;;  %2234 = vmatprep.mubr.msk.f32.mxu0 %vm591_vm2, %v1156_v37 }
 0x552   : > { %2232 = vmatprep.subr.msk.mxu0 %vm591_vm2, %v1160_v39 }
 0x555   : > { %2233 = vmatpush3.xpose.msk.msra.mxu0 %vm591_vm2, %v1160_v39 }
 0x556   : > { %2249 = vmatprep.subr.msk.mxu0 %vm591_vm2, %v1447_v40 }
 0x558   : > { %2235 = vmatmul.mubr.msk.f32.vlgmr.msra.gmra.mxu0 %vm591_vm2, %v1158_v41 }
 0x559   : > { %2250 = vmatpush3.xpose.msk.msra.mxu0 %vm591_vm2, %v1447_v40  ;;  %2253 = vmatprep.mubr.msk.f32.mxu0 %vm591_vm2, %v1441_v42 }
 0x55a   : > { %2251 = vmatprep.subr.msk.mxu0 %vm591_vm2, %v1445_v43 }
 0x55d   : > { %2252 = vmatpush3.xpose.msk.msra.mxu0 %vm591_vm2, %v1445_v43  ;;  %v2096_v43 = vld [vmem:[%s2742_s6] ss:$0 sm:$0xff] }
 0x560   : > { %2254 = vmatmul.mubr.msk.f32.vlgmr.msra.gmra.mxu0 %vm591_vm2, %v1443_v44 }
 0x60c   : > { %v2224_v45 = vpop.f32.mrf.mxu0 }
 0x60e   : > { %v1065_v46 = vpop.f32.mrf.mxu0 }
 0x610   : > { %v2229_v47 = vpop.f32.mrf.mxu0 }
 0x611   : > { %v2597_v48 = vadd.f32 %v2229_v47, %v2224_v45 }
 0x612   : > { %v1146_v49 = vpop.f32.mrf.mxu0 }
 0x613   : > { %v2599_v50 = vadd.f32 %v1146_v49, %v1065_v46 }
 0x618   : > { %v2236_v51 = vpop.f32.mrf.mxu0 }
 0x619   : > { %v1249_v52 = vsel %vm681_vm3, %v2236_v51, -inf }
 0x61a   : > { %1250 = vmax.xlane.f32.xlu1 %v1249_v52  ;;  %v1237_v53 = vpop.f32.mrf.mxu0 }
 0x61b   : > { %v1246_v54 = vsel %vm677_vm4, %v1237_v53, -inf }
 0x61c   : > { %1247 = vmax.xlane.f32.xlu0 %v1246_v54 }
 0x620   : > { %v2255_v55 = vpop.f32.mrf.mxu0 }
 0x621   : > { %v1534_v10 = vsel %vm681_vm3, %v2255_v55, -inf }
 0x622   : > { %v1522_v56 = vpop.f32.mrf.mxu0 }
 0x623   : > { %v1531_v57 = vsel %vm677_vm4, %v1522_v56, -inf }
 0x62b   : > { %1268 = vrot.lane.b32.xlu1 %v2519_v38, %s2394_s30 }
 0x64f   : > { %1532 = vmax.xlane.f32.xlu1 %v1531_v57 }
 0x6a3   : > { %v1251_v58 = vpop.xlane.xlu1 %1250 }
 0x6a4   : > { %v1253_v59 = vsub.f32 %v2236_v51, %v1251_v58 }
 0x6a5   : > { %v1248_v60 = vpop.xlane.xlu0 %1247 }
 0x6a6   : > { %v1256_v61 = vmul.f32 1.442695, %v1253_v59  ;;  %v1252_v62 = vsub.f32 %v1237_v53, %v1248_v60 }
 0x6a7   : > { %v1269_v6 = vpop.permute.xlu1 %1268 }
 0x6a8   : > { %2353 = vpow2.f32 %v1256_v61  ;;  %v1254_v63 = vmul.f32 1.442695, %v1252_v62  ;;  %v1782_v62 = vld [vmem:[%s2745_s9 + $0x18] sm:$0xff] }
 0x6a9   : > { %2268 = vmatprep.subr.mxu0 %v1782_v62 }
 0x6aa   : > { %2355 = vpow2.f32 %v1254_v63  ;;  %v1781_v63 = vld [vmem:[%s2745_s9 + $0x10] sm:$0xff]  ;;  %2269 = vmatpush3.msra.mxu0 %v1782_v62 }
 0x6ab   : > { %2270 = vmatprep.subr.mxu0 %v1781_v63 }
 0x6ac   : > { %2271 = vmatpush3.msra.mxu0 %v1781_v63 }
 0x6b5   : > { %v2354_v2 = vpop.eup %2353 }
 0x6b6   : > { %v1261_v3 = vsel %vm681_vm3, %v2354_v2, 0.0 }
 0x6b7   : > { %v2356_v4 = vpop.eup %2355  ;;  %1262 = vadd.xlane.f32.xlu0 %v1261_v3  ;;  %v1779_v3 = vld [vmem:[%s2745_s9] sm:$0xff] }
 0x6b8   : > { %v1258_v5 = vsel %vm677_vm4, %v2356_v4, 0.0 }
 0x6bb   : > { %1259 = vadd.xlane.f32.xlu0 %v1258_v5 }
 0x6d1   : > { %1270 = vrot.lane.b32.xlu0 %v2517_v36, %s2394_s30 }
 0x6d8   : > { %v1533_v7 = vpop.xlane.xlu1 %1532 }
 0x6d9   : > { %v1537_v8 = vsub.f32 %v1522_v56, %v1533_v7 }
 0x6db   : > { %v1539_v9 = vmul.f32 1.442695, %v1537_v8 }
 0x6dd   : > { %2357 = vpow2.f32 %v1539_v9 }
 0x6ea   : > { %v2358_v11 = vpop.eup %2357 }
 0x6eb   : > { %v1543_v12 = vsel %vm677_vm4, %v2358_v11, 0.0 }
 0x6f0   : > { %1535 = vmax.xlane.f32.xlu0 %v1534_v10 }
 0x6f4   : > { %1544 = vadd.xlane.f32.xlu0 %v1543_v12 }
 0x70a   : > { %1555 = vrot.lane.b32.xlu0 %v2517_v36, %s2395_s14 }
 0x740   : > { %v1263_v13 = vpop.xlane.xlu0 %1262 }
 0x741   : > { %2359 = vrcp.f32 %v1263_v13 }
 0x744   : > { %v1260_v14 = vpop.xlane.xlu0 %1259 }
 0x745   : > { %2361 = vrcp.f32 %v1260_v14 }
 0x748   : > { %v1271_v15 = vpop.permute.xlu0 %1270 }
 0x749   : > { %2237 = vmatprep.subr.msk.mxu1 %vm712_vm5, %v1271_v15 }
 0x74a   : > { %2238 = vmatpush3.msk.msra.mxu1 %vm712_vm5, %v1271_v15 }
 0x74b   : > { %2239 = vmatprep.subr.mxu1 %v1269_v6 }
 0x74c   : > { %2240 = vmatpush3.msra.mxu1 %v1269_v6 }
 0x74d   : > { %2244 = vmatprep.subr.mxu1 %v1356_v16 }
 0x74e   : > { %v2360_v17 = vpop.eup %2359 }
 0x74f   : > { %v1267_v36 = vmul.f32 %v2360_v17, %v2354_v2  ;;  %v1780_v2 = vld [vmem:[%s2745_s9 + $0x8] sm:$0xff] }
 0x750   : > { %2272 = vmatprep.subr.mxu0 %v1780_v2 }
 0x751   : > { %2273 = vmatpush3.msra.mxu0 %v1780_v2 }
 0x752   : > { %v2362_v18 = vpop.eup %2361  ;;  %2274 = vmatprep.subr.mxu0 %v1779_v3 }
 0x753   : > { %v1266_v19 = vmul.f32 %v2362_v18, %v2356_v4  ;;  %2275 = vmatpush3.msra.mxu0 %v1779_v3 }
 0x755   : > { %2241 = vmatprep.mubr.msk.f32.mxu1 %vm677_vm4, %v1266_v19 }
 0x756   : > { %2242 = vmatmul.mubr.msk.f32.vlgmr.msra.gmra.mxu1 %vm677_vm4, %v1267_v36  ;;  %v1799_v36 = vld [vmem:[%s2747_s11 + $0x78] sm:$0xff] }
 0x757   : > { %2245 = vmatpush3.msra.mxu1 %v1356_v16  ;;  %v2098_v16 = vld [vmem:[%s2744_s8] ss:$0 sm:$0xff] }
 0x779   : > { %v1536_v20 = vpop.xlane.xlu0 %1535 }
 0x77a   : > { %v1538_v21 = vsub.f32 %v2255_v55, %v1536_v20  ;;  %v1798_v20 = vld [vmem:[%s2747_s11 + $0x70] sm:$0xff] }
 0x77c   : > { %v1541_v22 = vmul.f32 1.442695, %v1538_v21  ;;  %v1797_v21 = vld [vmem:[%s2747_s11 + $0x68] sm:$0xff] }
 0x77d   : > { %v1545_v23 = vpop.xlane.xlu0 %1544 }
 0x77e   : > { %2363 = vpow2.f32 %v1541_v22  ;;  %v1796_v22 = vld [vmem:[%s2747_s11 + $0x60] sm:$0xff] }
 0x77f   : > { %2365 = vrcp.f32 %v1545_v23  ;;  %v1795_v23 = vld [vmem:[%s2747_s11 + $0x58] sm:$0xff] }
 0x781   : > { %v1556_v24 = vpop.permute.xlu0 %1555 }
 0x782   : > { %2256 = vmatprep.subr.msk.mxu1 %vm712_vm5, %v1556_v24 }
 0x78b   : > { %v2364_v25 = vpop.eup %2363 }
 0x78c   : > { %v1546_v26 = vsel %vm681_vm3, %v2364_v25, 0.0  ;;  %v2366_v27 = vpop.eup %2365 }
 0x78d   : > { %1547 = vadd.xlane.f32.xlu1 %v1546_v26  ;;  %v1551_v31 = vmul.f32 %v2366_v27, %v2358_v11  ;;  %v2097_v11 = vld [vmem:[%s2743_s7] ss:$0 sm:$0xff]  ;;  %v1791_v27 = vld [vmem:[%s2747_s11 + $0x38] sm:$0xff] }
 0x78e   : > { %v1792_v26 = vld [vmem:[%s2747_s11 + $0x40] sm:$0xff] }
 0x79e   : > { %1553 = vrot.lane.b32.xlu1 %v2519_v38, %s2395_s14 }
 0x816   : > { %v2243_v28 = vpop.f32.mrf.mxu1  ;;  %v1548_v29 = vpop.xlane.xlu1 %1547 }
 0x817   : > { %2367 = vrcp.f32 %v1548_v29  ;;  %v1789_v29 = vld [vmem:[%s2747_s11 + $0x28] sm:$0xff] }
 0x818   : > { %v1347_v30 = vpop.f32.mrf.mxu1 }
 0x819   : > { %2246 = vmatprep.mubr.msk.f32.mxu1 %vm591_vm2, %v1347_v30  ;;  %v1788_v30 = vld [vmem:[%s2747_s11 + $0x20] sm:$0xff] }
 0x81a   : > { %2247 = vmatmul.mubr.msk.f32.vlgmr.msra.gmra.mxu1 %vm591_vm2, %v2243_v28  ;;  %v1554_v32 = vpop.permute.xlu1 %1553  ;;  %v1790_v28 = vld [vmem:[%s2747_s11 + $0x30] sm:$0xff] }
 0x81b   : > { %2257 = vmatpush3.msk.msra.mxu1 %vm712_vm5, %v1556_v24  ;;  %2260 = vmatprep.mubr.msk.f32.mxu1 %vm677_vm4, %v1551_v31  ;;  %v1794_v24 = vld [vmem:[%s2747_s11 + $0x50] sm:$0xff]  ;;  %v1787_v31 = vld [vmem:[%s2747_s11 + $0x18] sm:$0xff] }
 0x81c   : > { %2258 = vmatprep.subr.mxu1 %v1554_v32 }
 0x81d   : > { %2259 = vmatpush3.msra.mxu1 %v1554_v32  ;;  %v1786_v32 = vld [vmem:[%s2747_s11 + $0x10] sm:$0xff] }
 0x81e   : > { %2263 = vmatprep.subr.mxu1 %v1641_v34 }
 0x824   : > { %v2368_v33 = vpop.eup %2367 }
 0x825   : > { %v1552_v38 = vmul.f32 %v2368_v33, %v2364_v25  ;;  %v1793_v25 = vld [vmem:[%s2747_s11 + $0x48] sm:$0xff] }
 0x826   : > { %v1785_v33 = vld [vmem:[%s2747_s11 + $0x8] sm:$0xff] }
 0x827   : > { %2261 = vmatmul.mubr.msk.f32.vlgmr.msra.gmra.mxu1 %vm677_vm4, %v1552_v38  ;;  %v1784_v38 = vld [vmem:[%s2747_s11] sm:$0xff] }
 0x828   : > { %2264 = vmatpush3.msra.mxu1 %v1641_v34  ;;  %v2099_v34 = vld [vmem:[%s2746_s10] ss:$0 sm:$0xff] }
 0x829   : > { %2279 = vmatprep.subr.mxu1 %v1799_v36 }
 0x8da   : > { %v2248_v35 = vpop.f32.mrf.mxu1 }
 0x8db   : > { %v1439_v37 = vadd.f32 %v2248_v35, %v2597_v48 }
 0x8dc   : > { %v1429_v39 = vpop.f32.mrf.mxu1 }
 0x8dd   : > { %v1438_v40 = vadd.f32 %v1429_v39, %v2599_v50 }
 0x8e7   : > { %v2262_v41 = vpop.f32.mrf.mxu1 }
 0x8e9   : > { %v1632_v42 = vpop.f32.mrf.mxu1 }
 0x8ea   : > { %2265 = vmatprep.mubr.msk.f32.mxu1 %vm591_vm2, %v1632_v42 }
 0x8eb   : > { %2266 = vmatmul.mubr.msk.f32.vlgmr.msra.gmra.mxu1 %vm591_vm2, %v2262_v41 }
 0x8ec   : > { %2280 = vmatpush3.msra.mxu1 %v1799_v36 }
 0x8ed   : > { %2281 = vmatprep.subr.mxu1 %v1798_v20 }
 0x8ee   : > { %2282 = vmatpush3.msra.mxu1 %v1798_v20 }
 0x8ef   : > { %2283 = vmatprep.subr.mxu1 %v1797_v21 }
 0x8f0   : > { %2284 = vmatpush3.msra.mxu1 %v1797_v21 }
 0x8f1   : > { %2285 = vmatprep.subr.mxu1 %v1796_v22 }
 0x8f2   : > { %2286 = vmatpush3.msra.mxu1 %v1796_v22 }
 0x8f3   : > { %2287 = vmatprep.subr.mxu1 %v1795_v23 }
 0x8f4   : > { %2288 = vmatpush3.msra.mxu1 %v1795_v23 }
 0x8f5   : > { %2289 = vmatprep.subr.mxu1 %v1794_v24 }
 0x8f6   : > { %2290 = vmatpush3.msra.mxu1 %v1794_v24 }
 0x8f7   : > { %2291 = vmatprep.subr.mxu1 %v1793_v25 }
 0x8f8   : > { %2292 = vmatpush3.msra.mxu1 %v1793_v25 }
 0x8f9   : > { %2293 = vmatprep.subr.mxu1 %v1792_v26 }
 0x8fa   : > { %2294 = vmatpush3.msra.mxu1 %v1792_v26 }
 0x8fb   : > { %2295 = vmatprep.subr.mxu1 %v1791_v27 }
 0x8fc   : > { %2296 = vmatpush3.msra.mxu1 %v1791_v27 }
 0x8fd   : > { %2297 = vmatprep.subr.mxu1 %v1790_v28 }
 0x8fe   : > { %2298 = vmatpush3.msra.mxu1 %v1790_v28 }
 0x8ff   : > { %2299 = vmatprep.subr.mxu1 %v1789_v29 }
 0x900   : > { %2300 = vmatpush3.msra.mxu1 %v1789_v29 }
 0x901   : > { %2301 = vmatprep.subr.mxu1 %v1788_v30 }
 0x902   : > { %2302 = vmatpush3.msra.mxu1 %v1788_v30 }
 0x903   : > { %2303 = vmatprep.subr.mxu1 %v1787_v31 }
 0x904   : > { %2304 = vmatpush3.msra.mxu1 %v1787_v31 }
 0x905   : > { %2305 = vmatprep.subr.mxu1 %v1786_v32 }
 0x906   : > { %2306 = vmatpush3.msra.mxu1 %v1786_v32 }
 0x907   : > { %2307 = vmatprep.subr.mxu1 %v1785_v33 }
 0x908   : > { %2308 = vmatpush3.msra.mxu1 %v1785_v33 }
 0x909   : > { %2309 = vmatprep.subr.mxu1 %v1784_v38 }
 0x90a   : > { %2310 = vmatpush3.msra.mxu1 %v1784_v38 }
 0x9ab   : > { %v2267_v44 = vpop.f32.mrf.mxu1 }
 0x9ac   : > { %v1724_v45 = vadd.f32 %v2267_v44, %v1439_v37 }
 0x9ad   : > { %v1714_v46 = vpop.f32.mrf.mxu1 }
 0x9ae   : > { %v1732_v47 = vadd.f32 %v2096_v43, %v1724_v45  ;;  %v1723_v49 = vadd.f32 %v1714_v46, %v1438_v40 }
 0x9b0   : > { %v2637_v48 = vadd.f32 %v1732_v47, %v2484_v1  ;;  %v1731_v51 = vadd.f32 %v2096_v43, %v1723_v49 }
 0x9b2   : > { %v2640_v50 = vadd.f32 %v1731_v51, %v2482_v0  ;;  %v1740_v52 = vsel %vm449_vm1, %v2637_v48, 0.0 }
 0x9b3   : > { %1741 = vadd.xlane.f32.xlu0 %v1740_v52 }
 0x9b4   : > { %v1737_v53 = vsel %vm445_vm0, %v2640_v50, 0.0 }
 0x9b5   : > { %1738 = vadd.xlane.f32.xlu1 %v1737_v53 }
 0xa3c   : > { %v1742_v54 = vpop.xlane.xlu0 %1741 }
 0xa3d   : > { %v1744_v55 = vmul.f32 0.03125, %v1742_v54 }
 0xa3e   : > { %v1739_v56 = vpop.xlane.xlu1 %1738 }
 0xa3f   : > { %v1746_v57 = vsub.f32 %v2637_v48, %v1744_v55  ;;  %v1743_v58 = vmul.f32 0.03125, %v1739_v56 }
 0xa41   : > { %v1745_v1 = vsub.f32 %v2640_v50, %v1743_v58  ;;  %v1748_v59 = vmul.f32 %v1746_v57, %v1746_v57 }
 0xa43   : > { %v1752_v0 = vsel %vm449_vm1, %v1748_v59, 0.0  ;;  %v1747_v60 = vmul.f32 %v1745_v1, %v1745_v1 }
 0xa44   : > { %1753 = vadd.xlane.f32.xlu1 %v1752_v0  ;;  %v2102_v0 = vld [vmem:[%s2748_s12] ss:$0 sm:$0xff] }
 0xa45   : > { %v1749_v61 = vsel %vm445_vm0, %v1747_v60, 0.0 }
 0xa46   : > { %1750 = vadd.xlane.f32.xlu0 %v1749_v61 }
 0xacd   : > { %v1754_v4 = vpop.xlane.xlu1 %1753 }
 0xace   : > { %v1756_v5 = vmul.f32 0.03125, %v1754_v4 }
 0xacf   : > { %v1751_v6 = vpop.xlane.xlu0 %1750 }
 0xad0   : > { %v1758_v7 = vadd.f32 1e-05, %v1756_v5  ;;  %v1755_v8 = vmul.f32 0.03125, %v1751_v6 }
 0xad2   : > { %2369 = vrsqrt.f32 %v1758_v7  ;;  %v1757_v9 = vadd.f32 1e-05, %v1755_v8 }
 0xad4   : > { %2371 = vrsqrt.f32 %v1757_v9 }
 0xadf   : > { %v2370_v10 = vpop.eup %2369 }
 0xae0   : > { %v1762_v12 = vmul.f32 %v2370_v10, %v1746_v57 }
 0xae1   : > { %v2372_v13 = vpop.eup %2371 }
 0xae2   : > { %v1761_v14 = vmul.f32 %v2372_v13, %v1745_v1  ;;  %v1770_v15 = vmul.f32 %v2097_v11, %v1762_v12 }
 0xae4   : > { %v1769_v17 = vmul.f32 %v2097_v11, %v1761_v14  ;;  %v1778_v19 = vadd.f32 %v2098_v16, %v1770_v15 }
 0xae6   : > { %v1777_v18 = vadd.f32 %v2098_v16, %v1769_v17 }
 0xae8   : > { %2276 = vmatprep.mubr.msk.f32.mxu0 %vm445_vm0, %v1777_v18 }
 0xae9   : > { %2277 = vmatmul.mubr.msk.f32.vlgmr.msra.gmra.mxu0 %vm445_vm0, %v1778_v19 }
 0xba9   : > { %v2278_v35 = vpop.f32.mrf.mxu0 }
 0xbaa   : > { %v1885_v37 = vadd.f32 %v2278_v35, %v2099_v34 }
 0xbab   : > { %v1879_v39 = vpop.f32.mrf.mxu0 }
 0xbac   : > { %v1889_v40 = vmul.f32 %v1885_v37, %v1885_v37  ;;  %v1880_v41 = vadd.f32 %v2099_v34, %v1879_v39 }
 0xbae   : > { %v1891_v42 = vmul.f32 %v1889_v40, %v1885_v37  ;;  %v1888_v43 = vmul.f32 %v1880_v41, %v1880_v41 }
 0xbb0   : > { %v1893_v44 = vmul.f32 0.044715, %v1891_v42  ;;  %v1890_v45 = vmul.f32 %v1888_v43, %v1880_v41 }
 0xbb2   : > { %v1895_v46 = vadd.f32 %v1893_v44, %v1885_v37  ;;  %v1892_v47 = vmul.f32 0.044715, %v1890_v45 }
 0xbb4   : > { %v1897_v49 = vmul.f32 0.7978846, %v1895_v46  ;;  %v1894_v51 = vadd.f32 %v1892_v47, %v1880_v41 }
 0xbb6   : > { %2373 = vtanh.f32 %v1897_v49  ;;  %v1896_v52 = vmul.f32 0.7978846, %v1894_v51 }
 0xbb8   : > { %2375 = vtanh.f32 %v1896_v52 }
 0xbc3   : > { %v2374_v53 = vpop.eup %2373 }
 0xbc4   : > { %v1901_v54 = vadd.f32 1.0, %v2374_v53 }
 0xbc5   : > { %v2376_v55 = vpop.eup %2375 }
 0xbc6   : > { %v1900_v56 = vadd.f32 1.0, %v2376_v55  ;;  %v1903_v57 = vmul.f32 0.5, %v1901_v54 }
 0xbc8   : > { %v1902_v58 = vmul.f32 0.5, %v1900_v56  ;;  %v1905_v59 = vmul.f32 %v1903_v57, %v1885_v37 }
 0xbca   : > { %v1904_v1 = vmul.f32 %v1902_v58, %v1880_v41 }
 0xbcc   : > { %2311 = vmatprep.mubr.f32.mxu1 %v1904_v1 }
 0xbcd   : > { %2312 = vmatmul.mubr.f32.vlgmr.msra.gmra.mxu1 %v1905_v59 }
 0xc8d   : > { %v2313_v60 = vpop.f32.mrf.mxu1 }
 0xc8e   : > { %v1984_v61 = vadd.f32 %v2313_v60, %v2102_v0 }
 0xc8f   : > { %v1978_v62 = vpop.f32.mrf.mxu1 }
 0xc90   : > { %v1988_v63 = vadd.f32 %v1984_v61, %v2637_v48  ;;  %v1979_v2 = vadd.f32 %v2102_v0, %v1978_v62 }
 0xc92   : > { %1990 = vst.msk [vmem:[%s440_s15 + $0x8] sm:$0x1] %vm449_vm1, %v1988_v63  ;;  %v1987_v3 = vadd.f32 %v1979_v2, %v2640_v50 }
 0xc94   : > { %1989 = vst.msk [vmem:[%s440_s15] sm:$0xff] %vm445_vm0, %v1987_v3 }
 0xc95 PF: > { %s23_s25 = sadd.s32 1, %s2383_s25  }
 0xc96   : > { %p20_p4 = scmp.ge.s32.totalorder %s23_s25, 4  }
 0xc98   :  { %22 = sbr.rel (!%p20_p4) target bundleno = 1 (0x1), region = 102 }

// kernel: constrained_seed_generator_forward.17
= control target key start
LH: loop header
LB: loop body
LE: loop exit
PB: predicated region body
PF: predicated region fallthrough
CT: control target
= control target key end

     0   :  { %vm35_vm0 = vcmask 261120   ;;  %vm146_vm1 = vcmask 130048   ;;  %s386_s1 = inlined_call_operand.vmem [shape: f32[32,16], index: 1, kind: input, shape index: {}]   ;;  %s387_s0 = inlined_call_operand.vmem [shape: f32[32,32], index: 0, kind: input, shape index: {}]   ;;  %s388_s3 = inlined_call_operand.vmem [shape: f32[16,32], index: 3, kind: input, shape index: {}]   ;;  %s389_s2 = inlined_call_operand.vmem [shape: f32[1,16], index: 2, kind: input, shape index: {}]   ;;  %s390_s4 = inlined_call_operand.vmem [shape: f32[1,32], index: 4, kind: input, shape index: {}]   ;;  %s391_s5 = inlined_call_operand.vmem [shape: f32[32,32], index: 5, kind: output, shape index: {}]  }
   0x1   :  { %v27_v0 = vld [vmem:[%s386_s1 + $0x18] sm:$0xff]  ;;  %v26_v1 = vld [vmem:[%s386_s1 + $0x10] sm:$0xff]  ;;  %v20_v2 = vld [vmem:[%s387_s0] sm:$0xff] }
   0x2   :  { %276 = vmatprep.subr.mxu0 %v27_v0  ;;  %v25_v3 = vld [vmem:[%s386_s1 + $0x8] sm:$0xff]  ;;  %284 = vmatprep.mubr.msk.f32.mxu0 %vm35_vm0, %v20_v2  ;;  %v24_v4 = vld [vmem:[%s386_s1] sm:$0xff]  ;;  %v22_v6 = vld [vmem:[%s387_s0 + $0x10] sm:$0xff] }
   0x3   :  { %277 = vmatpush3.msra.mxu0 %v27_v0  ;;  %v21_v5 = vld [vmem:[%s387_s0 + $0x8] sm:$0xff]  ;;  %v23_v7 = vld [vmem:[%s387_s0 + $0x18] sm:$0xff]  ;;  %v137_v9 = vld [vmem:[%s388_s3] sm:$0xff] }
   0x4   :  { %278 = vmatprep.subr.mxu0 %v26_v1  ;;  %v138_v8 = vld [vmem:[%s388_s3 + $0x8] sm:$0xff]  ;;  %v252_v10 = vld [vmem:[%s389_s2] ss:$0 sm:$0xff] }
   0x5   :  { %279 = vmatpush3.msra.mxu0 %v26_v1  ;;  %290 = vmatprep.subr.mxu1 %v138_v8  ;;  %v257_v23 = vld [vmem:[%s390_s4] ss:$0 sm:$0xff] }
   0x6   :  { %280 = vmatprep.subr.mxu0 %v25_v3  ;;  %291 = vmatpush3.msra.mxu1 %v138_v8 }
   0x7   :  { %281 = vmatpush3.msra.mxu0 %v25_v3  ;;  %292 = vmatprep.subr.mxu1 %v137_v9 }
   0x8   :  { %282 = vmatprep.subr.mxu0 %v24_v4  ;;  %293 = vmatpush3.msra.mxu1 %v137_v9 }
   0x9   :  { %283 = vmatpush3.msra.mxu0 %v24_v4 }
   0xa   :  { %285 = vmatmul.mubr.msk.f32.vlgmr.msra.gmra.mxu0 %vm35_vm0, %v21_v5 }
   0xb   :  { %287 = vmatprep.mubr.msk.f32.mxu0 %vm35_vm0, %v22_v6 }
   0xe   :  { %288 = vmatmul.mubr.msk.f32.gmra.mxu0 %vm35_vm0, %v23_v7 }
  0xca   :  { %v286_v11 = vpop.f32.mrf.mxu0 }
  0xcb   :  { %v120_v12 = vadd.f32 %v286_v11, %v252_v10 }
  0xcc   :  { %v114_v13 = vpop.f32.mrf.mxu0 }
  0xcd   :  { %v115_v14 = vadd.f32 %v252_v10, %v114_v13  ;;  %v134_v17 = vmax.f32 %v120_v12, 0.0 }
  0xce   :  { %v289_v15 = vpop.f32.mrf.mxu0 }
  0xcf   :  { %v133_v16 = vmax.f32 %v115_v14, 0.0  ;;  %v130_v18 = vadd.f32 %v289_v15, %v252_v10 }
  0xd0   :  { %v124_v19 = vpop.f32.mrf.mxu0 }
  0xd1   :  { %v125_v20 = vadd.f32 %v252_v10, %v124_v19  ;;  %294 = vmatprep.mubr.msk.f32.mxu1 %vm146_vm1, %v133_v16  ;;  %v136_v22 = vmax.f32 %v130_v18, 0.0 }
  0xd2   :  { %295 = vmatmul.mubr.msk.f32.vlgmr.msra.gmra.mxu1 %vm146_vm1, %v134_v17 }
  0xd3   :  { %v135_v21 = vmax.f32 %v125_v20, 0.0 }
  0xd5   :  { %297 = vmatprep.mubr.msk.f32.mxu1 %vm146_vm1, %v135_v21 }
  0xd6   :  { %298 = vmatmul.mubr.msk.f32.gmra.mxu1 %vm146_vm1, %v136_v22 }
 0x192   :  { %v296_v24 = vpop.f32.mrf.mxu1 }
 0x193   :  { %v231_v25 = vadd.f32 %v296_v24, %v257_v23 }
 0x194   :  { %v225_v26 = vpop.f32.mrf.mxu1 }
 0x195   :  { %245 = vst.msk [vmem:[%s391_s5 + $0x8] sm:$0xff] %vm35_vm0, %v231_v25  ;;  %v226_v27 = vadd.f32 %v257_v23, %v225_v26 }
 0x196   :  { %v299_v28 = vpop.f32.mrf.mxu1 }
 0x197   :  { %244 = vst.msk [vmem:[%s391_s5] sm:$0xff] %vm35_vm0, %v226_v27  ;;  %v241_v29 = vadd.f32 %v299_v28, %v257_v23 }
 0x198   :  { %v235_v30 = vpop.f32.mrf.mxu1 }
 0x199   :  { %247 = vst.msk [vmem:[%s391_s5 + $0x18] sm:$0xff] %vm35_vm0, %v241_v29  ;;  %v236_v31 = vadd.f32 %v257_v23, %v235_v30 }
 0x19b   :  { %246 = vst.msk [vmem:[%s391_s5 + $0x10] sm:$0xff] %vm35_vm0, %v236_v31 }

// kernel: constrained_seed_generator_forward.15
= control target key start
LH: loop header
LB: loop body
LE: loop exit
PB: predicated region body
PF: predicated region fallthrough
CT: control target
= control target key end

     0   :  { %s2128_s25 = smov 0   ;;  %s2387_s0 = inlined_call_operand.vmem [shape: f32[2,8,32], index: 0, kind: input, shape index: {}]   ;;  %s2388_s1 = inlined_call_operand.vmem [shape: f32[1,32], index: 1, kind: input, shape index: {}]   ;;  %s2389_s2 = inlined_call_operand.vmem [shape: f32[1,32], index: 2, kind: input, shape index: {}]   ;;  %s2390_s3 = inlined_call_operand.vmem [shape: f32[32,96], index: 3, kind: input, shape index: {}]   ;;  %s2391_s4 = inlined_call_operand.vmem [shape: f32[1,96], index: 4, kind: input, shape index: {}]   ;;  %s2392_s5 = inlined_call_operand.vmem [shape: f32[32,32], index: 5, kind: input, shape index: {}]   ;;  %s2393_s6 = inlined_call_operand.vmem [shape: f32[1,32], index: 6, kind: input, shape index: {}]   ;;  %s2394_s7 = inlined_call_operand.vmem [shape: f32[1,32], index: 7, kind: input, shape index: {}]   ;;  %s2395_s8 = inlined_call_operand.vmem [shape: f32[1,32], index: 8, kind: input, shape index: {}]   ;;  %s2396_s9 = inlined_call_operand.vmem [shape: f32[32,128], index: 9, kind: input, shape index: {}]   ;;  %s2397_s10 = inlined_call_operand.vmem [shape: f32[1,128], index: 10, kind: input, shape index: {}]   ;;  %s2398_s11 = inlined_call_operand.vmem [shape: f32[128,32], index: 11, kind: input, shape index: {}]   ;;  %s2399_s12 = inlined_call_operand.vmem [shape: f32[1,32], index: 12, kind: input, shape index: {}]   ;;  %s2400_s13 = inlined_call_operand.vmem [shape: f32[2,8,32], index: 13, kind: output, shape index: {}]  }
   0x1 LB: > { %s1791_s26 = sadd.s32 4294967295, %s2043_s25   ;;  %p1795_p0 = scmp.ge.s32.totalorder %s2043_s25, 1  ;;  %s2043_s25 = sphi %s2128_s25, %s23_s25  }
   0x2   : > { %p386_p1 = scmp.lt.s32.totalorder %s2043_s25, 3 }
   0x4   : > { %p387_p2 = pnand %p1795_p0, %p386_p1 }
   0x5   : > { %p428_p3 = scmp.lt.s32.totalorder (!%p387_p2), %s1791_s26, 1  ;;  %s2047_s14 = smov (!%p387_p2), 64  }
   0x6   : > { %390 = sbr.rel (%p387_p2) target bundleno = 3984 (0xf90), region = 72  ;;  %s2048_s15 = smov (!%p387_p2), 96  }
   0x7   : > { %s2049_s16 = smov (!%p387_p2), 88   ;;  %s2050_s17 = smov (!%p387_p2), 120  }
   0x8   : > { %s2051_s20 = smov (!%p387_p2), 56   ;;  %s2052_s21 = smov (!%p387_p2), 80  }
   0x9   : > { %s2053_s22 = smov (!%p387_p2), 112   ;;  %s2054_s23 = smov (!%p387_p2), 48  }
   0xa   : > { %s2055_s29 = smov (!%p387_p2), 72  }
   0xb   : > { %s2402_s26 = smov (!%p428_p3, %s1791_s26), 1  ;;  %vm439_vm0 = vcmask 261120   ;;  %v471_v7 = vld [vmem:[%s2390_s3 + $0x18] sm:$0xff]  ;;  %v2045_v8 = vmov 0.0   ;;  %v470_v9 = vld [vmem:[%s2390_s3 + $0x10] sm:$0xff]  ;;  %vm2046_vm1 = vmmov 0  }
   0xc   : > { %s1796_s27 = sshll.u32 %s2402_s26, 3  ;;  %1877 = vmatprep.subr.mxu0 %v2045_v8  ;;  %1885 = vmatprep.mubr.msk.f32.mxu0 %vm2046_vm1, %v2045_v8  ;;  %v469_v10 = vld [vmem:[%s2390_s3 + $0x8] sm:$0xff]  ;;  %v468_v11 = vld [vmem:[%s2390_s3] sm:$0xff]  ;;  %vm557_vm2 = vcmask 64512  }
   0xd   : > { %s431_s30 = scalar_lea.vmem %s2387_s0, %s1796_s27  ;;  %1878 = vmatpush3.msra.mxu0 %v471_v7  ;;  %1913 = vmatprep.subr.mxu1 %v2045_v8  ;;  %v1798_v16 = vld [vmem:[%s2388_s1] ss:$0 sm:$0xff]  ;;  %v886_v59 = vld [vmem:[%s2392_s5 + $0x8] sm:$0xff] }
   0xe   : > { %v2144_v0 = vld [vmem:[%s431_s30] sm:$0xff]  ;;  %1879 = vmatprep.subr.mxu0 %v2045_v8  ;;  %1915 = vmatprep.mubr.msk.f32.mxu1 %vm2046_vm1, %v2045_v8  ;;  %s2056_s30 = smov 104  }
   0xf   : > { %v440_v1 = vsel %vm439_vm0, %v2144_v0, 0.0  ;;  %1880 = vmatpush3.msra.mxu0 %v470_v9  ;;  %v1799_v18 = vld [vmem:[%s2389_s2] ss:$0 sm:$0xff] }
  0x10   : > { %441 = vadd.xlane.f32.xlu0 %v440_v1  ;;  %1881 = vmatprep.subr.mxu0 %v2045_v8  ;;  %v1800_v21 = vld [vmem:[%s2391_s4] ss:$0 sm:$0xff] }
  0x11   : > { %1882 = vmatpush3.msra.mxu0 %v469_v10  ;;  %v720_v41 = vld [vmem:[%s2392_s5] sm:$0xff] }
  0x12   : > { %1883 = vmatprep.subr.mxu0 %v2045_v8  ;;  %1914 = vmatpush3.msra.mxu1 %v720_v41 }
  0x13   : > { %1884 = vmatpush3.msra.mxu0 %v468_v11  ;;  %1923 = vmatprep.subr.mxu1 %v2045_v8 }
  0x14   : > { %1888 = vmatprep.subr.mxu0 %v2045_v8 }
  0x99   : > { %v442_v2 = vpop.xlane.xlu0 %441 }
  0x9a   : > { %v444_v3 = vmul.f32 0.03125, %v442_v2 }
  0x9c   : > { %v445_v4 = vsub.f32 %v2144_v0, %v444_v3 }
  0x9e   : > { %v446_v5 = vmul.f32 %v445_v4, %v445_v4 }
  0xa0   : > { %v447_v6 = vsel %vm439_vm0, %v446_v5, 0.0 }
  0xa1   : > { %448 = vadd.xlane.f32.xlu0 %v447_v6 }
 0x12a   : > { %v449_v12 = vpop.xlane.xlu0 %448 }
 0x12b   : > { %v450_v13 = vmul.f32 0.03125, %v449_v12 }
 0x12d   : > { %v451_v14 = vadd.f32 1e-05, %v450_v13 }
 0x12f   : > { %2015 = vrsqrt.f32 %v451_v14 }
 0x13c   : > { %v2016_v15 = vpop.eup %2015 }
 0x13d   : > { %v453_v17 = vmul.f32 %v2016_v15, %v445_v4 }
 0x13f   : > { %v460_v19 = vmul.f32 %v1798_v16, %v453_v17  ;;  %v1198_v17 = vld [vmem:[%s2392_s5 + $0x10] sm:$0xff] }
 0x141   : > { %v467_v20 = vadd.f32 %v1799_v18, %v460_v19 }
 0x143   : > { %1886 = vmatmul.mubr.msk.f32.vlgmr.msra.gmra.mxu0 %vm439_vm0, %v467_v20 }
 0x144   : > { %1890 = vmatprep.mubr.msk.f32.mxu0 %vm2046_vm1, %v2045_v8 }
 0x203   : > { %v548_v22 = vpop.f32.mrf.mxu0 }
 0x204   : > { %v2184_v23 = vadd.f32 %v1800_v21, %v548_v22 }
 0x205   : > { %v1887_v24 = vpop.f32.mrf.mxu0 }
 0x206   : > { %644 = vrot.lane.b32.xlu0 %v2184_v23, %s2047_s14  ;;  %555 = vrot.lane.b32.xlu1 %v2184_v23, %s2048_s15  ;;  %v2190_v26 = vmul.f32 0.35355338, %v2184_v23  ;;  %s435_s15 = scalar_lea.vmem %s2400_s13, %s1796_s27 }
 0x278   : > { %v556_v25 = vpop.permute.xlu1 %555  ;;  %v645_v27 = vpop.permute.xlu0 %644 }
 0x279   : > { %1889 = vmatpush3.xpose.msk.msra.mxu0 %vm557_vm2, %v556_v25 }
 0x27a   : > { %1893 = vmatprep.subr.mxu0 %v2045_v8 }
 0x27c   : > { %1891 = vmatmul.mubr.msk.f32.vlgmr.msra.gmra.mxu0 %vm557_vm2, %v2190_v26 }
 0x27d   : > { %1894 = vmatpush3.msra.mxu0 %v645_v27  ;;  %1895 = vmatprep.mubr.msk.f32.mxu0 %vm2046_vm1, %v2045_v8 }
 0x27e   : > { %1898 = vmatprep.subr.mxu0 %v2045_v8 }
 0x33c   : > { %v629_v28 = vpop.f32.mrf.mxu0 }
 0x33d   : > { %v633_v29 = vsel %vm557_vm2, %v629_v28, -inf }
 0x33e   : > { %634 = vmax.xlane.f32.xlu1 %v633_v29  ;;  %v1892_v30 = vpop.f32.mrf.mxu0 }
 0x33f   : > { %v1438_v30 = vld [vmem:[%s2392_s5 + $0x18] sm:$0xff] }
 0x3c7   : > { %v635_v31 = vpop.xlane.xlu1 %634 }
 0x3c8   : > { %v636_v32 = vsub.f32 %v629_v28, %v635_v31 }
 0x3ca   : > { %v637_v33 = vmul.f32 1.442695, %v636_v32 }
 0x3cc   : > { %2017 = vpow2.f32 %v637_v33 }
 0x3d9   : > { %v2018_v34 = vpop.eup %2017 }
 0x3da   : > { %v639_v35 = vsel %vm557_vm2, %v2018_v34, 0.0 }
 0x3db   : > { %640 = vadd.xlane.f32.xlu0 %v639_v35 }
 0x3f1   : > { %723 = vrot.lane.b32.xlu0 %v2184_v23, %s2049_s16  ;;  %s2057_s16 = smov 40  }
 0x3f5   : > { %721 = vrot.lane.b32.xlu0 %v2190_v26, %s2050_s17 }
 0x464   : > { %v641_v36 = vpop.xlane.xlu0 %640 }
 0x465   : > { %2019 = vrcp.f32 %v641_v36 }
 0x468   : > { %v724_v38 = vpop.permute.xlu0 %723 }
 0x46c   : > { %v722_v40 = vpop.permute.xlu0 %721 }
 0x472   : > { %v2020_v37 = vpop.eup %2019 }
 0x473   : > { %v643_v39 = vmul.f32 %v2020_v37, %v2018_v34 }
 0x475   : > { %1896 = vmatmul.mubr.msk.f32.vlgmr.msra.gmra.mxu0 %vm557_vm2, %v643_v39  ;;  %v1818_v39 = vld [vmem:[%s2393_s6] ss:$0 sm:$0xff] }
 0x476   : > { %1899 = vmatpush3.xpose.msk.msra.mxu0 %vm557_vm2, %v724_v38  ;;  %1900 = vmatprep.mubr.msk.f32.mxu0 %vm2046_vm1, %v2045_v8 }
 0x477   : > { %1903 = vmatprep.subr.mxu0 %v2045_v8 }
 0x479   : > { %1901 = vmatmul.mubr.msk.f32.vlgmr.msra.gmra.mxu0 %vm557_vm2, %v722_v40 }
 0x47a   : > { %1905 = vmatprep.mubr.msk.f32.mxu0 %vm2046_vm1, %v2045_v8 }
 0x535   : > { %v716_v42 = vpop.f32.mrf.mxu0 }
 0x536   : > { %1916 = vmatmul.mubr.msk.f32.vlgmr.msra.gmra.mxu1 %vm557_vm2, %v716_v42 }
 0x537   : > { %v1897_v43 = vpop.f32.mrf.mxu0  ;;  %1925 = vmatprep.mubr.msk.f32.mxu1 %vm2046_vm1, %v2045_v8 }
 0x539   : > { %v795_v44 = vpop.f32.mrf.mxu0 }
 0x53a   : > { %v799_v45 = vsel %vm557_vm2, %v795_v44, -inf }
 0x53b   : > { %800 = vmax.xlane.f32.xlu1 %v799_v45  ;;  %v1902_v46 = vpop.f32.mrf.mxu0 }
 0x54c   : > { %810 = vrot.lane.b32.xlu1 %v2184_v23, %s2051_s20 }
 0x550   : > { %1035 = vrot.lane.b32.xlu1 %v2184_v23, %s2052_s21 }
 0x554   : > { %1033 = vrot.lane.b32.xlu1 %v2190_v26, %s2053_s22 }
 0x5c4   : > { %v801_v47 = vpop.xlane.xlu1 %800 }
 0x5c5   : > { %v802_v48 = vsub.f32 %v795_v44, %v801_v47 }
 0x5c7   : > { %v803_v49 = vmul.f32 1.442695, %v802_v48 }
 0x5c8   : > { %v811_v50 = vpop.permute.xlu1 %810 }
 0x5c9   : > { %2021 = vpow2.f32 %v803_v49  ;;  %1904 = vmatpush3.msra.mxu0 %v811_v50 }
 0x5ca   : > { %1908 = vmatprep.subr.mxu0 %v2045_v8 }
 0x5cc   : > { %v1036_v60 = vpop.permute.xlu1 %1035 }
 0x5d0   : > { %v1034_v63 = vpop.permute.xlu1 %1033 }
 0x5d6   : > { %v2022_v51 = vpop.eup %2021 }
 0x5d7   : > { %v805_v52 = vsel %vm557_vm2, %v2022_v51, 0.0 }
 0x5d8   : > { %806 = vadd.xlane.f32.xlu0 %v805_v52  ;;  %v1551_v52 = vld [vmem:[%s2396_s9 + $0x8] sm:$0xff] }
 0x5ee   : > { %1122 = vrot.lane.b32.xlu0 %v2184_v23, %s2054_s23 }
 0x5f6   : > { %v2224_v53 = vpop.f32.mrf.mxu1 }
 0x5f8   : > { %v1917_v54 = vpop.f32.mrf.mxu1 }
 0x661   : > { %v807_v55 = vpop.xlane.xlu0 %806 }
 0x662   : > { %2023 = vrcp.f32 %v807_v55 }
 0x665   : > { %v1123_v56 = vpop.permute.xlu0 %1122 }
 0x666   : > { %1924 = vmatpush3.msra.mxu1 %v1123_v56 }
 0x667   : > { %1933 = vmatprep.subr.mxu1 %v2045_v8 }
 0x66f   : > { %v2024_v57 = vpop.eup %2023 }
 0x670   : > { %v809_v58 = vmul.f32 %v2024_v57, %v2022_v51  ;;  %v1553_v51 = vld [vmem:[%s2396_s9 + $0x18] sm:$0xff] }
 0x672   : > { %1906 = vmatmul.mubr.msk.f32.vlgmr.msra.gmra.mxu0 %vm557_vm2, %v809_v58  ;;  %v1819_v58 = vld [vmem:[%s2394_s7] ss:$0 sm:$0xff] }
 0x673   : > { %1909 = vmatpush3.msra.mxu0 %v886_v59  ;;  %1910 = vmatprep.mubr.msk.f32.mxu0 %vm2046_vm1, %v2045_v8 }
 0x674   : > { %1918 = vmatprep.subr.mxu0 %v2045_v8 }
 0x732   : > { %v882_v61 = vpop.f32.mrf.mxu0 }
 0x733   : > { %1911 = vmatmul.mubr.msk.f32.vlgmr.msra.gmra.mxu0 %vm557_vm2, %v882_v61 }
 0x734   : > { %1919 = vmatpush3.xpose.msk.msra.mxu0 %vm557_vm2, %v1036_v60  ;;  %v1907_v62 = vpop.f32.mrf.mxu0  ;;  %1920 = vmatprep.mubr.msk.f32.mxu0 %vm2046_vm1, %v2045_v8  ;;  %v1820_v60 = vld [vmem:[%s2395_s8] ss:$0 sm:$0xff] }
 0x735   : > { %1928 = vmatprep.subr.mxu0 %v2045_v8 }
 0x737   : > { %1921 = vmatmul.mubr.msk.f32.vlgmr.msra.gmra.mxu0 %vm557_vm2, %v1034_v63  ;;  %v1570_v63 = vld [vmem:[%s2398_s11 + $0x78] sm:$0xff] }
 0x738   : > { %1930 = vmatprep.mubr.msk.f32.mxu0 %vm2046_vm1, %v2045_v8  ;;  %1929 = vmatpush3.msra.mxu0 %v1198_v17  ;;  %v1821_v17 = vld [vmem:[%s2397_s10] ss:$0 sm:$0xff] }
 0x739   : > { %1938 = vmatprep.subr.mxu0 %v2045_v8 }
 0x7f3   : > { %v956_v1 = vpop.f32.mrf.mxu0 }
 0x7f5   : > { %v1912_v2 = vpop.f32.mrf.mxu0 }
 0x7f6   : > { %v1568_v2 = vld [vmem:[%s2398_s11 + $0x68] sm:$0xff] }
 0x7f7   : > { %v1107_v3 = vpop.f32.mrf.mxu0 }
 0x7f8   : > { %v1111_v4 = vsel %vm557_vm2, %v1107_v3, -inf }
 0x7f9   : > { %1112 = vmax.xlane.f32.xlu1 %v1111_v4  ;;  %v1922_v5 = vpop.f32.mrf.mxu0  ;;  %v1566_v4 = vld [vmem:[%s2398_s11 + $0x58] sm:$0xff] }
 0x7fa   : > { %v1565_v5 = vld [vmem:[%s2398_s11 + $0x50] sm:$0xff] }
 0x882   : > { %v1113_v6 = vpop.xlane.xlu1 %1112 }
 0x883   : > { %v1114_v7 = vsub.f32 %v1107_v3, %v1113_v6  ;;  %v1567_v3 = vld [vmem:[%s2398_s11 + $0x60] sm:$0xff]  ;;  %v1564_v6 = vld [vmem:[%s2398_s11 + $0x48] sm:$0xff] }
 0x885   : > { %v1115_v9 = vmul.f32 1.442695, %v1114_v7  ;;  %v1563_v7 = vld [vmem:[%s2398_s11 + $0x40] sm:$0xff] }
 0x887   : > { %2025 = vpow2.f32 %v1115_v9  ;;  %v1562_v9 = vld [vmem:[%s2398_s11 + $0x38] sm:$0xff] }
 0x894   : > { %v2026_v10 = vpop.eup %2025 }
 0x895   : > { %v1117_v11 = vsel %vm557_vm2, %v2026_v10, 0.0 }
 0x896   : > { %1118 = vadd.xlane.f32.xlu0 %v1117_v11  ;;  %v1560_v11 = vld [vmem:[%s2398_s11 + $0x28] sm:$0xff] }
 0x8ac   : > { %1275 = vrot.lane.b32.xlu0 %v2184_v23, %s2055_s29 }
 0x8b0   : > { %1273 = vrot.lane.b32.xlu0 %v2190_v26, %s2056_s30 }
 0x91f   : > { %v1119_v12 = vpop.xlane.xlu0 %1118 }
 0x920   : > { %2027 = vrcp.f32 %v1119_v12  ;;  %v1559_v12 = vld [vmem:[%s2398_s11 + $0x20] sm:$0xff] }
 0x923   : > { %v1276_v14 = vpop.permute.xlu0 %1275 }
 0x927   : > { %v1274_v16 = vpop.permute.xlu0 %1273 }
 0x92d   : > { %v2028_v13 = vpop.eup %2027 }
 0x92e   : > { %v1121_v15 = vmul.f32 %v2028_v13, %v2026_v10  ;;  %v1561_v10 = vld [vmem:[%s2398_s11 + $0x30] sm:$0xff]  ;;  %v1558_v13 = vld [vmem:[%s2398_s11 + $0x18] sm:$0xff] }
 0x930   : > { %1926 = vmatmul.mubr.msk.f32.vlgmr.msra.gmra.mxu1 %vm557_vm2, %v1121_v15  ;;  %v1556_v15 = vld [vmem:[%s2398_s11 + $0x8] sm:$0xff] }
 0x931   : > { %1934 = vmatpush3.xpose.msk.msra.mxu1 %vm557_vm2, %v1276_v14  ;;  %1935 = vmatprep.mubr.msk.f32.mxu1 %vm2046_vm1, %v2045_v8  ;;  %v1557_v14 = vld [vmem:[%s2398_s11 + $0x10] sm:$0xff] }
 0x932   : > { %1943 = vmatprep.subr.mxu1 %v2045_v8 }
 0x934   : > { %1936 = vmatmul.mubr.msk.f32.vlgmr.msra.gmra.mxu1 %vm557_vm2, %v1274_v16  ;;  %v1555_v16 = vld [vmem:[%s2398_s11] sm:$0xff] }
 0x935   : > { %1945 = vmatprep.mubr.msk.f32.mxu1 %vm2046_vm1, %v2045_v8  ;;  %1944 = vmatpush3.msra.mxu1 %v1438_v30 }
 0x936   : > { %1959 = vmatprep.subr.mxu1 %v2045_v8 }
 0x9f0   : > { %v1194_v18 = vpop.f32.mrf.mxu1 }
 0x9f1   : > { %1931 = vmatmul.mubr.msk.f32.vlgmr.msra.gmra.mxu0 %vm557_vm2, %v1194_v18 }
 0x9f2   : > { %v1927_v19 = vpop.f32.mrf.mxu1  ;;  %1940 = vmatprep.mubr.msk.f32.mxu0 %vm2046_vm1, %v2045_v8 }
 0x9f4   : > { %v1347_v20 = vpop.f32.mrf.mxu1 }
 0x9f5   : > { %v1351_v21 = vsel %vm557_vm2, %v1347_v20, -inf }
 0x9f6   : > { %1352 = vmax.xlane.f32.xlu1 %v1351_v21  ;;  %v1937_v22 = vpop.f32.mrf.mxu1 }
 0xa07   : > { %1362 = vrot.lane.b32.xlu1 %v2184_v23, %s2057_s16  ;;  %v1030_v23 = vadd.f32 %v2224_v53, %v956_v1  ;;  %v1550_v53 = vld [vmem:[%s2396_s9] sm:$0xff]  ;;  %v1569_v1 = vld [vmem:[%s2398_s11 + $0x70] sm:$0xff] }
 0xa7f   : > { %v1353_v24 = vpop.xlane.xlu1 %1352 }
 0xa80   : > { %v1354_v25 = vsub.f32 %v1347_v20, %v1353_v24 }
 0xa82   : > { %v1355_v26 = vmul.f32 1.442695, %v1354_v25 }
 0xa83   : > { %v1363_v27 = vpop.permute.xlu1 %1362 }
 0xa84   : > { %2029 = vpow2.f32 %v1355_v26  ;;  %1939 = vmatpush3.msra.mxu0 %v1363_v27 }
 0xa85   : > { %1948 = vmatprep.subr.mxu0 %v2045_v8 }
 0xa91   : > { %v2030_v28 = vpop.eup %2029 }
 0xa92   : > { %v1357_v29 = vsel %vm557_vm2, %v2030_v28, 0.0 }
 0xa93   : > { %1358 = vadd.xlane.f32.xlu0 %v1357_v29 }
 0xab1   : > { %v1268_v31 = vpop.f32.mrf.mxu0 }
 0xab2   : > { %v1272_v32 = vadd.f32 %v1268_v31, %v1030_v23 }
 0xab3   : > { %v1932_v33 = vpop.f32.mrf.mxu0 }
 0xb1c   : > { %v1359_v34 = vpop.xlane.xlu0 %1358 }
 0xb1d   : > { %2031 = vrcp.f32 %v1359_v34 }
 0xb2a   : > { %v2032_v35 = vpop.eup %2031 }
 0xb2b   : > { %v1361_v36 = vmul.f32 %v2032_v35, %v2030_v28 }
 0xb2d   : > { %1941 = vmatmul.mubr.msk.f32.vlgmr.msra.gmra.mxu0 %vm557_vm2, %v1361_v36 }
 0xb2e   : > { %1956 = vmatprep.mubr.msk.f32.mxu0 %vm2046_vm1, %v2045_v8  ;;  %1949 = vmatpush3.msra.mxu0 %v1553_v51 }
 0xb2f   : > { %1950 = vmatprep.subr.mxu0 %v2045_v8 }
 0xbed   : > { %v1434_v37 = vpop.f32.mrf.mxu0 }
 0xbee   : > { %1946 = vmatmul.mubr.msk.f32.vlgmr.msra.gmra.mxu1 %vm557_vm2, %v1434_v37 }
 0xbef   : > { %v1942_v38 = vpop.f32.mrf.mxu0  ;;  %1991 = vmatprep.mubr.msk.f32.mxu1 %vm2046_vm1, %v2045_v8  ;;  %1960 = vmatpush3.msra.mxu1 %v1570_v63 }
 0xbf0   : > { %1961 = vmatprep.subr.mxu1 %v2045_v8 }
 0xbf1   : > { %1962 = vmatpush3.msra.mxu1 %v1569_v1 }
 0xbf2   : > { %1963 = vmatprep.subr.mxu1 %v2045_v8 }
 0xbf3   : > { %1964 = vmatpush3.msra.mxu1 %v1568_v2 }
 0xbf4   : > { %1965 = vmatprep.subr.mxu1 %v2045_v8 }
 0xbf5   : > { %1966 = vmatpush3.msra.mxu1 %v1567_v3 }
 0xbf6   : > { %1967 = vmatprep.subr.mxu1 %v2045_v8 }
 0xbf7   : > { %1968 = vmatpush3.msra.mxu1 %v1566_v4 }
 0xbf8   : > { %1969 = vmatprep.subr.mxu1 %v2045_v8 }
 0xbf9   : > { %1970 = vmatpush3.msra.mxu1 %v1565_v5 }
 0xbfa   : > { %1971 = vmatprep.subr.mxu1 %v2045_v8 }
 0xbfb   : > { %1972 = vmatpush3.msra.mxu1 %v1564_v6 }
 0xbfc   : > { %1973 = vmatprep.subr.mxu1 %v2045_v8 }
 0xbfd   : > { %1974 = vmatpush3.msra.mxu1 %v1563_v7 }
 0xbfe   : > { %1975 = vmatprep.subr.mxu1 %v2045_v8 }
 0xbff   : > { %1976 = vmatpush3.msra.mxu1 %v1562_v9 }
 0xc00   : > { %1977 = vmatprep.subr.mxu1 %v2045_v8 }
 0xc01   : > { %1978 = vmatpush3.msra.mxu1 %v1561_v10 }
 0xc02   : > { %1979 = vmatprep.subr.mxu1 %v2045_v8 }
 0xc03   : > { %1980 = vmatpush3.msra.mxu1 %v1560_v11 }
 0xc04   : > { %1981 = vmatprep.subr.mxu1 %v2045_v8 }
 0xc05   : > { %1982 = vmatpush3.msra.mxu1 %v1559_v12 }
 0xc06   : > { %1983 = vmatprep.subr.mxu1 %v2045_v8 }
 0xc07   : > { %1984 = vmatpush3.msra.mxu1 %v1558_v13 }
 0xc08   : > { %1985 = vmatprep.subr.mxu1 %v2045_v8 }
 0xc09   : > { %1986 = vmatpush3.msra.mxu1 %v1557_v14 }
 0xc0a   : > { %1987 = vmatprep.subr.mxu1 %v2045_v8 }
 0xc0b   : > { %1988 = vmatpush3.msra.mxu1 %v1556_v15 }
 0xc0c   : > { %1989 = vmatprep.subr.mxu1 %v2045_v8 }
 0xc0d   : > { %1990 = vmatpush3.msra.mxu1 %v1555_v16 }
 0xcae   : > { %v1508_v40 = vpop.f32.mrf.mxu1 }
 0xcaf   : > { %v1512_v41 = vadd.f32 %v1508_v40, %v1272_v32 }
 0xcb0   : > { %v1947_v42 = vpop.f32.mrf.mxu1 }
 0xcb1   : > { %v1519_v43 = vadd.f32 %v1818_v39, %v1512_v41 }
 0xcb3   : > { %v2280_v44 = vadd.f32 %v1519_v43, %v2144_v0  ;;  %v1552_v0 = vld [vmem:[%s2396_s9 + $0x10] sm:$0xff] }
 0xcb4   : > { %1951 = vmatpush3.msra.mxu0 %v1552_v0 }
 0xcb5   : > { %v1523_v45 = vsel %vm439_vm0, %v2280_v44, 0.0  ;;  %1952 = vmatprep.subr.mxu0 %v2045_v8 }
 0xcb6   : > { %1524 = vadd.xlane.f32.xlu1 %v1523_v45  ;;  %1953 = vmatpush3.msra.mxu0 %v1551_v52 }
 0xcb7   : > { %1954 = vmatprep.subr.mxu0 %v2045_v8  ;;  %v1823_v8 = vld [vmem:[%s2399_s12] ss:$0 sm:$0xff] }
 0xcb8   : > { %1955 = vmatpush3.msra.mxu0 %v1550_v53 }
 0xd3f   : > { %v1525_v46 = vpop.xlane.xlu1 %1524 }
 0xd40   : > { %v1526_v47 = vmul.f32 0.03125, %v1525_v46 }
 0xd42   : > { %v1527_v48 = vsub.f32 %v2280_v44, %v1526_v47 }
 0xd44   : > { %v1528_v49 = vmul.f32 %v1527_v48, %v1527_v48 }
 0xd46   : > { %v1529_v50 = vsel %vm439_vm0, %v1528_v49, 0.0 }
 0xd47   : > { %1530 = vadd.xlane.f32.xlu0 %v1529_v50 }
 0xdd0   : > { %v1531_v54 = vpop.xlane.xlu0 %1530 }
 0xdd1   : > { %v1532_v55 = vmul.f32 0.03125, %v1531_v54 }
 0xdd3   : > { %v1533_v56 = vadd.f32 1e-05, %v1532_v55 }
 0xdd5   : > { %2033 = vrsqrt.f32 %v1533_v56 }
 0xde2   : > { %v2034_v57 = vpop.eup %2033 }
 0xde3   : > { %v1535_v59 = vmul.f32 %v2034_v57, %v1527_v48 }
 0xde5   : > { %v1542_v61 = vmul.f32 %v1819_v58, %v1535_v59 }
 0xde7   : > { %v1549_v62 = vadd.f32 %v1820_v60, %v1542_v61 }
 0xde9   : > { %1957 = vmatmul.mubr.msk.f32.vlgmr.msra.gmra.mxu0 %vm439_vm0, %v1549_v62 }
 0xea9   : > { %v1647_v18 = vpop.f32.mrf.mxu0 }
 0xeaa   : > { %v1648_v19 = vadd.f32 %v1821_v17, %v1647_v18 }
 0xeab   : > { %v1958_v20 = vpop.f32.mrf.mxu0 }
 0xeac   : > { %v1651_v21 = vmul.f32 %v1648_v19, %v1648_v19 }
 0xeae   : > { %v1652_v22 = vmul.f32 %v1651_v21, %v1648_v19 }
 0xeb0   : > { %v1653_v24 = vmul.f32 0.044715, %v1652_v22 }
 0xeb2   : > { %v1654_v25 = vadd.f32 %v1653_v24, %v1648_v19 }
 0xeb4   : > { %v1655_v26 = vmul.f32 0.7978846, %v1654_v25 }
 0xeb6   : > { %2035 = vtanh.f32 %v1655_v26 }
 0xec3   : > { %v2036_v27 = vpop.eup %2035 }
 0xec4   : > { %v1657_v28 = vadd.f32 1.0, %v2036_v27 }
 0xec6   : > { %v1658_v29 = vmul.f32 0.5, %v1657_v28 }
 0xec8   : > { %v1659_v30 = vmul.f32 %v1658_v29, %v1648_v19 }
 0xeca   : > { %1992 = vmatmul.mubr.f32.vlgmr.msra.gmra.mxu1 %v1659_v30 }
 0xf8a   : > { %v1732_v23 = vpop.f32.mrf.mxu1 }
 0xf8b   : > { %v1733_v31 = vadd.f32 %v1823_v8, %v1732_v23 }
 0xf8c   : > { %v1993_v32 = vpop.f32.mrf.mxu1 }
 0xf8d   : > { %v1736_v33 = vadd.f32 %v1733_v31, %v2280_v44 }
 0xf8f   : > { %1737 = vst.msk [vmem:[%s435_s15] sm:$0xff] %vm439_vm0, %v1736_v33 }
 0xf90 PF: > { %s23_s25 = sadd.s32 1, %s2043_s25  }
 0xf91   : > { %p20_p4 = scmp.ge.s32.totalorder %s23_s25, 4  }
 0xf93   :  { %22 = sbr.rel (!%p20_p4) target bundleno = 1 (0x1), region = 102 }

// kernel: constrained_seed_generator_forward.19
= control target key start
LH: loop header
LB: loop body
LE: loop exit
PB: predicated region body
PF: predicated region fallthrough
CT: control target
= control target key end

     0   :  { %vm47_vm0 = vcmask 654336   ;;  %vm160_vm1 = vcmask 261120   ;;  %vm271_vm2 = vcmask 130048   ;;  %vm369_vm3 = vcmask 23552   ;;  %s596_s1 = inlined_call_operand.vmem [shape: f32[80,32], index: 1, kind: input, shape index: {}]   ;;  %s597_s0 = inlined_call_operand.vmem [shape: f32[32,80], index: 0, kind: input, shape index: {}]   ;;  %s598_s3 = inlined_call_operand.vmem [shape: f32[32,16], index: 3, kind: input, shape index: {}]   ;;  %s599_s5 = inlined_call_operand.vmem [shape: f32[16,3], index: 5, kind: input, shape index: {}]   ;;  %s600_s2 = inlined_call_operand.vmem [shape: f32[1,32], index: 2, kind: input, shape index: {}]   ;;  %s601_s4 = inlined_call_operand.vmem [shape: f32[1,16], index: 4, kind: input, shape index: {}]   ;;  %s602_s6 = inlined_call_operand.vmem [shape: f32[1,3], index: 6, kind: input, shape index: {}]   ;;  %s603_s7 = inlined_call_operand.vmem [shape: f32[32,3], index: 7, kind: output, shape index: {}]  }
   0x1   :  { %v39_v0 = vld [vmem:[%s596_s1 + $0x48] sm:$0xff]  ;;  %v38_v1 = vld [vmem:[%s596_s1 + $0x40] sm:$0xff]  ;;  %v37_v2 = vld [vmem:[%s596_s1 + $0x38] sm:$0xff] }
   0x2   :  { %421 = vmatprep.subr.mxu0 %v39_v0  ;;  %v26_v3 = vld [vmem:[%s597_s0] sm:$0xff]  ;;  %v36_v4 = vld [vmem:[%s596_s1 + $0x30] sm:$0xff]  ;;  %v35_v5 = vld [vmem:[%s596_s1 + $0x28] sm:$0xff] }
   0x3   :  { %422 = vmatpush3.msra.mxu0 %v39_v0  ;;  %441 = vmatprep.mubr.msk.f32.mxu0 %vm47_vm0, %v26_v3  ;;  %v34_v6 = vld [vmem:[%s596_s1 + $0x20] sm:$0xff]  ;;  %v33_v7 = vld [vmem:[%s596_s1 + $0x18] sm:$0xff]  ;;  %v32_v8 = vld [vmem:[%s596_s1 + $0x10] sm:$0xff] }
   0x4   :  { %423 = vmatprep.subr.mxu0 %v38_v1  ;;  %v31_v9 = vld [vmem:[%s596_s1 + $0x8] sm:$0xff]  ;;  %v30_v10 = vld [vmem:[%s596_s1] sm:$0xff]  ;;  %v28_v12 = vld [vmem:[%s597_s0 + $0x10] sm:$0xff] }
   0x5   :  { %424 = vmatpush3.msra.mxu0 %v38_v1  ;;  %v27_v11 = vld [vmem:[%s597_s0 + $0x8] sm:$0xff]  ;;  %v29_v13 = vld [vmem:[%s597_s0 + $0x18] sm:$0xff]  ;;  %v151_v15 = vld [vmem:[%s598_s3 + $0x10] sm:$0xff] }
   0x6   :  { %425 = vmatprep.subr.mxu0 %v37_v2  ;;  %v152_v14 = vld [vmem:[%s598_s3 + $0x18] sm:$0xff]  ;;  %v150_v16 = vld [vmem:[%s598_s3 + $0x8] sm:$0xff]  ;;  %v149_v17 = vld [vmem:[%s598_s3] sm:$0xff] }
   0x7   :  { %426 = vmatpush3.msra.mxu0 %v37_v2  ;;  %447 = vmatprep.subr.mxu1 %v152_v14  ;;  %v263_v18 = vld [vmem:[%s599_s5 + $0x8] sm:$0xff]  ;;  %v378_v19 = vld [vmem:[%s600_s2] ss:$0 sm:$0xff] }
   0x8   :  { %427 = vmatprep.subr.mxu0 %v36_v4  ;;  %448 = vmatpush3.msra.mxu1 %v152_v14  ;;  %v262_v32 = vld [vmem:[%s599_s5] sm:$0xff] }
   0x9   :  { %428 = vmatpush3.msra.mxu0 %v36_v4  ;;  %449 = vmatprep.subr.mxu1 %v151_v15  ;;  %v383_v33 = vld [vmem:[%s601_s4] ss:$0 sm:$0xff] }
   0xa   :  { %429 = vmatprep.subr.mxu0 %v35_v5  ;;  %450 = vmatpush3.msra.mxu1 %v151_v15  ;;  %v388_v46 = vld [vmem:[%s602_s6] ss:$0 sm:$0xff] }
   0xb   :  { %430 = vmatpush3.msra.mxu0 %v35_v5  ;;  %451 = vmatprep.subr.mxu1 %v150_v16 }
   0xc   :  { %431 = vmatprep.subr.mxu0 %v34_v6  ;;  %452 = vmatpush3.msra.mxu1 %v150_v16 }
   0xd   :  { %432 = vmatpush3.msra.mxu0 %v34_v6  ;;  %453 = vmatprep.subr.mxu1 %v149_v17 }
   0xe   :  { %433 = vmatprep.subr.mxu0 %v33_v7  ;;  %454 = vmatpush3.msra.mxu1 %v149_v17 }
   0xf   :  { %434 = vmatpush3.msra.mxu0 %v33_v7  ;;  %461 = vmatprep.subr.mxu1 %v263_v18 }
  0x10   :  { %435 = vmatprep.subr.mxu0 %v32_v8 }
  0x11   :  { %436 = vmatpush3.msra.mxu0 %v32_v8 }
  0x12   :  { %437 = vmatprep.subr.mxu0 %v31_v9 }
  0x13   :  { %438 = vmatpush3.msra.mxu0 %v31_v9 }
  0x14   :  { %439 = vmatprep.subr.mxu0 %v30_v10 }
  0x15   :  { %440 = vmatpush3.msra.mxu0 %v30_v10 }
  0x16   :  { %442 = vmatmul.mubr.msk.f32.vlgmr.msra.gmra.mxu0 %vm47_vm0, %v27_v11 }
  0x17   :  { %444 = vmatprep.mubr.msk.f32.mxu0 %vm47_vm0, %v28_v12 }
  0x1a   :  { %445 = vmatmul.mubr.msk.f32.gmra.mxu0 %vm47_vm0, %v29_v13 }
  0xd6   :  { %v443_v20 = vpop.f32.mrf.mxu0 }
  0xd7   :  { %v132_v21 = vadd.f32 %v443_v20, %v378_v19 }
  0xd8   :  { %v126_v22 = vpop.f32.mrf.mxu0 }
  0xd9   :  { %v127_v23 = vadd.f32 %v378_v19, %v126_v22  ;;  %v146_v26 = vmax.f32 %v132_v21, 0.0 }
  0xda   :  { %v446_v24 = vpop.f32.mrf.mxu0 }
  0xdb   :  { %v145_v25 = vmax.f32 %v127_v23, 0.0  ;;  %v142_v27 = vadd.f32 %v446_v24, %v378_v19 }
  0xdc   :  { %v136_v28 = vpop.f32.mrf.mxu0 }
  0xdd   :  { %v137_v29 = vadd.f32 %v378_v19, %v136_v28  ;;  %455 = vmatprep.mubr.msk.f32.mxu1 %vm160_vm1, %v145_v25  ;;  %v148_v31 = vmax.f32 %v142_v27, 0.0 }
  0xde   :  { %456 = vmatmul.mubr.msk.f32.vlgmr.msra.gmra.mxu1 %vm160_vm1, %v146_v26 }
  0xdf   :  { %v147_v30 = vmax.f32 %v137_v29, 0.0  ;;  %462 = vmatpush3.msra.mxu1 %v263_v18 }
  0xe0   :  { %463 = vmatprep.subr.mxu1 %v262_v32 }
  0xe1   :  { %458 = vmatprep.mubr.msk.f32.mxu1 %vm160_vm1, %v147_v30  ;;  %464 = vmatpush3.msra.mxu1 %v262_v32 }
  0xe2   :  { %459 = vmatmul.mubr.msk.f32.gmra.mxu1 %vm160_vm1, %v148_v31 }
 0x19e   :  { %v457_v34 = vpop.f32.mrf.mxu1 }
 0x19f   :  { %v245_v35 = vadd.f32 %v457_v34, %v383_v33 }
 0x1a0   :  { %v239_v36 = vpop.f32.mrf.mxu1 }
 0x1a1   :  { %v240_v37 = vadd.f32 %v383_v33, %v239_v36  ;;  %v259_v40 = vmax.f32 %v245_v35, 0.0 }
 0x1a2   :  { %v460_v38 = vpop.f32.mrf.mxu1 }
 0x1a3   :  { %v258_v39 = vmax.f32 %v240_v37, 0.0  ;;  %v255_v41 = vadd.f32 %v460_v38, %v383_v33 }
 0x1a4   :  { %v249_v42 = vpop.f32.mrf.mxu1 }
 0x1a5   :  { %v250_v43 = vadd.f32 %v383_v33, %v249_v42  ;;  %465 = vmatprep.mubr.msk.f32.mxu1 %vm271_vm2, %v258_v39  ;;  %v261_v45 = vmax.f32 %v255_v41, 0.0 }
 0x1a6   :  { %466 = vmatmul.mubr.msk.f32.vlgmr.msra.gmra.mxu1 %vm271_vm2, %v259_v40 }
 0x1a7   :  { %v260_v44 = vmax.f32 %v250_v43, 0.0 }
 0x1a9   :  { %468 = vmatprep.mubr.msk.f32.mxu1 %vm271_vm2, %v260_v44 }
 0x1aa   :  { %469 = vmatmul.mubr.msk.f32.gmra.mxu1 %vm271_vm2, %v261_v45 }
 0x266   :  { %v467_v47 = vpop.f32.mrf.mxu1 }
 0x267   :  { %v356_v48 = vadd.f32 %v467_v47, %v388_v46 }
 0x268   :  { %v350_v49 = vpop.f32.mrf.mxu1 }
 0x269   :  { %371 = vst.msk [vmem:[%s603_s7 + $0x8] sm:$0xff] %vm369_vm3, %v356_v48  ;;  %v351_v50 = vadd.f32 %v388_v46, %v350_v49 }
 0x26a   :  { %v470_v51 = vpop.f32.mrf.mxu1 }
 0x26b   :  { %370 = vst.msk [vmem:[%s603_s7] sm:$0xff] %vm369_vm3, %v351_v50  ;;  %v366_v52 = vadd.f32 %v470_v51, %v388_v46 }
 0x26c   :  { %v360_v53 = vpop.f32.mrf.mxu1 }
 0x26d   :  { %373 = vst.msk [vmem:[%s603_s7 + $0x18] sm:$0xff] %vm369_vm3, %v366_v52  ;;  %v361_v54 = vadd.f32 %v388_v46, %v360_v53 }
 0x26f   :  { %372 = vst.msk [vmem:[%s603_s7 + $0x10] sm:$0xff] %vm369_vm3, %v361_v54 }

// kernel: constrained_seed_generator_forward.18
= control target key start
LH: loop header
LB: loop body
LE: loop exit
PB: predicated region body
PF: predicated region fallthrough
CT: control target
= control target key end

     0   :  { %v346_v0 = vmov 0.0   ;;  %vm347_vm0 = vmmov 0   ;;  %vm40_vm1 = vcmask 392192   ;;  %vm126_vm2 = vcmask 261120   ;;  %s442_s1 = inlined_call_operand.vmem [shape: f32[48,32], index: 1, kind: input, shape index: {}]   ;;  %s443_s3 = inlined_call_operand.vmem [shape: f32[32,16], index: 3, kind: input, shape index: {}]   ;;  %s444_s0 = inlined_call_operand.vmem [shape: f32[2,48], index: 0, kind: input, shape index: {}]   ;;  %s445_s2 = inlined_call_operand.vmem [shape: f32[1,32], index: 2, kind: input, shape index: {}]   ;;  %s446_s5 = inlined_call_operand.vmem [shape: f32[16,3], index: 5, kind: input, shape index: {}]   ;;  %s447_s4 = inlined_call_operand.vmem [shape: f32[1,16], index: 4, kind: input, shape index: {}]   ;;  %s448_s6 = inlined_call_operand.vmem [shape: f32[1,3], index: 6, kind: input, shape index: {}]   ;;  %s449_s7 = inlined_call_operand.vmem [shape: f32[2,3], index: 7, kind: output, shape index: {}]  }
   0x1   :  { %311 = vmatprep.subr.mxu0 %v346_v0  ;;  %v32_v1 = vld [vmem:[%s442_s1 + $0x28] sm:$0xff]  ;;  %v31_v2 = vld [vmem:[%s442_s1 + $0x20] sm:$0xff]  ;;  %323 = vmatprep.mubr.msk.f32.mxu0 %vm347_vm0, %v346_v0  ;;  %v30_v3 = vld [vmem:[%s442_s1 + $0x18] sm:$0xff]  ;;  %vm210_vm3 = vcmask 130048   ;;  %vm284_vm4 = vcmask 17408  }
   0x2   :  { %312 = vmatpush3.msra.mxu0 %v32_v1  ;;  %326 = vmatprep.subr.mxu1 %v346_v0  ;;  %v118_v4 = vld [vmem:[%s443_s3 + $0x18] sm:$0xff]  ;;  %v29_v5 = vld [vmem:[%s442_s1 + $0x10] sm:$0xff]  ;;  %v28_v6 = vld [vmem:[%s442_s1 + $0x8] sm:$0xff] }
   0x3   :  { %313 = vmatprep.subr.mxu0 %v346_v0  ;;  %334 = vmatprep.mubr.msk.f32.mxu1 %vm347_vm0, %v346_v0  ;;  %v27_v7 = vld [vmem:[%s442_s1] sm:$0xff]  ;;  %v117_v9 = vld [vmem:[%s443_s3 + $0x10] sm:$0xff]  ;;  %v116_v10 = vld [vmem:[%s443_s3 + $0x8] sm:$0xff] }
   0x4   :  { %314 = vmatpush3.msra.mxu0 %v31_v2  ;;  %327 = vmatpush3.msra.mxu1 %v118_v4  ;;  %v26_v8 = vld [vmem:[%s444_s0] sm:$0x3]  ;;  %v202_v17 = vld [vmem:[%s446_s5 + $0x8] sm:$0xff] }
   0x5   :  { %315 = vmatprep.subr.mxu0 %v346_v0  ;;  %328 = vmatprep.subr.mxu1 %v346_v0  ;;  %v115_v11 = vld [vmem:[%s443_s3] sm:$0xff] }
   0x6   :  { %316 = vmatpush3.msra.mxu0 %v30_v3  ;;  %329 = vmatpush3.msra.mxu1 %v117_v9  ;;  %v290_v12 = vld [vmem:[%s445_s2] ss:$0 sm:$0xff] }
   0x7   :  { %317 = vmatprep.subr.mxu0 %v346_v0  ;;  %330 = vmatprep.subr.mxu1 %v346_v0  ;;  %v201_v18 = vld [vmem:[%s446_s5] sm:$0xff] }
   0x8   :  { %318 = vmatpush3.msra.mxu0 %v29_v5  ;;  %331 = vmatpush3.msra.mxu1 %v116_v10  ;;  %v292_v19 = vld [vmem:[%s447_s4] ss:$0 sm:$0xff] }
   0x9   :  { %319 = vmatprep.subr.mxu0 %v346_v0  ;;  %332 = vmatprep.subr.mxu1 %v346_v0  ;;  %v294_v24 = vld [vmem:[%s448_s6] ss:$0 sm:$0xff] }
   0xa   :  { %320 = vmatpush3.msra.mxu0 %v28_v6  ;;  %333 = vmatpush3.msra.mxu1 %v115_v11 }
   0xb   :  { %321 = vmatprep.subr.mxu0 %v346_v0  ;;  %337 = vmatprep.subr.mxu1 %v346_v0 }
   0xc   :  { %322 = vmatpush3.msra.mxu0 %v27_v7 }
   0xd   :  { %324 = vmatmul.mubr.msk.f32.vlgmr.msra.gmra.mxu0 %vm40_vm1, %v26_v8 }
  0xcd   :  { %v110_v13 = vpop.f32.mrf.mxu0 }
  0xce   :  { %v111_v14 = vadd.f32 %v290_v12, %v110_v13 }
  0xcf   :  { %v325_v15 = vpop.f32.mrf.mxu0 }
  0xd0   :  { %v114_v16 = vmax.f32 %v111_v14, 0.0 }
  0xd2   :  { %335 = vmatmul.mubr.msk.f32.vlgmr.msra.gmra.mxu1 %vm126_vm2, %v114_v16 }
  0xd3   :  { %341 = vmatprep.mubr.msk.f32.mxu1 %vm347_vm0, %v346_v0  ;;  %338 = vmatpush3.msra.mxu1 %v202_v17 }
  0xd4   :  { %339 = vmatprep.subr.mxu1 %v346_v0 }
  0xd5   :  { %340 = vmatpush3.msra.mxu1 %v201_v18 }
 0x192   :  { %v196_v20 = vpop.f32.mrf.mxu1 }
 0x193   :  { %v197_v21 = vadd.f32 %v292_v19, %v196_v20 }
 0x194   :  { %v336_v22 = vpop.f32.mrf.mxu1 }
 0x195   :  { %v200_v23 = vmax.f32 %v197_v21, 0.0 }
 0x197   :  { %342 = vmatmul.mubr.msk.f32.vlgmr.msra.gmra.mxu1 %vm210_vm3, %v200_v23 }
 0x257   :  { %v280_v25 = vpop.f32.mrf.mxu1 }
 0x258   :  { %v281_v26 = vadd.f32 %v294_v24, %v280_v25 }
 0x259   :  { %v343_v27 = vpop.f32.mrf.mxu1 }
 0x25a   :  { %285 = vst.msk [vmem:[%s449_s7] sm:$0x3] %vm284_vm4, %v281_v26 }

</bundles_post_ra>
